<compile_context>
chip_gen: v5e
topology: v5e:2x2
jax: 0.10.0
libtpu: 0.0.40
codegen_flags: <defaults>
</compile_context>

<pallas_src>
import functools
import math

import jax
import jax.numpy as jnp
from jax import lax
from jax.experimental import pallas as pl
from jax.experimental.pallas import tpu as pltpu


def _round_up(x, m):
    return ((x + m - 1) // m) * m


def _supcon_kernel(featr_ref, featc_ref, labr_ref, labc_ref, pair_ref,
                   loss_ref, lossn_ref,
                   m_acc, z_acc, cnt_acc, sp_acc, wpp_acc, sa_acc, wpa_acc,
                   *, b_real, temperature, base_temperature, mask_weight):
    i = pl.program_id(0)
    j = pl.program_id(1)
    nj = pl.num_programs(1)
    tm, tn = pair_ref.shape

    # ---- per-row-tile accumulator init (first column tile) -----------------
    @pl.when(j == 0)
    def _():
        m_acc[...] = jnp.full_like(m_acc, -1e30)
        z_acc[...] = jnp.zeros_like(z_acc)
        cnt_acc[...] = jnp.zeros_like(cnt_acc)
        sp_acc[...] = jnp.zeros_like(sp_acc)
        wpp_acc[...] = jnp.zeros_like(wpp_acc)
        sa_acc[...] = jnp.zeros_like(sa_acc)
        wpa_acc[...] = jnp.zeros_like(wpa_acc)

    # ---- Gram tile on the MXU: [tm, D] x [D, tn] (no per-tile transpose) ----
    adc = lax.dot_general(
        featr_ref[...], featc_ref[...],
        (((1,), (0,)), ((), ())),
        preferred_element_type=jnp.float32) * (1.0 / temperature)     # [tm, tn]

    # ---- masks from int32 labels + global indices (no eye(B) HBM input) ----
    row_ids = i * tm + lax.broadcasted_iota(jnp.int32, (tm, tn), 0)
    col_ids = j * tn + lax.broadcasted_iota(jnp.int32, (tm, tn), 1)
    valid_c = col_ids < b_real                       # mask out padded columns
    non_diag = row_ids != col_ids                    # logits_mask (no self)
    same_b = (labr_ref[...] == labc_ref[...]) & valid_c   # same label (incl diag)
    same = same_b.astype(jnp.float32)
    pos = (same_b & non_diag).astype(jnp.float32)          # positives
    lmv = (non_diag & valid_c).astype(jnp.float32)          # valid non-self

    pairw = 1.0 + pair_ref[...].astype(jnp.float32) * mask_weight

    # ---- online logsumexp over the contrast (column) axis -------------------
    # Max over the raw tile (padded cols contribute adc=0 which only raises the
    # shift -> still numerically exact since the shift cancels in the LSE).
    m_old = m_acc[...]
    m_new = jnp.maximum(m_old, jnp.max(adc, axis=1, keepdims=True))
    z_acc[...] = (jnp.exp(m_old - m_new) * z_acc[...]
                  + jnp.sum(jnp.exp(adc - m_new) * lmv, axis=1, keepdims=True))
    m_acc[...] = m_new

    # ---- weighted partial sums (log_prob never materialized) ----------------
    wpos = pos * pairw
    wall = lmv * pairw
    sp_acc[...] += jnp.sum(wpos * adc, axis=1, keepdims=True)
    wpp_acc[...] += jnp.sum(wpos, axis=1, keepdims=True)
    sa_acc[...] += jnp.sum(wall * adc, axis=1, keepdims=True)
    wpa_acc[...] += jnp.sum(wall, axis=1, keepdims=True)
    cnt_acc[...] += jnp.sum(same, axis=1, keepdims=True)

    # ---- finalize per-row losses on the last column tile --------------------
    @pl.when(j == nj - 1)
    def _():
        lse = m_acc[...] + jnp.log(z_acc[...])                 # [tm, 1]
        # n_pos / n_neg from a single reduction (cnt includes the diagonal).
        # Like the PyTorch module, n_pos == 0 (a label seen once) yields inf/nan.
        n_pos = cnt_acc[...] - 1.0
        n_neg = float(b_real) - cnt_acc[...]
        s_pos = sp_acc[...]
        wp_pos = wpp_acc[...]
        s_neg = sa_acc[...] - s_pos
        wp_neg = wpa_acc[...] - wp_pos
        scale = -(temperature / base_temperature)
        loss_ref[...] = scale * (s_pos - lse * wp_pos) / n_pos
        lossn_ref[...] = scale * (s_neg - lse * wp_neg) / n_neg


def supcon_loss_pair_pn_mask(features, labels, pair=None,
                             temperature=0.07, mask_weight=1.0,
                             base_temperature=0.07,
                             tm=None, tn=None,
                             matmul_dtype=jnp.bfloat16,
                             interpret=False):
    """Returns (loss, lossn) scalars matching SupConLossPairPNMask.forward."""
    assert features.ndim == 2, "pass features as [bsz, dim]"
    B, D = features.shape
    features = features.astype(jnp.float32)
    labels = labels.reshape(B).astype(jnp.int32)
    if pair is None:
        pair = jnp.zeros((B, B), jnp.float32)

    # Lane-dense tiles: tn multiple of 128, tm multiple of 8 (both here are
    # multiples of 128).  Users with large B should raise tn (e.g. 512-1024).
    b128 = _round_up(B, 128)
    if tn is None:
        tn = min(256, b128)
    if tm is None:
        tm = min(128, b128)
    assert tn % 128 == 0 and tm % 8 == 0
    b_pad = _round_up(B, (tm * tn) // math.gcd(tm, tn))
    pad = b_pad - B

    # Padded rows/cols: zero features, sentinel labels, zero pair weight.
    feat_p = jnp.pad(features, ((0, pad), (0, 0)))
    lab_p = jnp.pad(labels, (0, pad), constant_values=jnp.iinfo(jnp.int32).min)
    pair_p = jnp.pad(pair.astype(jnp.bfloat16), ((0, pad), (0, pad)))

    feat_m = feat_p.astype(matmul_dtype)        # [B_pad, D]  row (anchor) operand
    feat_t = feat_m.T                           # [D, B_pad]  col (contrast) operand
    lab_row = lab_p.reshape(b_pad, 1)
    lab_col = lab_p.reshape(1, b_pad)

    grid = (b_pad // tm, b_pad // tn)

    kernel = functools.partial(
        _supcon_kernel,
        b_real=int(B),
        temperature=float(temperature),
        base_temperature=float(base_temperature),
        mask_weight=float(mask_weight),
    )

    loss_rows, lossn_rows = pl.pallas_call(
        kernel,
        out_shape=(jax.ShapeDtypeStruct((b_pad, 1), jnp.float32),
                   jax.ShapeDtypeStruct((b_pad, 1), jnp.float32)),
        grid_spec=pltpu.PrefetchScalarGridSpec(
            num_scalar_prefetch=0,
            grid=grid,
            in_specs=[
                pl.BlockSpec((tm, D), lambda i, j: (i, 0)),   # anchor features
                pl.BlockSpec((D, tn), lambda i, j: (0, j)),   # contrast features^T
                pl.BlockSpec((tm, 1), lambda i, j: (i, 0)),   # anchor labels
                pl.BlockSpec((1, tn), lambda i, j: (0, j)),   # contrast labels
                pl.BlockSpec((tm, tn), lambda i, j: (i, j)),  # pair mask (bf16)
            ],
            out_specs=(
                pl.BlockSpec((tm, 1), lambda i, j: (i, 0)),
                pl.BlockSpec((tm, 1), lambda i, j: (i, 0)),
            ),
            scratch_shapes=[pltpu.VMEM((tm, 1), jnp.float32) for _ in range(7)],
        ),
        compiler_params=pltpu.CompilerParams(
            dimension_semantics=("parallel", "arbitrary"),
            vmem_limit_bytes=48 * 1024 * 1024,   # above 16/32 MiB defaults, safe on v7x
        ),
        interpret=interpret,
    )(feat_m, feat_t, lab_row, lab_col, pair_p)

    # Final mean over the real anchors only (padded rows are simply dropped).
    loss = jnp.mean(loss_rows[:B, 0])
    lossn = jnp.mean(lossn_rows[:B, 0])
    return loss, lossn


def _reference(features, labels, pair, temperature=0.07, mask_weight=1.0,
               base_temperature=0.07):
    """Pure-JAX transcription of the PyTorch module (f32)."""
    B = features.shape[0]
    features = features.astype(jnp.float32)
    lab = labels.reshape(-1, 1)
    mask_label = (lab == lab.T).astype(jnp.float32)
    maskn_label = 1.0 - mask_label
    mask_pair = 1.0 + pair.astype(jnp.float32) * mask_weight
    adc = jnp.matmul(features, features.T,
                     precision=jax.lax.Precision.HIGHEST) / temperature
    logits = adc - jnp.max(adc, axis=1, keepdims=True)
    logits_mask = 1.0 - jnp.eye(B, dtype=jnp.float32)
    mask = mask_label * logits_mask
    exp_logits = jnp.exp(logits) * logits_mask
    log_prob = logits - jnp.log(exp_logits.sum(1, keepdims=True))
    mlpp = (mask * mask_pair * log_prob).sum(1) / mask.sum(1)
    mlpn = (maskn_label * mask_pair * log_prob).sum(1) / maskn_label.sum(1)
    scale = -(temperature / base_temperature)
    return jnp.mean(scale * mlpp), jnp.mean(scale * mlpn)


if __name__ == "__main__":
    key = jax.random.PRNGKey(0)
    k1, k2, k3, k4 = jax.random.split(key, 4)

    # ---------- Case 1: tiny shape (single tile), exact f32 matmul -----------
    B1, D1 = 8, 32
    f1 = jax.random.normal(k1, (B1, D1), dtype=jnp.float32)
    f1 = f1 / jnp.linalg.norm(f1, axis=1, keepdims=True)
    lab1 = jnp.array([0, 0, 1, 1, 2, 2, 0, 1], dtype=jnp.int32)
    diff1 = (lab1[:, None] != lab1[None, :]).astype(jnp.float32)
    pair1 = diff1 * (jax.random.uniform(k2, (B1, B1)) > 0.5).astype(jnp.float32)

    loss1, lossn1 = supcon_loss_pair_pn_mask(f1, lab1, pair1,
                                             matmul_dtype=jnp.float32)
    jax.block_until_ready((loss1, lossn1))
    rl1, rn1 = _reference(f1, lab1, pair1)
    assert jnp.allclose(loss1, rl1, atol=2e-2, rtol=2e-2), (loss1, rl1)
    assert jnp.allclose(lossn1, rn1, atol=2e-2, rtol=2e-2), (lossn1, rn1)

    # ---------- Case 2: multi-tile grid (300 -> 384 pad, 3x3 grid), f32 ------
    B2, D2 = 300, 64
    f2 = jax.random.normal(k3, (B2, D2), dtype=jnp.float32)
    f2 = f2 / jnp.linalg.norm(f2, axis=1, keepdims=True)
    lab2 = jax.random.randint(k4, (B2,), 0, 7, dtype=jnp.int32)
    diff2 = (lab2[:, None] != lab2[None, :]).astype(jnp.float32)
    pair2 = diff2 * (jax.random.uniform(k2, (B2, B2)) > 0.5).astype(jnp.float32)

    loss2, lossn2 = supcon_loss_pair_pn_mask(f2, lab2, pair2, tm=128, tn=128,
                                             matmul_dtype=jnp.float32)
    jax.block_until_ready((loss2, lossn2))
    rl2, rn2 = _reference(f2, lab2, pair2)
    assert jnp.allclose(loss2, rl2, atol=2e-2, rtol=2e-2), (loss2, rl2)
    assert jnp.allclose(lossn2, rn2, atol=2e-2, rtol=2e-2), (lossn2, rn2)

    # ---------- Case 3: default fast path (bf16 Gram matmul, f32 accum) ------
    loss3, lossn3 = supcon_loss_pair_pn_mask(f2, lab2, pair2, tm=128, tn=128)
    jax.block_until_ready((loss3, lossn3))
    assert jnp.allclose(loss3, rl2, atol=5e-2, rtol=5e-2), (loss3, rl2)
    assert jnp.allclose(lossn3, rn2, atol=5e-2, rtol=5e-2), (lossn3, rn2)

    print("KERNEL_OK")
</pallas_src>

<mosaic_0001>
module attributes {stable_mosaic.version = 11 : i64} {
  func.func @_supcon_kernel(%arg0: i32, %arg1: i32, %arg2: memref<128x32xf32, #tpu.memory_space<vmem>>, %arg3: memref<32x128xf32, #tpu.memory_space<vmem>>, %arg4: memref<128x1xi32, #tpu.memory_space<vmem>>, %arg5: memref<1x128xi32, #tpu.memory_space<vmem>>, %arg6: memref<128x128xbf16, #tpu.memory_space<vmem>>, %arg7: memref<128x1xf32, #tpu.memory_space<vmem>>, %arg8: memref<128x1xf32, #tpu.memory_space<vmem>>, %arg9: memref<128x1xf32, #tpu.memory_space<vmem>>, %arg10: memref<128x1xf32, #tpu.memory_space<vmem>>, %arg11: memref<128x1xf32, #tpu.memory_space<vmem>>, %arg12: memref<128x1xf32, #tpu.memory_space<vmem>>, %arg13: memref<128x1xf32, #tpu.memory_space<vmem>>, %arg14: memref<128x1xf32, #tpu.memory_space<vmem>>, %arg15: memref<128x1xf32, #tpu.memory_space<vmem>>) attributes {dimension_semantics = [#tpu.dimension_semantics<parallel>, #tpu.dimension_semantics<arbitrary>], iteration_bounds = array<i64: 1, 1>, scalar_prefetch = 0 : i64, scratch_operands = 7 : i64, tpu.core_type = #tpu.core_type<tc>, window_params = [{transform_indices = @transform_0, window_bounds = array<i64: 128, 32>}, {transform_indices = @transform_1, window_bounds = array<i64: 32, 128>}, {transform_indices = @transform_2, window_bounds = array<i64: 128, 1>}, {transform_indices = @transform_3, window_bounds = array<i64: 1, 128>}, {transform_indices = @transform_4, window_bounds = array<i64: 128, 128>}, {transform_indices = @transform_5, window_bounds = array<i64: 128, 1>}, {transform_indices = @transform_6, window_bounds = array<i64: 128, 1>}]} {
    %c0_i32 = arith.constant 0 : i32
    %0 = arith.cmpi eq, %arg1, %c0_i32 : i32
    %1 = arith.extui %0 : i1 to i32
    %c0_i32_0 = arith.constant 0 : i32
    %2 = arith.cmpi ne, %1, %c0_i32_0 : i32
    scf.if %2 {
      %cst_51 = arith.constant -1.000000e+30 : f32
      %88 = vector.broadcast %cst_51 : f32 to vector<128x1xf32>
      %c0_52 = arith.constant 0 : index
      %c0_53 = arith.constant 0 : index
      %89 = vector.load %arg9[%c0_52, %c0_53] : memref<128x1xf32, #tpu.memory_space<vmem>>, vector<128x1xf32>
      tpu.vector_store %arg9[%c0_52, %c0_53], %88 {strides = array<i32>} : memref<128x1xf32, #tpu.memory_space<vmem>>, vector<128x1xf32>,
      %cst_54 = arith.constant 0.000000e+00 : f32
      %90 = vector.broadcast %cst_54 : f32 to vector<128x1xf32>
      %c0_55 = arith.constant 0 : index
      %c0_56 = arith.constant 0 : index
      %91 = vector.load %arg10[%c0_55, %c0_56] : memref<128x1xf32, #tpu.memory_space<vmem>>, vector<128x1xf32>
      tpu.vector_store %arg10[%c0_55, %c0_56], %90 {strides = array<i32>} : memref<128x1xf32, #tpu.memory_space<vmem>>, vector<128x1xf32>,
      %cst_57 = arith.constant 0.000000e+00 : f32
      %92 = vector.broadcast %cst_57 : f32 to vector<128x1xf32>
      %c0_58 = arith.constant 0 : index
      %c0_59 = arith.constant 0 : index
      %93 = vector.load %arg11[%c0_58, %c0_59] : memref<128x1xf32, #tpu.memory_space<vmem>>, vector<128x1xf32>
      tpu.vector_store %arg11[%c0_58, %c0_59], %92 {strides = array<i32>} : memref<128x1xf32, #tpu.memory_space<vmem>>, vector<128x1xf32>,
      %cst_60 = arith.constant 0.000000e+00 : f32
      %94 = vector.broadcast %cst_60 : f32 to vector<128x1xf32>
      %c0_61 = arith.constant 0 : index
      %c0_62 = arith.constant 0 : index
      %95 = vector.load %arg12[%c0_61, %c0_62] : memref<128x1xf32, #tpu.memory_space<vmem>>, vector<128x1xf32>
      tpu.vector_store %arg12[%c0_61, %c0_62], %94 {strides = array<i32>} : memref<128x1xf32, #tpu.memory_space<vmem>>, vector<128x1xf32>,
      %cst_63 = arith.constant 0.000000e+00 : f32
      %96 = vector.broadcast %cst_63 : f32 to vector<128x1xf32>
      %c0_64 = arith.constant 0 : index
      %c0_65 = arith.constant 0 : index
      %97 = vector.load %arg13[%c0_64, %c0_65] : memref<128x1xf32, #tpu.memory_space<vmem>>, vector<128x1xf32>
      tpu.vector_store %arg13[%c0_64, %c0_65], %96 {strides = array<i32>} : memref<128x1xf32, #tpu.memory_space<vmem>>, vector<128x1xf32>,
      %cst_66 = arith.constant 0.000000e+00 : f32
      %98 = vector.broadcast %cst_66 : f32 to vector<128x1xf32>
      %c0_67 = arith.constant 0 : index
      %c0_68 = arith.constant 0 : index
      %99 = vector.load %arg14[%c0_67, %c0_68] : memref<128x1xf32, #tpu.memory_space<vmem>>, vector<128x1xf32>
      tpu.vector_store %arg14[%c0_67, %c0_68], %98 {strides = array<i32>} : memref<128x1xf32, #tpu.memory_space<vmem>>, vector<128x1xf32>,
      %cst_69 = arith.constant 0.000000e+00 : f32
      %100 = vector.broadcast %cst_69 : f32 to vector<128x1xf32>
      %c0_70 = arith.constant 0 : index
      %c0_71 = arith.constant 0 : index
      %101 = vector.load %arg15[%c0_70, %c0_71] : memref<128x1xf32, #tpu.memory_space<vmem>>, vector<128x1xf32>
      tpu.vector_store %arg15[%c0_70, %c0_71], %100 {strides = array<i32>} : memref<128x1xf32, #tpu.memory_space<vmem>>, vector<128x1xf32>,
    } else {
    }
    %c0 = arith.constant 0 : index
    %c0_1 = arith.constant 0 : index
    %3 = vector.load %arg2[%c0, %c0_1] : memref<128x32xf32, #tpu.memory_space<vmem>>, vector<128x32xf32>
    %c0_2 = arith.constant 0 : index
    %c0_3 = arith.constant 0 : index
    %4 = vector.load %arg3[%c0_2, %c0_3] : memref<32x128xf32, #tpu.memory_space<vmem>>, vector<32x128xf32>
    %cst = arith.constant dense<0.000000e+00> : vector<128x128xf32>
    %5 = tpu.matmul %3, %4, %cst {dimension_numbers = #tpu.dot_dimension_numbers<[1], [0], [0], [1], [0, 0, 1, 1], [], []>} : vector<128x32xf32>, vector<32x128xf32>, vector<128x128xf32> -> vector<128x128xf32>
    %cst_4 = arith.constant 14.2857141 : f32
    %6 = vector.broadcast %cst_4 : f32 to vector<128x128xf32>
    %7 = arith.mulf %5, %6 : vector<128x128xf32>
    %c128_i32 = arith.constant 128 : i32
    %8 = arith.muli %arg0, %c128_i32 : i32
    %9 = tpu.iota {dimensions = array<i32: 0>} : vector<128x128xi32>
    %10 = vector.broadcast %8 : i32 to vector<128x128xi32>
    %11 = arith.addi %10, %9 : vector<128x128xi32>
    %c128_i32_5 = arith.constant 128 : i32
    %12 = arith.muli %arg1, %c128_i32_5 : i32
    %13 = tpu.iota {dimensions = array<i32: 1>} : vector<128x128xi32>
    %14 = vector.broadcast %12 : i32 to vector<128x128xi32>
    %15 = arith.addi %14, %13 : vector<128x128xi32>
    %c8_i32 = arith.constant 8 : i32
    %16 = vector.broadcast %c8_i32 : i32 to vector<128x128xi32>
    %17 = arith.cmpi slt, %15, %16 : vector<128x128xi32>
    %18 = arith.cmpi ne, %11, %15 : vector<128x128xi32>
    %c0_6 = arith.constant 0 : index
    %c0_7 = arith.constant 0 : index
    %19 = vector.load %arg4[%c0_6, %c0_7] : memref<128x1xi32, #tpu.memory_space<vmem>>, vector<128x1xi32>
    %c0_8 = arith.constant 0 : index
    %c0_9 = arith.constant 0 : index
    %20 = vector.load %arg5[%c0_8, %c0_9] : memref<1x128xi32, #tpu.memory_space<vmem>>, vector<1x128xi32>
    %21 = vector.broadcast %19 : vector<128x1xi32> to vector<128x128xi32>
    %22 = vector.broadcast %20 : vector<1x128xi32> to vector<128x128xi32>
    %23 = arith.cmpi eq, %21, %22 : vector<128x128xi32>
    %24 = arith.andi %23, %17 : vector<128x128xi1>
    %25 = arith.extui %24 : vector<128x128xi1> to vector<128x128xi32>
    %26 = arith.sitofp %25 : vector<128x128xi32> to vector<128x128xf32>
    %27 = arith.andi %24, %18 : vector<128x128xi1>
    %28 = arith.extui %27 : vector<128x128xi1> to vector<128x128xi32>
    %29 = arith.sitofp %28 : vector<128x128xi32> to vector<128x128xf32>
    %30 = arith.andi %18, %17 : vector<128x128xi1>
    %31 = arith.extui %30 : vector<128x128xi1> to vector<128x128xi32>
    %32 = arith.sitofp %31 : vector<128x128xi32> to vector<128x128xf32>
    %c0_10 = arith.constant 0 : index
    %c0_11 = arith.constant 0 : index
    %33 = vector.load %arg6[%c0_10, %c0_11] : memref<128x128xbf16, #tpu.memory_space<vmem>>, vector<128x128xbf16>
    %34 = arith.extf %33 : vector<128x128xbf16> to vector<128x128xf32>
    %cst_12 = arith.constant 1.000000e+00 : f32
    %35 = vector.broadcast %cst_12 : f32 to vector<128x128xf32>
    %36 = arith.mulf %34, %35 : vector<128x128xf32>
    %cst_13 = arith.constant 1.000000e+00 : f32
    %37 = vector.broadcast %cst_13 : f32 to vector<128x128xf32>
    %38 = arith.addf %37, %36 : vector<128x128xf32>
    %c0_14 = arith.constant 0 : index
    %c0_15 = arith.constant 0 : index
    %39 = vector.load %arg9[%c0_14, %c0_15] : memref<128x1xf32, #tpu.memory_space<vmem>>, vector<128x1xf32>
    %cst_16 = arith.constant dense<0xFF800000> : vector<128xf32>
    %40 = vector.multi_reduction <maximumf>, %7, %cst_16 [1] : vector<128x128xf32> to vector<128xf32>
    %41 = vector.shape_cast %40 : vector<128xf32> to vector<128x1xf32>
    %42 = arith.maximumf %39, %41 : vector<128x1xf32>
    %43 = arith.subf %39, %42 : vector<128x1xf32>
    %44 = math.exp %43 : vector<128x1xf32>
    %c0_17 = arith.constant 0 : index
    %c0_18 = arith.constant 0 : index
    %45 = vector.load %arg10[%c0_17, %c0_18] : memref<128x1xf32, #tpu.memory_space<vmem>>, vector<128x1xf32>
    %46 = arith.mulf %44, %45 : vector<128x1xf32>
    %47 = vector.broadcast %42 : vector<128x1xf32> to vector<128x128xf32>
    %48 = arith.subf %7, %47 : vector<128x128xf32>
    %49 = math.exp %48 : vector<128x128xf32>
    %50 = arith.mulf %49, %32 : vector<128x128xf32>
    %cst_19 = arith.constant dense<0.000000e+00> : vector<128xf32>
    %51 = vector.multi_reduction <add>, %50, %cst_19 [1] : vector<128x128xf32> to vector<128xf32>
    %52 = vector.shape_cast %51 : vector<128xf32> to vector<128x1xf32>
    %53 = arith.addf %46, %52 : vector<128x1xf32>
    %c0_20 = arith.constant 0 : index
    %c0_21 = arith.constant 0 : index
    %54 = vector.load %arg10[%c0_20, %c0_21] : memref<128x1xf32, #tpu.memory_space<vmem>>, vector<128x1xf32>
    tpu.vector_store %arg10[%c0_20, %c0_21], %53 {strides = array<i32>} : memref<128x1xf32, #tpu.memory_space<vmem>>, vector<128x1xf32>,
    %c0_22 = arith.constant 0 : index
    %c0_23 = arith.constant 0 : index
    %55 = vector.load %arg9[%c0_22, %c0_23] : memref<128x1xf32, #tpu.memory_space<vmem>>, vector<128x1xf32>
    tpu.vector_store %arg9[%c0_22, %c0_23], %42 {strides = array<i32>} : memref<128x1xf32, #tpu.memory_space<vmem>>, vector<128x1xf32>,
    %56 = arith.mulf %29, %38 : vector<128x128xf32>
    %57 = arith.mulf %32, %38 : vector<128x128xf32>
    %c0_24 = arith.constant 0 : index
    %c0_25 = arith.constant 0 : index
    %58 = vector.load %arg12[%c0_24, %c0_25] : memref<128x1xf32, #tpu.memory_space<vmem>>, vector<128x1xf32>
    %59 = arith.mulf %56, %7 : vector<128x128xf32>
    %cst_26 = arith.constant dense<0.000000e+00> : vector<128xf32>
    %60 = vector.multi_reduction <add>, %59, %cst_26 [1] : vector<128x128xf32> to vector<128xf32>
    %61 = vector.shape_cast %60 : vector<128xf32> to vector<128x1xf32>
    %62 = arith.addf %58, %61 : vector<128x1xf32>
    %c0_27 = arith.constant 0 : index
    %c0_28 = arith.constant 0 : index
    %63 = vector.load %arg12[%c0_27, %c0_28] : memref<128x1xf32, #tpu.memory_space<vmem>>, vector<128x1xf32>
    tpu.vector_store %arg12[%c0_27, %c0_28], %62 {strides = array<i32>} : memref<128x1xf32, #tpu.memory_space<vmem>>, vector<128x1xf32>,
    %c0_29 = arith.constant 0 : index
    %c0_30 = arith.constant 0 : index
    %64 = vector.load %arg13[%c0_29, %c0_30] : memref<128x1xf32, #tpu.memory_space<vmem>>, vector<128x1xf32>
    %cst_31 = arith.constant dense<0.000000e+00> : vector<128xf32>
    %65 = vector.multi_reduction <add>, %56, %cst_31 [1] : vector<128x128xf32> to vector<128xf32>
    %66 = vector.shape_cast %65 : vector<128xf32> to vector<128x1xf32>
    %67 = arith.addf %64, %66 : vector<128x1xf32>
    %c0_32 = arith.constant 0 : index
    %c0_33 = arith.constant 0 : index
    %68 = vector.load %arg13[%c0_32, %c0_33] : memref<128x1xf32, #tpu.memory_space<vmem>>, vector<128x1xf32>
    tpu.vector_store %arg13[%c0_32, %c0_33], %67 {strides = array<i32>} : memref<128x1xf32, #tpu.memory_space<vmem>>, vector<128x1xf32>,
    %c0_34 = arith.constant 0 : index
    %c0_35 = arith.constant 0 : index
    %69 = vector.load %arg14[%c0_34, %c0_35] : memref<128x1xf32, #tpu.memory_space<vmem>>, vector<128x1xf32>
    %70 = arith.mulf %57, %7 : vector<128x128xf32>
    %cst_36 = arith.constant dense<0.000000e+00> : vector<128xf32>
    %71 = vector.multi_reduction <add>, %70, %cst_36 [1] : vector<128x128xf32> to vector<128xf32>
    %72 = vector.shape_cast %71 : vector<128xf32> to vector<128x1xf32>
    %73 = arith.addf %69, %72 : vector<128x1xf32>
    %c0_37 = arith.constant 0 : index
    %c0_38 = arith.constant 0 : index
    %74 = vector.load %arg14[%c0_37, %c0_38] : memref<128x1xf32, #tpu.memory_space<vmem>>, vector<128x1xf32>
    tpu.vector_store %arg14[%c0_37, %c0_38], %73 {strides = array<i32>} : memref<128x1xf32, #tpu.memory_space<vmem>>, vector<128x1xf32>,
    %c0_39 = arith.constant 0 : index
    %c0_40 = arith.constant 0 : index
    %75 = vector.load %arg15[%c0_39, %c0_40] : memref<128x1xf32, #tpu.memory_space<vmem>>, vector<128x1xf32>
    %cst_41 = arith.constant dense<0.000000e+00> : vector<128xf32>
    %76 = vector.multi_reduction <add>, %57, %cst_41 [1] : vector<128x128xf32> to vector<128xf32>
    %77 = vector.shape_cast %76 : vector<128xf32> to vector<128x1xf32>
    %78 = arith.addf %75, %77 : vector<128x1xf32>
    %c0_42 = arith.constant 0 : index
    %c0_43 = arith.constant 0 : index
    %79 = vector.load %arg15[%c0_42, %c0_43] : memref<128x1xf32, #tpu.memory_space<vmem>>, vector<128x1xf32>
    tpu.vector_store %arg15[%c0_42, %c0_43], %78 {strides = array<i32>} : memref<128x1xf32, #tpu.memory_space<vmem>>, vector<128x1xf32>,
    %c0_44 = arith.constant 0 : index
    %c0_45 = arith.constant 0 : index
    %80 = vector.load %arg11[%c0_44, %c0_45] : memref<128x1xf32, #tpu.memory_space<vmem>>, vector<128x1xf32>
    %cst_46 = arith.constant dense<0.000000e+00> : vector<128xf32>
    %81 = vector.multi_reduction <add>, %26, %cst_46 [1] : vector<128x128xf32> to vector<128xf32>
    %82 = vector.shape_cast %81 : vector<128xf32> to vector<128x1xf32>
    %83 = arith.addf %80, %82 : vector<128x1xf32>
    %c0_47 = arith.constant 0 : index
    %c0_48 = arith.constant 0 : index
    %84 = vector.load %arg11[%c0_47, %c0_48] : memref<128x1xf32, #tpu.memory_space<vmem>>, vector<128x1xf32>
    tpu.vector_store %arg11[%c0_47, %c0_48], %83 {strides = array<i32>} : memref<128x1xf32, #tpu.memory_space<vmem>>, vector<128x1xf32>,
    %c0_i32_49 = arith.constant 0 : i32
    %85 = arith.cmpi eq, %arg1, %c0_i32_49 : i32
    %86 = arith.extui %85 : i1 to i32
    %c0_i32_50 = arith.constant 0 : i32
    %87 = arith.cmpi ne, %86, %c0_i32_50 : i32
    scf.if %87 {
      %c0_51 = arith.constant 0 : index
      %c0_52 = arith.constant 0 : index
      %88 = vector.load %arg9[%c0_51, %c0_52] : memref<128x1xf32, #tpu.memory_space<vmem>>, vector<128x1xf32>
      %c0_53 = arith.constant 0 : index
      %c0_54 = arith.constant 0 : index
      %89 = vector.load %arg10[%c0_53, %c0_54] : memref<128x1xf32, #tpu.memory_space<vmem>>, vector<128x1xf32>
      %90 = math.log %89 : vector<128x1xf32>
      %91 = arith.addf %88, %90 : vector<128x1xf32>
      %c0_55 = arith.constant 0 : index
      %c0_56 = arith.constant 0 : index
      %92 = vector.load %arg11[%c0_55, %c0_56] : memref<128x1xf32, #tpu.memory_space<vmem>>, vector<128x1xf32>
      %cst_57 = arith.constant 1.000000e+00 : f32
      %93 = vector.broadcast %cst_57 : f32 to vector<128x1xf32>
      %94 = arith.subf %92, %93 : vector<128x1xf32>
      %c0_58 = arith.constant 0 : index
      %c0_59 = arith.constant 0 : index
      %95 = vector.load %arg11[%c0_58, %c0_59] : memref<128x1xf32, #tpu.memory_space<vmem>>, vector<128x1xf32>
      %cst_60 = arith.constant 8.000000e+00 : f32
      %96 = vector.broadcast %cst_60 : f32 to vector<128x1xf32>
      %97 = arith.subf %96, %95 : vector<128x1xf32>
      %c0_61 = arith.constant 0 : index
      %c0_62 = arith.constant 0 : index
      %98 = vector.load %arg12[%c0_61, %c0_62] : memref<128x1xf32, #tpu.memory_space<vmem>>, vector<128x1xf32>
      %c0_63 = arith.constant 0 : index
      %c0_64 = arith.constant 0 : index
      %99 = vector.load %arg13[%c0_63, %c0_64] : memref<128x1xf32, #tpu.memory_space<vmem>>, vector<128x1xf32>
      %c0_65 = arith.constant 0 : index
      %c0_66 = arith.constant 0 : index
      %100 = vector.load %arg14[%c0_65, %c0_66] : memref<128x1xf32, #tpu.memory_space<vmem>>, vector<128x1xf32>
      %101 = arith.subf %100, %98 : vector<128x1xf32>
      %c0_67 = arith.constant 0 : index
      %c0_68 = arith.constant 0 : index
      %102 = vector.load %arg15[%c0_67, %c0_68] : memref<128x1xf32, #tpu.memory_space<vmem>>, vector<128x1xf32>
      %103 = arith.subf %102, %99 : vector<128x1xf32>
      %104 = arith.mulf %91, %99 : vector<128x1xf32>
      %105 = arith.subf %98, %104 : vector<128x1xf32>
      %cst_69 = arith.constant -1.000000e+00 : f32
      %106 = vector.broadcast %cst_69 : f32 to vector<128x1xf32>
      %107 = arith.mulf %106, %105 : vector<128x1xf32>
      %108 = arith.divf %107, %94 : vector<128x1xf32>
      %c0_70 = arith.constant 0 : index
      %c0_71 = arith.constant 0 : index
      %109 = vector.load %arg7[%c0_70, %c0_71] : memref<128x1xf32, #tpu.memory_space<vmem>>, vector<128x1xf32>
      tpu.vector_store %arg7[%c0_70, %c0_71], %108 {strides = array<i32>} : memref<128x1xf32, #tpu.memory_space<vmem>>, vector<128x1xf32>,
      %110 = arith.mulf %91, %103 : vector<128x1xf32>
      %111 = arith.subf %101, %110 : vector<128x1xf32>
      %cst_72 = arith.constant -1.000000e+00 : f32
      %112 = vector.broadcast %cst_72 : f32 to vector<128x1xf32>
      %113 = arith.mulf %112, %111 : vector<128x1xf32>
      %114 = arith.divf %113, %97 : vector<128x1xf32>
      %c0_73 = arith.constant 0 : index
      %c0_74 = arith.constant 0 : index
      %115 = vector.load %arg8[%c0_73, %c0_74] : memref<128x1xf32, #tpu.memory_space<vmem>>, vector<128x1xf32>
      tpu.vector_store %arg8[%c0_73, %c0_74], %114 {strides = array<i32>} : memref<128x1xf32, #tpu.memory_space<vmem>>, vector<128x1xf32>,
    } else {
    }
    return
  }
  func.func @transform_0(%arg0: i32, %arg1: i32) -> (i32, i32) {
    %c0_i32 = arith.constant 0 : i32
    %c0_i32_0 = arith.constant 0 : i32
    return %arg0, %c0_i32 : i32, i32
  }
  func.func @transform_1(%arg0: i32, %arg1: i32) -> (i32, i32) {
    %c0_i32 = arith.constant 0 : i32
    %c0_i32_0 = arith.constant 0 : i32
    return %c0_i32, %arg1 : i32, i32
  }
  func.func @transform_2(%arg0: i32, %arg1: i32) -> (i32, i32) {
    %c0_i32 = arith.constant 0 : i32
    %c0_i32_0 = arith.constant 0 : i32
    return %arg0, %c0_i32 : i32, i32
  }
  func.func @transform_3(%arg0: i32, %arg1: i32) -> (i32, i32) {
    %c0_i32 = arith.constant 0 : i32
    %c0_i32_0 = arith.constant 0 : i32
    return %c0_i32, %arg1 : i32, i32
  }
  func.func @transform_4(%arg0: i32, %arg1: i32) -> (i32, i32) {
    %c0_i32 = arith.constant 0 : i32
    return %arg0, %arg1 : i32, i32
  }
  func.func @transform_5(%arg0: i32, %arg1: i32) -> (i32, i32) {
    %c0_i32 = arith.constant 0 : i32
    %c0_i32_0 = arith.constant 0 : i32
    return %arg0, %c0_i32 : i32, i32
  }
  func.func @transform_6(%arg0: i32, %arg1: i32) -> (i32, i32) {
    %c0_i32 = arith.constant 0 : i32
    %c0_i32_0 = arith.constant 0 : i32
    return %arg0, %c0_i32 : i32, i32
  }
}

</mosaic_0001>

<bundles_post_ra>
// kernel: tpu_custom_call.1
= control target key start
LH: loop header
LB: loop body
LE: loop exit
PB: predicated region body
PF: predicated region fallthrough
CT: control target
= control target key end

     0   :  { %v2594_v0 = vmov 0   ;;  %vm159_vm0 = vcmask 261120   ;;  %v290_v37 = vlaneseq  ;;  %v5429_v50 = vmov 0  ;;  %s5334_s2 = inlined_call_operand.vmem [shape: s32[128,1], index: 2, kind: input, shape index: {}]   ;;  %s5335_s1 = inlined_call_operand.vmem [shape: f32[32,128], index: 1, kind: input, shape index: {}]   ;;  %s5336_s0 = inlined_call_operand.vmem [shape: f32[128,32], index: 0, kind: input, shape index: {}]   ;;  %s5337_s3 = inlined_call_operand.vmem [shape: s32[1,128], index: 3, kind: input, shape index: {}]   ;;  %s5338_s4 = inlined_call_operand.vmem [shape: bf16[128,128], index: 4, kind: input, shape index: {}]   ;;  %s5339_s5 = inlined_call_operand.vmem [shape: f32[128,1], index: 5, kind: output, shape index: {0}]   ;;  %s5340_s6 = inlined_call_operand.vmem [shape: f32[128,1], index: 6, kind: output, shape index: {1}]  }
   0x1   :  { %2431 = vset.pattern.permute.xlu1 %v2594_v0  ;;  %2430 = vset.pattern.permute.xlu0 %v2594_v0  ;;  %v348_v1 = vld [vmem:[%s5334_s2 + $0x10] sm:$0xff]  ;;  %v346_v2 = vld [vmem:[%s5334_s2] sm:$0xff]  ;;  %v158_v3 = vld [vmem:[%s5335_s1 + $0x18] sm:$0xff]  ;;  %v5432_v52 = vmov 0  ;;  %v5359_v53 = vmov 0.0  }
   0x2   :  { %370 = vperm.xlu1 %2431, %v348_v1   ;;  %364 = vperm.xlu0 %2430, %v346_v2   ;;  %v157_v4 = vld [vmem:[%s5335_s1 + $0x10] sm:$0xff]  ;;  %v156_v5 = vld [vmem:[%s5335_s1 + $0x8] sm:$0xff]  ;;  %v155_v6 = vld [vmem:[%s5335_s1] sm:$0xff]  ;;  %v2756_v38 = vshrl.u32 %v290_v37, 7  ;;  %v2767_v42 = vand.u32 127, %v290_v37  ;;  %v5435_v2 = vmov 0 }
   0x3   :  { %220 = vmatpush.msra.mxu0 %v158_v3  ;;  %2415 = vmatpush.msra.mxu1 %v158_v3  ;;  %v139_v7 = vld [vmem:[%s5336_s0] sm:$0xff]  ;;  %v349_v11 = vld [vmem:[%s5334_s2 + $0x18] sm:$0xff]  ;;  %v347_v12 = vld [vmem:[%s5334_s2 + $0x8] sm:$0xff] }
   0x4   :  { %2416 = vmatpush.msra.mxu2 %v158_v3  ;;  %2417 = vmatpush.msra.mxu3 %v158_v3  ;;  %v143_v8 = vld [vmem:[%s5336_s0 + $0x20] sm:$0xff]  ;;  %v140_v14 = vld [vmem:[%s5336_s0 + $0x8] sm:$0xff]  ;;  %v353_v18 = vld [vmem:[%s5334_s2 + $0x38] sm:$0xff]  ;;  %v2762_v40 = vadd.s32 16, %v2756_v38  ;;  %vm5356_vm2 = vcmp.lt.s32.totalorder %v2767_v42, 8  ;;  %vm5346_vm6 = vcmp.ne.s32.totalorder %v2756_v38, %v2767_v42  ;;  %v2814_v58 = vadd.s32 24, %v2756_v38 }
   0x5   :  { %221 = vmatpush.msra.mxu0 %v157_v4  ;;  %2418 = vmatpush.msra.mxu1 %v157_v4  ;;  %v147_v9 = vld [vmem:[%s5336_s0 + $0x40] sm:$0xff]  ;;  %v144_v15 = vld [vmem:[%s5336_s0 + $0x28] sm:$0xff]  ;;  %v352_v19 = vld [vmem:[%s5334_s2 + $0x30] sm:$0xff]  ;;  %v2818_v60 = vadd.s32 8, %v2756_v38 }
   0x6   :  { %2419 = vmatpush.msra.mxu2 %v157_v4  ;;  %2420 = vmatpush.msra.mxu3 %v157_v4  ;;  %v151_v10 = vld [vmem:[%s5336_s0 + $0x60] sm:$0xff]  ;;  %v148_v16 = vld [vmem:[%s5336_s0 + $0x48] sm:$0xff]  ;;  %v141_v21 = vld [vmem:[%s5336_s0 + $0x10] sm:$0xff]  ;;  %vm5347_vm1 = vcmp.ne.s32.totalorder %v2762_v40, %v2767_v42  ;;  %vm5344_vm10 = vcmp.ne.s32.totalorder %v2814_v58, %v2767_v42  ;;  %v5438_v4 = vmov 0 }
   0x7   :  { %222 = vmatpush.msra.mxu0 %v156_v5  ;;  %2421 = vmatpush.msra.mxu1 %v156_v5  ;;  %v350_v13 = vld [vmem:[%s5334_s2 + $0x20] sm:$0xff]  ;;  %v152_v17 = vld [vmem:[%s5336_s0 + $0x68] sm:$0xff]  ;;  %v145_v22 = vld [vmem:[%s5336_s0 + $0x30] sm:$0xff]  ;;  %vm5343_vm14 = vcmp.ne.s32.totalorder %v2818_v60, %v2767_v42 }
   0x8   :  { %2422 = vmatpush.msra.mxu2 %v156_v5  ;;  %2423 = vmatpush.msra.mxu3 %v156_v5  ;;  %v351_v20 = vld [vmem:[%s5334_s2 + $0x28] sm:$0xff]  ;;  %v149_v23 = vld [vmem:[%s5336_s0 + $0x50] sm:$0xff]  ;;  %v354_v27 = vld [vmem:[%s5334_s2 + $0x40] sm:$0xff] }
   0x9   :  { %223 = vmatpush.msra.mxu0 %v155_v6  ;;  %2424 = vmatpush.msra.mxu1 %v155_v6  ;;  %v153_v24 = vld [vmem:[%s5336_s0 + $0x70] sm:$0xff]  ;;  %v355_v26 = vld [vmem:[%s5334_s2 + $0x48] sm:$0xff]  ;;  %v142_v28 = vld [vmem:[%s5336_s0 + $0x18] sm:$0xff] }
   0xa   :  { %2425 = vmatpush.msra.mxu2 %v155_v6  ;;  %2426 = vmatpush.msra.mxu3 %v155_v6  ;;  %v356_v25 = vld [vmem:[%s5334_s2 + $0x50] sm:$0xff]  ;;  %v146_v29 = vld [vmem:[%s5336_s0 + $0x38] sm:$0xff]  ;;  %v359_v32 = vld [vmem:[%s5334_s2 + $0x68] sm:$0xff] }
   0xb   :  { %2296 = vmatmul.msk.f32.vlgmr.msra.gmra.mxu0 %vm159_vm0, %v139_v7  ;;  %2300 = vmatmul.msk.f32.vlgmr.msra.gmra.mxu1 %vm159_vm0, %v143_v8  ;;  %v150_v30 = vld [vmem:[%s5336_s0 + $0x58] sm:$0xff]  ;;  %v358_v33 = vld [vmem:[%s5334_s2 + $0x60] sm:$0xff]  ;;  %v360_v36 = vld [vmem:[%s5334_s2 + $0x70] sm:$0xff] }
   0xc   :  { %2304 = vmatmul.msk.f32.vlgmr.msra.gmra.mxu2 %vm159_vm0, %v147_v9  ;;  %2308 = vmatmul.msk.f32.vlgmr.msra.gmra.mxu3 %vm159_vm0, %v151_v10  ;;  %v154_v31 = vld [vmem:[%s5336_s0 + $0x78] sm:$0xff]  ;;  %v2408_v39 = vld [vmem:[%s5338_s4 + $0x8] sm:$0xff]   ;;  %v2377_v41 = vld [vmem:[%s5338_s4] sm:$0xff]   ;;  %v2864_v10 = vadd.s32 64, %v2756_v38 }
   0xd   :  { %373 = vperm.xlu1 %2431, %v349_v11   ;;  %367 = vperm.xlu0 %2430, %v347_v12   ;;  %v357_v34 = vld [vmem:[%s5334_s2 + $0x58] sm:$0xff]  ;;  %v2772_v43 = vld [vmem:[%s5337_s3] ss:$0 sm:$0xff]  ;;  %v2382_v44 = vunpack.c.l.bf16 %v2408_v39  ;;  %v2378_v46 = vunpack.c.l.bf16 %v2377_v41  ;;  %v2383_v59 = vunpack.c.h.bf16 %v2408_v39  ;;  %v2379_v62 = vunpack.c.h.bf16 %v2377_v41 }
   0xe   :  { %2432 = vset.pattern.permute.xlu2 %v2594_v0  ;;  %v361_v35 = vld [vmem:[%s5334_s2 + $0x78] sm:$0xff] }
   0xf   :  { %376 = vperm.xlu2 %2432, %v350_v13   ;;  %v2779_v49 = vadd.f32 1.0, %v2382_v44  ;;  %v2794_v51 = vadd.f32 1.0, %v2378_v46  ;;  %v2824_v1 = vadd.f32 1.0, %v2383_v59  ;;  %v2839_v3 = vadd.f32 1.0, %v2379_v62 }
  0x10   :  { %v5450_v62 = vmov 0 }
  0x13   :  { %2297 = vmatmul.msk.f32.gmra.mxu0 %vm159_vm0, %v140_v14  ;;  %2301 = vmatmul.msk.f32.gmra.mxu1 %vm159_vm0, %v144_v15  ;;  %v2873_v14 = vld [vmem:[%s5338_s4 + $0x20] sm:$0xff]   ;;  %v2876_v15 = vadd.s32 32, %v2756_v38 }
  0x14   :  { %2305 = vmatmul.msk.f32.gmra.mxu2 %vm159_vm0, %v148_v16  ;;  %2309 = vmatmul.msk.f32.gmra.mxu3 %vm159_vm0, %v152_v17  ;;  %v5441_v17 = vmov 0 }
  0x15   :  { %385 = vperm.xlu1 %2431, %v353_v18   ;;  %382 = vperm.xlu0 %2430, %v352_v19   ;;  %v2394_v19 = vunpack.c.l.bf16 %v2873_v14 }
  0x17   :  { %379 = vperm.xlu2 %2432, %v351_v20   ;;  %v2409_v20 = vld [vmem:[%s5338_s4 + $0x10] sm:$0xff]  }
  0x18   :  { %v2387_v39 = vunpack.c.h.bf16 %v2409_v20 }
  0x1b   :  { %2298 = vmatmul.msk.f32.gmra.mxu0 %vm159_vm0, %v141_v21  ;;  %2302 = vmatmul.msk.f32.gmra.mxu1 %vm159_vm0, %v145_v22  ;;  %v5444_v21 = vmov 0 }
  0x1c   :  { %2306 = vmatmul.msk.f32.gmra.mxu2 %vm159_vm0, %v149_v23  ;;  %2310 = vmatmul.msk.f32.gmra.mxu3 %vm159_vm0, %v153_v24 }
  0x1d   :  { %394 = vperm.xlu1 %2431, %v356_v25   ;;  %391 = vperm.xlu0 %2430, %v355_v26   ;;  %v2386_v26 = vunpack.c.l.bf16 %v2409_v20 }
  0x1f   :  { %388 = vperm.xlu2 %2432, %v354_v27  }
  0x23   :  { %2299 = vmatmul.msk.f32.gmra.mxu0 %vm159_vm0, %v142_v28  ;;  %2303 = vmatmul.msk.f32.gmra.mxu1 %vm159_vm0, %v146_v29  ;;  %v2910_v28 = vadd.f32 1.0, %v2394_v19  ;;  %v2918_v29 = vadd.s32 40, %v2756_v38 }
  0x24   :  { %2307 = vmatmul.msk.f32.gmra.mxu2 %vm159_vm0, %v150_v30  ;;  %2311 = vmatmul.msk.f32.gmra.mxu3 %vm159_vm0, %v154_v31 }
  0x25   :  { %403 = vperm.xlu1 %2431, %v359_v32   ;;  %400 = vperm.xlu0 %2430, %v358_v33   ;;  %v2927_v33 = vadd.f32 1.0, %v2386_v26 }
  0x27   :  { %397 = vperm.xlu2 %2432, %v357_v34  }
  0x2d   :  { %409 = vperm.xlu0 %2430, %v361_v35  }
  0x2f   :  { %406 = vperm.xlu2 %2432, %v360_v36   ;;  %v5447_v36 = vmov 0 }
  0x69   :  { %v377_v45 = vpop.permute.xlu2 %376 }
  0x71   :  { %v380_v61 = vpop.permute.xlu2 %379 }
  0x74   :  { %v371_v47 = vpop.permute.xlu1 %370  ;;  %v365_v48 = vpop.permute.xlu0 %364 }
  0x75   :  { %vm414_vm3 = vcmp.eq.s32.totalorder %v371_v47, %v2772_v43  ;;  %vm412_vm4 = vcmp.eq.s32.totalorder %v365_v48, %v2772_v43 }
  0x76   :  { %vm2783_vm5 = vmand %vm414_vm3, %vm5356_vm2 }
  0x77   :  { %v5430_v50 = vsel %vm2783_vm5, 4294967295, %v5429_v50  ;;  %vm478_vm7 = vmand %vm2783_vm5, %vm5347_vm1 }
  0x78   :  { %5431 = vst [vmem:[#allocation9_spill] sm:$0xff] %v5430_v50  ;;  %vm2798_vm8 = vmand %vm412_vm4, %vm5356_vm2  ;;  %v2330_v54 = vsel %vm478_vm7, 1.0, %v5359_v53  ;;  %vm416_vm7 = vcmp.eq.s32.totalorder %v377_v45, %v2772_v43 }
  0x79   :  { %v5433_v52 = vsel %vm2798_vm8, 4294967295, %v5432_v52  ;;  %vm476_vm9 = vmand %vm2798_vm8, %vm5346_vm6  ;;  %v2809_v55 = vmul.f32 %v2330_v54, %v2779_v49  ;;  %v389_v11 = vpop.permute.xlu2 %388  ;;  %v2958_v54 = vadd.f32 1.0, %v2387_v39 }
  0x7a   :  { %5434 = vst [vmem:[#allocation10_spill] sm:$0xff] %v5433_v52  ;;  %v2328_v56 = vsel %vm476_vm9, 1.0, %v5359_v53  ;;  %vm420_vm4 = vcmp.eq.s32.totalorder %v389_v11, %v2772_v43  ;;  %vm5342_vm9 = vcmp.ne.s32.totalorder %v2864_v10, %v2767_v42 }
  0x7b   :  { %v989_v57 = vmul.f32 %v2328_v56, %v2794_v51  ;;  %1137 = vadd.xlane.f32.xlu2 %v2809_v55 }
  0x7d   :  { %1133 = vadd.xlane.f32.xlu1 %v989_v57 }
  0x7f   :  { %v374_v63 = vpop.permute.xlu1 %373  ;;  %v368_v0 = vpop.permute.xlu0 %367 }
  0x80   :  { %vm415_vm11 = vcmp.eq.s32.totalorder %v374_v63, %v2772_v43  ;;  %vm413_vm12 = vcmp.eq.s32.totalorder %v368_v0, %v2772_v43  ;;  %v2413_v63 = vld [vmem:[%s5338_s4 + $0x30] sm:$0xff]  }
  0x81   :  { %vm2828_vm13 = vmand %vm415_vm11, %vm5356_vm2  ;;  %v2402_v11 = vunpack.c.l.bf16 %v2413_v63 }
  0x82   :  { %v5436_v2 = vsel %vm2828_vm13, 4294967295, %v5435_v2  ;;  %vm479_vm15 = vmand %vm2828_vm13, %vm5344_vm10 }
  0x83   :  { %5437 = vst [vmem:[#allocation11_spill] sm:$0xff] %v5436_v2  ;;  %vm2843_vm0 = vmand %vm413_vm12, %vm5356_vm2  ;;  %v2331_v5 = vsel %vm479_vm15, 1.0, %v5359_v53  ;;  %vm5341_vm15 = vcmp.ne.s32.totalorder %v2876_v15, %v2767_v42  ;;  %v5474_v2 = vmov 0.0  }
  0x84   :  { %v5439_v4 = vsel %vm2843_vm0, 4294967295, %v5438_v4  ;;  %vm477_vm3 = vmand %vm2843_vm0, %vm5343_vm14  ;;  %v2854_v6 = vmul.f32 %v2331_v5, %v2824_v1 }
  0x85   :  { %5440 = vst [vmem:[#allocation12_spill] sm:$0xff] %v5439_v4  ;;  %v2329_v7 = vsel %vm477_vm3, 1.0, %v5359_v53  ;;  %vm2884_vm11 = vmand %vm420_vm4, %vm5356_vm2 }
  0x86   :  { %1139 = vadd.xlane.f32.xlu1 %v2854_v6  ;;  %v2859_v8 = vmul.f32 %v2329_v7, %v2839_v3  ;;  %v5442_v17 = vsel %vm2884_vm11, 4294967295, %v5441_v17  ;;  %vm2896_vm12 = vmand %vm416_vm7, %vm5356_vm2  ;;  %vm417_vm7 = vcmp.eq.s32.totalorder %v380_v61, %v2772_v43 }
  0x87   :  { %v2861_v9 = vpop.permute.xlu0 %382  ;;  %5443 = vst [vmem:[#allocation13_spill] sm:$0xff] %v5442_v17  ;;  %v2888_v18 = vpop.permute.xlu1 %385  ;;  %v5445_v21 = vsel %vm2896_vm12, 4294967295, %v5444_v21  ;;  %vm484_vm3 = vmand %vm2884_vm11, %vm5342_vm9 }
  0x88   :  { %v225_v12 = vpop.f32.mrf.mxu0  ;;  %1135 = vadd.xlane.f32.xlu0 %v2859_v8  ;;  %5446 = vst [vmem:[#allocation14_spill] sm:$0xff] %v5445_v21  ;;  %v237_v22 = vpop.f32.mrf.mxu1  ;;  %vm480_vm4 = vmand %vm2896_vm12, %vm5341_vm15  ;;  %v2336_v30 = vsel %vm484_vm3, 1.0, %v5359_v53  ;;  %vm5345_vm3 = vcmp.ne.s32.totalorder %v2918_v29, %v2767_v42 }
  0x89   :  { %v2868_v13 = vmul.f32 14.285714, %v225_v12  ;;  %v2925_v32 = vmul.f32 14.285714, %v237_v22  ;;  %v2332_v34 = vsel %vm480_vm4, 1.0, %v5359_v53  ;;  %v2932_v35 = vmul.f32 %v2336_v30, %v2910_v28  ;;  %vm2938_vm15 = vmand %vm417_vm7, %vm5356_vm2 }
  0x8a   :  { %v5448_v36 = vsel %vm2938_vm15, 4294967295, %v5447_v36  ;;  %v2946_v45 = vmul.f32 %v2332_v34, %v2927_v33  ;;  %vm481_vm4 = vmand %vm2938_vm15, %vm5345_vm3  ;;  %v2987_v12 = vadd.s32 104, %v2756_v38  ;;  %v616_v22 = vadd.f32 1.0, %v2402_v11 }
  0x8b   :  { %v1037_v16 = vmul.f32 %v989_v57, %v2868_v13  ;;  %5449 = vst [vmem:[#allocation15_spill] sm:$0xff] %v5448_v36  ;;  %v2333_v56 = vsel %vm481_vm4, 1.0, %v5359_v53  ;;  %v303_v57 = vadd.s32 96, %v2756_v38  ;;  %v2395_v34 = vunpack.c.h.bf16 %v2873_v14 }
  0x8c   :  { %v1041_v59 = vmul.f32 %v2946_v45, %v2925_v32  ;;  %v2977_v0 = vmul.f32 %v2333_v56, %v2958_v54  ;;  %vm5348_vm3 = vcmp.ne.s32.totalorder %v2987_v12, %v2767_v42  ;;  %v3033_v14 = vadd.s32 48, %v2756_v38 }
  0x8d   :  { %1053 = vadd.xlane.f32.xlu2 %v1037_v16  ;;  %vm5350_vm4 = vcmp.ne.s32.totalorder %v303_v57, %v2767_v42  ;;  %v2990_v16 = vadd.s32 72, %v2756_v38 }
  0x8e   :  { %636 = vmax.xlane.f32.xlu1 %v2868_v13 }
  0x8f   :  { %v392_v23 = vpop.permute.xlu0 %391  ;;  %v249_v24 = vpop.f32.mrf.mxu2 }
  0x90   :  { %v261_v25 = vpop.f32.mrf.mxu3  ;;  %v2922_v31 = vmul.f32 14.285714, %v249_v24  ;;  %v2943_v37 = vpop.permute.xlu1 %394  ;;  %vm421_vm10 = vcmp.eq.s32.totalorder %v392_v23, %v2772_v43  ;;  %v2403_v23 = vunpack.c.h.bf16 %v2413_v63 }
  0x91   :  { %v2908_v27 = vmul.f32 14.285714, %v261_v25  ;;  %v228_v41 = vpop.f32.mrf.mxu0  ;;  %v240_v47 = vpop.f32.mrf.mxu1  ;;  %v5453_v25 = vmov 0  ;;  %vm3012_vm1 = vmand %vm421_vm10, %vm5356_vm2 }
  0x92   :  { %v1045_v46 = vmul.f32 %v2932_v35, %v2922_v31  ;;  %v2955_v48 = vmul.f32 14.285714, %v228_v41  ;;  %v2964_v61 = vmul.f32 14.285714, %v240_v47  ;;  %v3039_v47 = vpop.permute.xlu2 %397 }
  0x93   :  { %660 = vmax.xlane.f32.xlu0 %v2908_v27 }
  0x94   :  { %v1042_v7 = vmul.f32 %v2977_v0, %v2964_v61  ;;  %v1038_v20 = vmul.f32 %v2859_v8, %v2955_v48  ;;  %v5456_v8 = vmov 0 }
  0x95   :  { %652 = vmax.xlane.f32.xlu2 %v2922_v31  ;;  %v5457_v8 = vsel %vm3012_vm1, 4294967295, %v5456_v8 }
  0x96   :  { %644 = vmax.xlane.f32.xlu1 %v2925_v32  ;;  %5458 = vst [vmem:[#allocation18_spill] sm:$0xff] %v5457_v8 }
  0x97   :  { %v401_v44 = vpop.permute.xlu0 %400  ;;  %v252_v24 = vpop.f32.mrf.mxu2 }
  0x98   :  { %vm424_vm7 = vcmp.eq.s32.totalorder %v401_v44, %v2772_v43  ;;  %v404_v5 = vpop.permute.xlu1 %403  ;;  %v3016_v30 = vmul.f32 14.285714, %v252_v24  ;;  %v264_v39 = vpop.f32.mrf.mxu3 }
  0x99   :  { %vm2969_vm9 = vmand %vm424_vm7, %vm5356_vm2  ;;  %vm425_vm7 = vcmp.eq.s32.totalorder %v404_v5, %v2772_v43  ;;  %v3035_v44 = vmul.f32 14.285714, %v264_v39  ;;  %v231_v5 = vpop.f32.mrf.mxu0 }
  0x9a   :  { %v5451_v62 = vsel %vm2969_vm9, 4294967295, %v5450_v62  ;;  %vm488_vm14 = vmand %vm2969_vm9, %vm5350_vm4 }
  0x9b   :  { %1069 = vadd.xlane.f32.xlu0 %v1045_v46  ;;  %5452 = vst [vmem:[#allocation16_spill] sm:$0xff] %v5451_v62  ;;  %v2340_v19 = vsel %vm488_vm14, 1.0, %v5359_v53  ;;  %vm3002_vm6 = vmand %vm425_vm7, %vm5356_vm2  ;;  %vm5349_vm14 = vcmp.ne.s32.totalorder %v2990_v16, %v2767_v42  ;;  %v3037_v46 = vadd.f32 1.0, %v2403_v23  ;;  %v3093_v62 = vadd.s32 112, %v2756_v38 }
  0x9c   :  { %v5454_v25 = vsel %vm3002_vm6, 4294967295, %v5453_v25  ;;  %v3006_v26 = vmul.f32 %v2340_v19, %v616_v22  ;;  %vm489_vm7 = vmand %vm3002_vm6, %vm5348_vm3  ;;  %5459 = vst [vmem:[#allocation19_spill] sm:$0xff] %v3035_v44  ;;  %vm418_vm3 = vcmp.eq.s32.totalorder %v2861_v9, %v2772_v43  ;;  %v5460_v9 = vmov 0 }
  0x9d   :  { %638 = vmax.xlane.f32.xlu2 %v2955_v48  ;;  %5455 = vst [vmem:[#allocation17_spill] sm:$0xff] %v5454_v25  ;;  %vm485_vm10 = vmand %vm3012_vm1, %vm5349_vm14  ;;  %v2341_v56 = vsel %vm489_vm7, 1.0, %v5359_v53  ;;  %vm5355_vm14 = vcmp.ne.s32.totalorder %v3033_v14, %v2767_v42  ;;  %v3064_v19 = vmul.f32 14.285714, %v231_v5  ;;  %vm5469_vm6 = vcmp.lt.s32.totalorder %v2767_v42, 8 }
  0x9e   :  { %1061 = vadd.xlane.f32.xlu1 %v1041_v59  ;;  %v1049_v41 = vmul.f32 %v3006_v26, %v2908_v27  ;;  %v3044_v59 = vadd.f32 1.0, %v2395_v34  ;;  %v2337_v63 = vsel %vm485_vm10, 1.0, %v5359_v53  ;;  %vm3057_vm4 = vmand %vm418_vm3, %vm5356_vm2  ;;  %v3062_v11 = vmul.f32 %v2341_v56, %v3037_v46  ;;  %v243_v34 = vpop.f32.mrf.mxu1 }
  0x9f   :  { %v5461_v9 = vsel %vm3057_vm4, 4294967295, %v5460_v9  ;;  %vm482_vm7 = vmand %vm3057_vm4, %vm5355_vm14  ;;  %vm5463_vm3 = vcmp.ne.s32.totalorder %v303_v57, %v2767_v42  ;;  %v3087_v5 = vmul.f32 14.285714, %v243_v34  ;;  %v255_v8 = vpop.f32.mrf.mxu2  ;;  %v3110_v34 = vld [vmem:[%s5338_s4 + $0x38] sm:$0xff]   ;;  %vm422_vm14 = vcmp.eq.s32.totalorder %v2943_v37, %v2772_v43 }
  0xa0   :  { %5462 = vst [vmem:[#allocation20_spill] sm:$0xff] %v5461_v9  ;;  %v1050_v39 = vmul.f32 %v3062_v11, %v3035_v44  ;;  %vm536_vm10 = vmand %vm5463_vm3, %vm5356_vm2  ;;  %v2334_v56 = vsel %vm482_vm7, 1.0, %v5359_v53  ;;  %vm5368_vm7 = vcmp.ne.s32.totalorder %v3093_v62, %v2767_v42  ;;  %vm26_vm1 = vcmask 7168  }
  0xa1   :  { %v3090_v25 = vsel %vm536_vm10, 1.0, %v5359_v53  ;;  %vm3136_vm9 = vmand %vm422_vm14, %vm5469_vm6  ;;  %v2412_v53 = vld [vmem:[%s5338_s4 + $0x28] sm:$0xff]   ;;  %vm419_vm14 = vcmp.eq.s32.totalorder %v2888_v18, %v2772_v43  ;;  %91 = vst.msk [vmem:[#allocation6] sm:$0xff] %vm26_vm1, %v5474_v2 }
  0xa2   :  { %5464 = vst [vmem:[#allocation21_spill] sm:$0xff] %v3090_v25  ;;  %v3099_v57 = vmul.f32 %v3090_v25, %v616_v22  ;;  %v5466_v22 = vmov 0 }
  0xa3   :  { %1063 = vadd.xlane.f32.xlu0 %v1042_v7  ;;  %v3051_v7 = vld [vmem:[%s5338_s4 + $0x18] sm:$0xff]   ;;  %43 = vst.msk [vmem:[#allocation3] sm:$0xff] %vm26_vm1, %v5474_v2 }
  0xa4   :  { %v2390_v24 = vunpack.c.l.bf16 %v3051_v7  ;;  %44 = vst.msk [vmem:[#allocation3 + $0x8] sm:$0xff] %vm26_vm1, %v5474_v2 }
  0xa5   :  { %646 = vmax.xlane.f32.xlu2 %v2964_v61  ;;  %45 = vst.msk [vmem:[#allocation3 + $0x10] sm:$0xff] %vm26_vm1, %v5474_v2 }
  0xa6   :  { %1055 = vadd.xlane.f32.xlu1 %v1038_v20  ;;  %v3067_v20 = vmul.f32 %v2337_v63, %v3044_v59  ;;  %v407_v63 = vpop.permute.xlu2 %406  ;;  %v246_v37 = vpop.f32.mrf.mxu1  ;;  %46 = vst.msk [vmem:[#allocation3 + $0x18] sm:$0xff] %vm26_vm1, %v5474_v2 }
  0xa7   :  { %vm426_vm3 = vcmp.eq.s32.totalorder %v407_v63, %v2772_v43  ;;  %v5470_v63 = vmov 0  ;;  %v3155_v25 = vmul.f32 14.285714, %v246_v37  ;;  %v5477_v37 = vmov 0  ;;  %47 = vst.msk [vmem:[#allocation3 + $0x20] sm:$0xff] %vm26_vm1, %v5474_v2 }
  0xa8   :  { %v1046_v23 = vmul.f32 %v3067_v20, %v3016_v30  ;;  %vm3116_vm10 = vmand %vm426_vm3, %vm5356_vm2  ;;  %v5471_v63 = vsel %vm3136_vm9, 4294967295, %v5470_v63  ;;  %48 = vst.msk [vmem:[#allocation3 + $0x28] sm:$0xff] %vm26_vm1, %v5474_v2 }
  0xa9   :  { %v5467_v22 = vsel %vm3116_vm10, 4294967295, %v5466_v22  ;;  %vm490_vm3 = vmand %vm3116_vm10, %vm5368_vm7  ;;  %5472 = vst [vmem:[#allocation24_spill] sm:$0xff] %v5471_v63  ;;  %v234_v63 = vpop.f32.mrf.mxu0  ;;  %vm5476_vm7 = vcmp.lt.s32.totalorder %v2767_v42, 8 }
  0xaa   :  { %5468 = vst [vmem:[#allocation23_spill] sm:$0xff] %v5467_v22  ;;  %v2398_v22 = vunpack.c.l.bf16 %v2412_v53  ;;  %v2342_v36 = vsel %vm490_vm3, 1.0, %v5474_v2  ;;  %v3189_v4 = vmul.f32 14.285714, %v234_v63 }
  0xab   :  { %654 = vmax.xlane.f32.xlu0 %v3016_v30  ;;  %5475 = vst [vmem:[#allocation26_spill] sm:$0xff] %v3155_v25 }
  0xac   :  { %49 = vst.msk [vmem:[#allocation3 + $0x30] sm:$0xff] %vm26_vm1, %v5474_v2 }
  0xad   :  { %1077 = vadd.xlane.f32.xlu2 %v1049_v41  ;;  %v3084_v41 = vadd.f32 1.0, %v2390_v24  ;;  %50 = vst.msk [vmem:[#allocation3 + $0x38] sm:$0xff] %vm26_vm1, %v5474_v2 }
  0xae   :  { %662 = vmax.xlane.f32.xlu1 %v3035_v44  ;;  %v1040_v44 = vmul.f32 %v2854_v6, %v3189_v4  ;;  %51 = vst.msk [vmem:[#allocation3 + $0x40] sm:$0xff] %vm26_vm1, %v5474_v2 }
  0xaf   :  { %v3096_v9 = vmul.f32 %v2334_v56, %v3084_v41  ;;  %v267_v56 = vpop.f32.mrf.mxu3  ;;  %52 = vst.msk [vmem:[#allocation3 + $0x48] sm:$0xff] %vm26_vm1, %v5474_v2 }
  0xb0   :  { %v3145_v17 = vmul.f32 14.285714, %v267_v56  ;;  %53 = vst.msk [vmem:[#allocation3 + $0x50] sm:$0xff] %vm26_vm1, %v5474_v2 }
  0xb1   :  { %v1043_v24 = vmul.f32 %v3096_v9, %v3087_v5  ;;  %54 = vst.msk [vmem:[#allocation3 + $0x58] sm:$0xff] %vm26_vm1, %v5474_v2 }
  0xb2   :  { %5473 = vst [vmem:[#allocation25_spill] sm:$0xff] %v3145_v17 }
  0xb3   :  { %640 = vmax.xlane.f32.xlu0 %v3064_v19  ;;  %55 = vst.msk [vmem:[#allocation3 + $0x60] sm:$0xff] %vm26_vm1, %v5474_v2 }
  0xb4   :  { %56 = vst.msk [vmem:[#allocation3 + $0x68] sm:$0xff] %vm26_vm1, %v5474_v2 }
  0xb5   :  { %1071 = vadd.xlane.f32.xlu2 %v1046_v23  ;;  %v3105_v23 = vmul.f32 14.285714, %v255_v8  ;;  %v2406_v8 = vunpack.c.l.bf16 %v3110_v34  ;;  %57 = vst.msk [vmem:[#allocation3 + $0x70] sm:$0xff] %vm26_vm1, %v5474_v2 }
  0xb6   :  { %1079 = vadd.xlane.f32.xlu1 %v1050_v39  ;;  %v3121_v39 = vadd.s32 80, %v2756_v38  ;;  %58 = vst.msk [vmem:[#allocation3 + $0x78] sm:$0xff] %vm26_vm1, %v5474_v2 }
  0xb7   :  { %5465 = vst [vmem:[#allocation22_spill] sm:$0xff] %v3105_v23  ;;  %v3147_v21 = vadd.f32 1.0, %v2406_v8  ;;  %v3164_v8 = vadd.f32 1.0, %v2398_v22  ;;  %v3181_v22 = vadd.s32 88, %v2756_v38 }
  0xb8   :  { %vm5369_vm2 = vcmp.ne.s32.totalorder %v3121_v39, %v2767_v42  ;;  %59 = vst.msk [vmem:[#allocation4] sm:$0xff] %vm26_vm1, %v5474_v2 }
  0xb9   :  { %vm486_vm6 = vmand %vm3136_vm9, %vm5369_vm2  ;;  %vm5480_vm9 = vcmp.lt.s32.totalorder %v2767_v42, 8  ;;  %60 = vst.msk [vmem:[#allocation4 + $0x8] sm:$0xff] %vm26_vm1, %v5474_v2 }
  0xba   :  { %v2338_v56 = vsel %vm486_vm6, 1.0, %v5474_v2  ;;  %vm3174_vm2 = vmand %vm419_vm14, %vm5476_vm7  ;;  %vm423_vm6 = vcmp.eq.s32.totalorder %v3039_v47, %v2772_v43  ;;  %vm5384_vm14 = vcmp.ne.s32.totalorder %v3181_v22, %v2767_v42  ;;  %v5481_v47 = vmov 0  ;;  %61 = vst.msk [vmem:[#allocation4 + $0x10] sm:$0xff] %vm26_vm1, %v5474_v2 }
  0xbb   :  { %648 = vmax.xlane.f32.xlu0 %v3087_v5  ;;  %v5478_v37 = vsel %vm3174_vm2, 4294967295, %v5477_v37  ;;  %v3184_v52 = vmul.f32 %v2338_v56, %v3164_v8  ;;  %vm3203_vm10 = vmand %vm423_vm6, %vm5480_vm9  ;;  %62 = vst.msk [vmem:[#allocation4 + $0x18] sm:$0xff] %vm26_vm1, %v5474_v2 }
  0xbc   :  { %5479 = vst [vmem:[#allocation27_spill] sm:$0xff] %v5478_v37  ;;  %v5482_v47 = vsel %vm3203_vm10, 4294967295, %v5481_v47  ;;  %vm487_vm9 = vmand %vm3203_vm10, %vm5384_vm14 }
  0xbd   :  { %1065 = vadd.xlane.f32.xlu2 %v1043_v24  ;;  %v1039_v24 = vmul.f32 %v2809_v55, %v3064_v19  ;;  %v3158_v55 = vadd.s32 56, %v2756_v38  ;;  %v1047_v50 = vmul.f32 %v3184_v52, %v3105_v23  ;;  %5483 = vst [vmem:[#allocation28_spill] sm:$0xff] %v5482_v47  ;;  %v3235_v47 = vadd.s32 120, %v2756_v38 }
  0xbe   :  { %656 = vmax.xlane.f32.xlu1 %v3105_v23  ;;  %63 = vst.msk [vmem:[#allocation4 + $0x20] sm:$0xff] %vm26_vm1, %v5474_v2 }
  0xbf   :  { %vm5385_vm3 = vcmp.ne.s32.totalorder %v3158_v55, %v2767_v42  ;;  %64 = vst.msk [vmem:[#allocation4 + $0x28] sm:$0xff] %vm26_vm1, %v5474_v2 }
  0xc0   :  { %vm483_vm7 = vmand %vm3174_vm2, %vm5385_vm3  ;;  %vm5388_vm3 = vcmp.ne.s32.totalorder %v3235_v47, %v2767_v42  ;;  %65 = vst.msk [vmem:[#allocation4 + $0x30] sm:$0xff] %vm26_vm1, %v5474_v2 }
  0xc1   :  { %v2335_v56 = vsel %vm483_vm7, 1.0, %v5474_v2  ;;  %vm5484_vm7 = vcmp.lt.s32.totalorder %v2767_v42, 8  ;;  %66 = vst.msk [vmem:[#allocation4 + $0x38] sm:$0xff] %vm26_vm1, %v5474_v2 }
  0xc2   :  { %vm5486_vm2 = vmmov %vm5484_vm7  ;;  %67 = vst.msk [vmem:[#allocation4 + $0x40] sm:$0xff] %vm26_vm1, %v5474_v2 }
  0xc3   :  { %1057 = vadd.xlane.f32.xlu0 %v1039_v24  ;;  %v3168_v24 = vmul.f32 %v2342_v36, %v3147_v21  ;;  %v2391_v36 = vunpack.c.h.bf16 %v3051_v7  ;;  %v270_v7 = vpop.f32.mrf.mxu3  ;;  %68 = vst.msk [vmem:[#allocation4 + $0x48] sm:$0xff] %vm26_vm1, %v5474_v2 }
  0xc4   :  { %v3219_v37 = vmul.f32 14.285714, %v270_v7  ;;  %v2339_v7 = vsel %vm487_vm9, 1.0, %v5474_v2  ;;  %vm5485_vm9 = vcmp.ne.s32.totalorder %v2987_v12, %v2767_v42  ;;  %69 = vst.msk [vmem:[#allocation4 + $0x50] sm:$0xff] %vm26_vm1, %v5474_v2 }
  0xc5   :  { %664 = vmax.xlane.f32.xlu2 %v3145_v17  ;;  %v1051_v18 = vmul.f32 %v3168_v24, %v3145_v17  ;;  %v3207_v63 = vadd.f32 1.0, %v2391_v36  ;;  %v258_v36 = vpop.f32.mrf.mxu2  ;;  %vm537_vm14 = vmand %vm5485_vm9, %vm5484_vm7  ;;  %70 = vst.msk [vmem:[#allocation4 + $0x58] sm:$0xff] %vm26_vm1, %v5474_v2 }
  0xc6   :  { %650 = vmax.xlane.f32.xlu1 %v3155_v25  ;;  %v3241_v23 = vmul.f32 14.285714, %v258_v36  ;;  %71 = vst.msk [vmem:[#allocation4 + $0x60] sm:$0xff] %vm26_vm1, %v5474_v2 }
  0xc7   :  { %72 = vst.msk [vmem:[#allocation4 + $0x68] sm:$0xff] %vm26_vm1, %v5474_v2 }
  0xc8   :  { %73 = vst.msk [vmem:[#allocation4 + $0x70] sm:$0xff] %vm26_vm1, %v5474_v2 }
  0xc9   :  { %74 = vst.msk [vmem:[#allocation4 + $0x78] sm:$0xff] %vm26_vm1, %v5474_v2 }
  0xca   :  { %75 = vst.msk [vmem:[#allocation5] sm:$0xff] %vm26_vm1, %v5474_v2 }
  0xcb   :  { %1081 = vadd.xlane.f32.xlu0 %v1051_v18  ;;  %v2399_v18 = vunpack.c.h.bf16 %v2412_v53  ;;  %v996_v53 = vmul.f32 %v2335_v56, %v3207_v63  ;;  %76 = vst.msk [vmem:[#allocation5 + $0x8] sm:$0xff] %vm26_vm1, %v5474_v2 }
  0xcc   :  { %77 = vst.msk [vmem:[#allocation5 + $0x10] sm:$0xff] %vm26_vm1, %v5474_v2 }
  0xcd   :  { %642 = vmax.xlane.f32.xlu2 %v3189_v4  ;;  %v3229_v17 = vadd.f32 1.0, %v2399_v18  ;;  %v1044_v56 = vmul.f32 %v996_v53, %v3155_v25  ;;  %v3273_v18 = vsel %vm537_vm14, 1.0, %v5474_v2  ;;  %vm5491_vm14 = vmmov %vm5484_vm7  ;;  %78 = vst.msk [vmem:[#allocation5 + $0x18] sm:$0xff] %vm26_vm1, %v5474_v2 }
  0xce   :  { %1073 = vadd.xlane.f32.xlu1 %v1047_v50  ;;  %v410_v50 = vpop.permute.xlu0 %409  ;;  %5490 = vst [vmem:[#allocation30_spill] sm:$0xff] %v3273_v18  ;;  %vm5494_vm9 = vmmov %vm5491_vm14 }
  0xcf   :  { %vm427_vm6 = vcmp.eq.s32.totalorder %v410_v50, %v2772_v43  ;;  %v3253_v6 = vmul.f32 %v2339_v7, %v3229_v17  ;;  %v5487_v43 = vmov 0  ;;  %v3279_v50 = vmul.f32 %v3273_v18, %v3037_v46  ;;  %79 = vst.msk [vmem:[#allocation5 + $0x20] sm:$0xff] %vm26_vm1, %v5474_v2 }
  0xd0   :  { %vm3261_vm10 = vmand %vm427_vm6, %vm5486_vm2  ;;  %vm5492_vm6 = vcmp.ne.s32.totalorder %v2762_v40, %v2767_v42  ;;  %80 = vst.msk [vmem:[#allocation5 + $0x28] sm:$0xff] %vm26_vm1, %v5474_v2 }
  0xd1   :  { %v5488_v43 = vsel %vm3261_vm10, 4294967295, %v5487_v43  ;;  %v1048_v12 = vmul.f32 %v3253_v6, %v3241_v23  ;;  %vm491_vm2 = vmand %vm3261_vm10, %vm5388_vm3  ;;  %81 = vst.msk [vmem:[#allocation5 + $0x30] sm:$0xff] %vm26_vm1, %v5474_v2 }
  0xd2   :  { %5489 = vst [vmem:[#allocation29_spill] sm:$0xff] %v5488_v43  ;;  %v2343_v46 = vsel %vm491_vm2, 1.0, %v5474_v2  ;;  %vm526_vm7 = vmand %vm5492_vm6, %vm5491_vm14  ;;  %vm5495_vm2 = vcmp.ne.s32.totalorder %v2756_v38, %v2767_v42 }
  0xd3   :  { %666 = vmax.xlane.f32.xlu0 %v3219_v37  ;;  %vm524_vm14 = vmand %vm5495_vm2, %vm5494_vm9  ;;  %82 = vst.msk [vmem:[#allocation5 + $0x38] sm:$0xff] %vm26_vm1, %v5474_v2  ;;  %vm5500_vm2 = vcmp.ne.s32.totalorder %v2814_v58, %v2767_v42 }
  0xd4   :  { %83 = vst.msk [vmem:[#allocation5 + $0x40] sm:$0xff] %vm26_vm1, %v5474_v2  ;;  %vm5496_vm6 = vmmov %vm5494_vm9  ;;  %v3385_v38 = vsel %vm524_vm14, 1.0, %v5474_v2 }
  0xd5   :  { %1059 = vadd.xlane.f32.xlu2 %v1040_v44  ;;  %v2407_v44 = vunpack.c.h.bf16 %v3110_v34  ;;  %84 = vst.msk [vmem:[#allocation5 + $0x48] sm:$0xff] %vm26_vm1, %v5474_v2  ;;  %vm5499_vm9 = vmmov %vm5496_vm6 }
  0xd6   :  { %1067 = vadd.xlane.f32.xlu1 %v1044_v56  ;;  %85 = vst.msk [vmem:[#allocation5 + $0x50] sm:$0xff] %vm26_vm1, %v5474_v2  ;;  %vm527_vm14 = vmand %vm5500_vm2, %vm5499_vm9  ;;  %vm5504_vm2 = vcmp.ne.s32.totalorder %v2864_v10, %v2767_v42 }
  0xd7   :  { %v3291_v34 = vadd.f32 1.0, %v2407_v44  ;;  %86 = vst.msk [vmem:[#allocation5 + $0x58] sm:$0xff] %vm26_vm1, %v5474_v2 }
  0xd8   :  { %87 = vst.msk [vmem:[#allocation5 + $0x60] sm:$0xff] %vm26_vm1, %v5474_v2 }
  0xd9   :  { %v1004_v36 = vmul.f32 %v2343_v46, %v3291_v34  ;;  %88 = vst.msk [vmem:[#allocation5 + $0x68] sm:$0xff] %vm26_vm1, %v5474_v2 }
  0xda   :  { %89 = vst.msk [vmem:[#allocation5 + $0x70] sm:$0xff] %vm26_vm1, %v5474_v2 }
  0xdb   :  { %1075 = vadd.xlane.f32.xlu0 %v1048_v12  ;;  %90 = vst.msk [vmem:[#allocation5 + $0x78] sm:$0xff] %vm26_vm1, %v5474_v2 }
  0xdc   :  { %92 = vst.msk [vmem:[#allocation6 + $0x8] sm:$0xff] %vm26_vm1, %v5474_v2 }
  0xdd   :  { %658 = vmax.xlane.f32.xlu2 %v3241_v23  ;;  %93 = vst.msk [vmem:[#allocation6 + $0x10] sm:$0xff] %vm26_vm1, %v5474_v2 }
  0xde   :  { %1145 = vadd.xlane.f32.xlu1 %v3096_v9  ;;  %v1052_v9 = vmul.f32 %v1004_v36, %v3219_v37  ;;  %94 = vst.msk [vmem:[#allocation6 + $0x18] sm:$0xff] %vm26_vm1, %v5474_v2 }
  0xdf   :  { %95 = vst.msk [vmem:[#allocation6 + $0x20] sm:$0xff] %vm26_vm1, %v5474_v2 }
  0xe0   :  { %96 = vst.msk [vmem:[#allocation6 + $0x28] sm:$0xff] %vm26_vm1, %v5474_v2 }
  0xe1   :  { %97 = vst.msk [vmem:[#allocation6 + $0x30] sm:$0xff] %vm26_vm1, %v5474_v2 }
  0xe2   :  { %98 = vst.msk [vmem:[#allocation6 + $0x38] sm:$0xff] %vm26_vm1, %v5474_v2 }
  0xe3   :  { %1141 = vadd.xlane.f32.xlu0 %v2946_v45  ;;  %v1117_v45 = vld [vmem:[#allocation6] sm:$0xff]  ;;  %99 = vst.msk [vmem:[#allocation6 + $0x40] sm:$0xff] %vm26_vm1, %v5474_v2 }
  0xe4   :  { %100 = vst.msk [vmem:[#allocation6 + $0x48] sm:$0xff] %vm26_vm1, %v5474_v2 }
  0xe5   :  { %1083 = vadd.xlane.f32.xlu2 %v1052_v9  ;;  %101 = vst.msk [vmem:[#allocation6 + $0x50] sm:$0xff] %vm26_vm1, %v5474_v2 }
  0xe6   :  { %1151 = vadd.xlane.f32.xlu1 %v3067_v20  ;;  %102 = vst.msk [vmem:[#allocation6 + $0x58] sm:$0xff] %vm26_vm1, %v5474_v2 }
  0xe7   :  { %103 = vst.msk [vmem:[#allocation6 + $0x60] sm:$0xff] %vm26_vm1, %v5474_v2 }
  0xe8   :  { %104 = vst.msk [vmem:[#allocation6 + $0x68] sm:$0xff] %vm26_vm1, %v5474_v2 }
  0xe9   :  { %105 = vst.msk [vmem:[#allocation6 + $0x70] sm:$0xff] %vm26_vm1, %v5474_v2 }
  0xea   :  { %106 = vst.msk [vmem:[#allocation6 + $0x78] sm:$0xff] %vm26_vm1, %v5474_v2 }
  0xeb   :  { %1147 = vadd.xlane.f32.xlu0 %v996_v53  ;;  %107 = vst.msk [vmem:[#allocation7] sm:$0xff] %vm26_vm1, %v5474_v2 }
  0xec   :  { %108 = vst.msk [vmem:[#allocation7 + $0x8] sm:$0xff] %vm26_vm1, %v5474_v2 }
  0xed   :  { %1143 = vadd.xlane.f32.xlu2 %v2977_v0  ;;  %v3358_v0 = vsel %vm526_vm7, 1.0, %v5474_v2  ;;  %vm5497_vm7 = vcmp.ne.s32.totalorder %v2918_v29, %v2767_v42  ;;  %109 = vst.msk [vmem:[#allocation7 + $0x10] sm:$0xff] %vm26_vm1, %v5474_v2 }
  0xee   :  { %1157 = vadd.xlane.f32.xlu1 %v3006_v26  ;;  %5493 = vst [vmem:[#allocation31_spill] sm:$0xff] %v3358_v0  ;;  %v3373_v40 = vmul.f32 %v3358_v0, %v2779_v49  ;;  %vm529_vm3 = vmand %vm5497_vm7, %vm5496_vm6 }
  0xef   :  { %v3402_v29 = vsel %vm529_vm3, 1.0, %v5474_v2  ;;  %vm5501_vm3 = vmmov %vm5496_vm6  ;;  %vm5502_vm6 = vcmp.ne.s32.totalorder %v2818_v60, %v2767_v42  ;;  %110 = vst.msk [vmem:[#allocation7 + $0x18] sm:$0xff] %vm26_vm1, %v5474_v2 }
  0xf0   :  { %v1134_v20 = vpop.xlane.xlu1 %1133  ;;  %v1215_v49 = vmul.f32 %v3373_v40, %v3064_v19  ;;  %5498 = vst [vmem:[#allocation32_spill] sm:$0xff] %v3402_v29  ;;  %vm525_vm7 = vmand %vm5502_vm6, %vm5501_vm3 }
  0xf1   :  { %v1165_v53 = vadd.f32 %v1134_v20, %v1117_v45  ;;  %vm5503_vm9 = vmmov %vm5501_vm3  ;;  %111 = vst.msk [vmem:[#allocation7 + $0x20] sm:$0xff] %vm26_vm1, %v5474_v2 }
  0xf2   :  { %vm532_vm10 = vmand %vm5504_vm2, %vm5503_vm9  ;;  %112 = vst.msk [vmem:[#allocation7 + $0x28] sm:$0xff] %vm26_vm1, %v5474_v2 }
  0xf3   :  { %1181 = vst.msk [vmem:[#allocation6] sm:$0xff] %vm26_vm1, %v1165_v53  ;;  %1153 = vadd.xlane.f32.xlu0 %v3184_v52  ;;  %v3399_v52 = vmul.f32 %v3385_v38, %v2794_v51  ;;  %v3417_v51 = vmul.f32 %v3402_v29, %v2958_v54  ;;  %v3445_v54 = vsel %vm525_vm7, 1.0, %v5474_v2  ;;  %v3455_v26 = vsel %vm532_vm10, 1.0, %v5474_v2  ;;  %vm5508_vm10 = vmmov %vm5503_vm9  ;;  %v1119_v53 = vld [vmem:[#allocation6 + $0x10] sm:$0xff] }
  0xf4   :  { %vm5509_vm7 = vcmp.ne.s32.totalorder %v2876_v15, %v2767_v42  ;;  %vm5511_vm2 = vmmov %vm5508_vm10  ;;  %113 = vst.msk [vmem:[#allocation7 + $0x30] sm:$0xff] %vm26_vm1, %v5474_v2 }
  0xf5   :  { %1149 = vadd.xlane.f32.xlu2 %v2932_v35  ;;  %v1213_v58 = vmul.f32 %v3399_v52, %v2868_v13  ;;  %v3436_v35 = vsel %vm527_vm14, 1.0, %v5474_v2  ;;  %v1218_v60 = vmul.f32 %v3417_v51, %v2964_v61  ;;  %vm5506_vm14 = vmmov %vm5501_vm3  ;;  %vm5507_vm3 = vcmp.ne.s32.totalorder %v3033_v14, %v2767_v42  ;;  %114 = vst.msk [vmem:[#allocation7 + $0x38] sm:$0xff] %vm26_vm1, %v5474_v2 }
  0xf6   :  { %1163 = vadd.xlane.f32.xlu1 %v1004_v36  ;;  %5505 = vst [vmem:[#allocation33_spill] sm:$0xff] %v3436_v35  ;;  %v3452_v10 = vmul.f32 %v3436_v35, %v2824_v1  ;;  %vm530_vm6 = vmand %vm5507_vm3, %vm5506_vm14  ;;  %v3468_v1 = vmul.f32 %v3445_v54, %v2839_v3  ;;  %vm5512_vm14 = vcmp.ne.s32.totalorder %v2990_v16, %v2767_v42 }
  0xf7   :  { %vm528_vm9 = vmand %vm5509_vm7, %vm5508_vm10  ;;  %v3488_v14 = vsel %vm530_vm6, 1.0, %v5474_v2  ;;  %vm5514_vm10 = vcmp.ne.s32.totalorder %v3158_v55, %v2767_v42  ;;  %115 = vst.msk [vmem:[#allocation7 + $0x40] sm:$0xff] %vm26_vm1, %v5474_v2 }
  0xf8   :  { %v1216_v3 = vmul.f32 %v3452_v10, %v3189_v4  ;;  %5510 = vst [vmem:[#allocation34_spill] sm:$0xff] %v3488_v14  ;;  %v1214_v15 = vmul.f32 %v3468_v1, %v2955_v48  ;;  %v3505_v7 = vmul.f32 %v3488_v14, %v3084_v41  ;;  %vm533_vm3 = vmand %vm5512_vm14, %vm5511_vm2 }
  0xf9   :  { %vm5513_vm6 = vmmov %vm5511_vm2  ;;  %v1140_v12 = vpop.xlane.xlu1 %1139  ;;  %116 = vst.msk [vmem:[#allocation7 + $0x48] sm:$0xff] %vm26_vm1, %v5474_v2 }
  0xfa   :  { %vm531_vm7 = vmand %vm5514_vm10, %vm5513_vm6  ;;  %v1219_v16 = vmul.f32 %v3505_v7, %v3087_v5  ;;  %117 = vst.msk [vmem:[#allocation7 + $0x50] sm:$0xff] %vm26_vm1, %v5474_v2 }
  0xfb   :  { %1159 = vadd.xlane.f32.xlu0 %v3062_v11  ;;  %v3474_v11 = vmul.f32 %v3455_v26, %v2910_v28  ;;  %v3543_v55 = vsel %vm531_vm7, 1.0, %v5474_v2  ;;  %118 = vst.msk [vmem:[#allocation7 + $0x58] sm:$0xff] %vm26_vm1, %v5474_v2  ;;  %v1136_v36 = vpop.xlane.xlu0 %1135 }
  0xfc   :  { %5515 = vst [vmem:[#allocation35_spill] sm:$0xff] %v3543_v55  ;;  %v3557_v46 = vmul.f32 %v3543_v55, %v3207_v63 }
  0xfd   :  { %1155 = vadd.xlane.f32.xlu2 %v3253_v6  ;;  %v1221_v28 = vmul.f32 %v3474_v11, %v2922_v31  ;;  %v1138_v6 = vpop.xlane.xlu2 %1137  ;;  %119 = vst.msk [vmem:[#allocation7 + $0x60] sm:$0xff] %vm26_vm1, %v5474_v2 }
  0xfe   :  { %1233 = vadd.xlane.f32.xlu1 %v1215_v49  ;;  %v1220_v63 = vmul.f32 %v3557_v46, %v3155_v25  ;;  %120 = vst.msk [vmem:[#allocation7 + $0x68] sm:$0xff] %vm26_vm1, %v5474_v2  ;;  %v1026_v25 = vld [vmem:[#allocation5 + $0x28] sm:$0xff] }
  0xff   :  { %121 = vst.msk [vmem:[#allocation7 + $0x70] sm:$0xff] %vm26_vm1, %v5474_v2 }
 0x100   :  { %122 = vst.msk [vmem:[#allocation7 + $0x78] sm:$0xff] %vm26_vm1, %v5474_v2 }
 0x101   :  { %v637_v9 = vpop.xlane.xlu1 %636  ;;  %123 = vst.msk [vmem:[#allocation8] sm:$0xff] %vm26_vm1, %v5474_v2 }
 0x102   :  { %124 = vst.msk [vmem:[#allocation8 + $0x8] sm:$0xff] %vm26_vm1, %v5474_v2 }
 0x103   :  { %1229 = vadd.xlane.f32.xlu0 %v1213_v58  ;;  %125 = vst.msk [vmem:[#allocation8 + $0x10] sm:$0xff] %vm26_vm1, %v5474_v2 }
 0x104   :  { %126 = vst.msk [vmem:[#allocation8 + $0x18] sm:$0xff] %vm26_vm1, %v5474_v2 }
 0x105   :  { %1161 = vadd.xlane.f32.xlu2 %v3168_v24  ;;  %v3499_v24 = vsel %vm528_vm9, 1.0, %v5474_v2  ;;  %v3579_v45 = vpop.xlane.xlu2 %1053  ;;  %127 = vst.msk [vmem:[#allocation8 + $0x20] sm:$0xff] %vm26_vm1, %v5474_v2  ;;  %vm5539_vm9 = vmmov %vm5511_vm2  ;;  %vm5540_vm2 = vcmp.ne.s32.totalorder %v3235_v47, %v2767_v42 }
 0x106   :  { %1239 = vadd.xlane.f32.xlu1 %v1218_v60  ;;  %v3518_v56 = vmul.f32 %v3499_v24, %v2927_v33  ;;  %v3534_v33 = vsel %vm533_vm3, 1.0, %v5474_v2  ;;  %128 = vst.msk [vmem:[#allocation8 + $0x28] sm:$0xff] %vm26_vm1, %v5474_v2  ;;  %v3593_v20 = vpop.xlane.xlu0 %660  ;;  %v1120_v60 = vld [vmem:[#allocation6 + $0x18] sm:$0xff]  ;;  %vm539_vm14 = vmand %vm5540_vm2, %vm5539_vm9  ;;  %vm5544_vm9 = vcmp.ne.s32.totalorder %v3121_v39, %v2767_v42 }
 0x107   :  { %v3549_v44 = vmul.f32 %v3534_v33, %v3044_v59  ;;  %129 = vst.msk [vmem:[#allocation8 + $0x30] sm:$0xff] %vm26_vm1, %v5474_v2  ;;  %vm5541_vm3 = vmmov %vm5513_vm6  ;;  %vm5542_vm6 = vcmp.ne.s32.totalorder %v3181_v22, %v2767_v42 }
 0x108   :  { %v1217_v41 = vmul.f32 %v3518_v56, %v2925_v32  ;;  %130 = vst.msk [vmem:[#allocation8 + $0x38] sm:$0xff] %vm26_vm1, %v5474_v2  ;;  %vm535_vm10 = vmand %vm5542_vm6, %vm5541_vm3 }
 0x109   :  { %5516 = vst [vmem:[#allocation36_spill] sm:$0xff] %v3549_v44  ;;  %v1222_v59 = vmul.f32 %v3549_v44, %v3016_v30  ;;  %v645_v49 = vpop.xlane.xlu1 %644  ;;  %v1021_v44 = vld [vmem:[#allocation5] sm:$0xff]  ;;  %vm5543_vm7 = vmmov %vm5541_vm3 }
 0x10a   :  { %131 = vst.msk [vmem:[#allocation8 + $0x40] sm:$0xff] %vm26_vm1, %v5474_v2  ;;  %vm534_vm2 = vmand %vm5544_vm9, %vm5543_vm7 }
 0x10b   :  { %1235 = vadd.xlane.f32.xlu0 %v1216_v3  ;;  %132 = vst.msk [vmem:[#allocation8 + $0x48] sm:$0xff] %vm26_vm1, %v5474_v2  ;;  %v1118_v3 = vld [vmem:[#allocation6 + $0x8] sm:$0xff] }
 0x10c   :  { %133 = vst.msk [vmem:[#allocation8 + $0x50] sm:$0xff] %vm26_vm1, %v5474_v2 }
 0x10d   :  { %1231 = vadd.xlane.f32.xlu2 %v1214_v15  ;;  %v653_v58 = vpop.xlane.xlu2 %652  ;;  %134 = vst.msk [vmem:[#allocation8 + $0x58] sm:$0xff] %vm26_vm1, %v5474_v2  ;;  %v1167_v15 = vadd.f32 %v1138_v6, %v1119_v53  ;;  %v2596_v6 = vmov -1e+30  }
 0x10e   :  { %1245 = vadd.xlane.f32.xlu1 %v1221_v28  ;;  %135 = vst.msk [vmem:[#allocation8 + $0x60] sm:$0xff] %vm26_vm1, %v5474_v2  ;;  %v1168_v28 = vadd.f32 %v1140_v12, %v1120_v60 }
 0x10f   :  { %136 = vst.msk [vmem:[#allocation8 + $0x68] sm:$0xff] %vm26_vm1, %v5474_v2 }
 0x110   :  { %137 = vst.msk [vmem:[#allocation8 + $0x70] sm:$0xff] %vm26_vm1, %v5474_v2 }
 0x111   :  { %138 = vst.msk [vmem:[#allocation8 + $0x78] sm:$0xff] %vm26_vm1, %v5474_v2 }
 0x112   :  { %1183 = vst.msk [vmem:[#allocation6 + $0x10] sm:$0xff] %vm26_vm1, %v1167_v15 }
 0x113   :  { %1241 = vadd.xlane.f32.xlu0 %v1219_v16  ;;  %v1070_v16 = vpop.xlane.xlu0 %1069  ;;  %1184 = vst.msk [vmem:[#allocation6 + $0x18] sm:$0xff] %vm26_vm1, %v1168_v28 }
 0x114   :  { %27 = vst.msk [vmem:[#allocation2] sm:$0xff] %vm26_vm1, %v2596_v6 }
 0x115   :  { %1237 = vadd.xlane.f32.xlu2 %v1217_v41  ;;  %v1166_v41 = vadd.f32 %v1136_v36, %v1118_v3  ;;  %28 = vst.msk [vmem:[#allocation2 + $0x8] sm:$0xff] %vm26_vm1, %v2596_v6 }
 0x116   :  { %29 = vst.msk [vmem:[#allocation2 + $0x10] sm:$0xff] %vm26_vm1, %v2596_v6 }
 0x117   :  { %1182 = vst.msk [vmem:[#allocation6 + $0x8] sm:$0xff] %vm26_vm1, %v1166_v41 }
 0x118   :  { %30 = vst.msk [vmem:[#allocation2 + $0x18] sm:$0xff] %vm26_vm1, %v2596_v6 }
 0x119   :  { %31 = vst.msk [vmem:[#allocation2 + $0x20] sm:$0xff] %vm26_vm1, %v2596_v6 }
 0x11a   :  { %32 = vst.msk [vmem:[#allocation2 + $0x28] sm:$0xff] %vm26_vm1, %v2596_v6 }
 0x11b   :  { %1247 = vadd.xlane.f32.xlu0 %v1222_v59  ;;  %v1062_v59 = vpop.xlane.xlu1 %1061  ;;  %v1064_v12 = vpop.xlane.xlu0 %1063  ;;  %33 = vst.msk [vmem:[#allocation2 + $0x30] sm:$0xff] %vm26_vm1, %v2596_v6  ;;  %v3625_v60 = vld [vmem:[#allocation2] sm:$0xff] }
 0x11c   :  { %5517 = vst [vmem:[#allocation37_spill] sm:$0xff] %v3625_v60  ;;  %v3629_v3 = vmax.f32 %v3625_v60, %v637_v9  ;;  %v3632_v15 = vld [vmem:[#allocation2 + $0x8] sm:$0xff]  ;;  %v1029_v60 = vld [vmem:[#allocation5 + $0x40] sm:$0xff] }
 0x11d   :  { %1243 = vadd.xlane.f32.xlu2 %v1220_v63  ;;  %v639_v63 = vpop.xlane.xlu2 %638  ;;  %34 = vst.msk [vmem:[#allocation2 + $0x38] sm:$0xff] %vm26_vm1, %v2596_v6  ;;  %v3675_v55 = vld [vmem:[#allocation2 + $0x10] sm:$0xff] }
 0x11e   :  { %5518 = vst [vmem:[#allocation38_spill] sm:$0xff] %v3629_v3  ;;  %v3636_v28 = vmax.f32 %v3632_v15, %v639_v63 }
 0x11f   :  { %35 = vst.msk [vmem:[#allocation2 + $0x40] sm:$0xff] %vm26_vm1, %v2596_v6 }
 0x120   :  { %5519 = vst [vmem:[#allocation39_spill] sm:$0xff] %v3632_v15  ;;  %v3644_v9 = vld [vmem:[#allocation2 + $0x20] sm:$0xff] }
 0x121   :  { %36 = vst.msk [vmem:[#allocation2 + $0x48] sm:$0xff] %vm26_vm1, %v2596_v6  ;;  %v3651_v63 = vmax.f32 %v3644_v9, %v645_v49  ;;  %v3653_v41 = vld [vmem:[#allocation2 + $0x28] sm:$0xff]  ;;  %v1025_v15 = vld [vmem:[#allocation5 + $0x20] sm:$0xff] }
 0x122   :  { %973 = vst.msk [vmem:[#allocation2] sm:$0xff] %vm26_vm1, %v3629_v3 }
 0x123   :  { %v1056_v53 = vpop.xlane.xlu1 %1055  ;;  %v655_v43 = vpop.xlane.xlu0 %654  ;;  %37 = vst.msk [vmem:[#allocation2 + $0x50] sm:$0xff] %vm26_vm1, %v2596_v6 }
 0x124   :  { %5520 = vst [vmem:[#allocation40_spill] sm:$0xff] %v3644_v9  ;;  %v1089_v9 = vadd.f32 %v1062_v59, %v1025_v15 }
 0x125   :  { %v647_v36 = vpop.xlane.xlu2 %646  ;;  %38 = vst.msk [vmem:[#allocation2 + $0x58] sm:$0xff] %vm26_vm1, %v2596_v6 }
 0x126   :  { %39 = vst.msk [vmem:[#allocation2 + $0x60] sm:$0xff] %vm26_vm1, %v2596_v6  ;;  %v3658_v0 = vmax.f32 %v3653_v41, %v647_v36  ;;  %v3665_v49 = vld [vmem:[#allocation2 + $0x40] sm:$0xff]  ;;  %v1093_v36 = vadd.f32 %v1070_v16, %v1029_v60  ;;  %v1022_v16 = vld [vmem:[#allocation5 + $0x8] sm:$0xff] }
 0x127   :  { %766 = vperm.xlu1 %2431, %v3629_v3   ;;  %v1085_v3 = vadd.f32 %v3579_v45, %v1021_v44  ;;  %40 = vst.msk [vmem:[#allocation2 + $0x68] sm:$0xff] %vm26_vm1, %v2596_v6  ;;  %v3671_v45 = vmax.f32 %v3665_v49, %v653_v58  ;;  %v1086_v60 = vadd.f32 %v1056_v53, %v1022_v16  ;;  %v1030_v53 = vld [vmem:[#allocation5 + $0x48] sm:$0xff]  ;;  %v3718_v16 = vld [vmem:[#allocation2 + $0x30] sm:$0xff] }
 0x128   :  { %41 = vst.msk [vmem:[#allocation2 + $0x70] sm:$0xff] %vm26_vm1, %v2596_v6  ;;  %v3673_v18 = vld [vmem:[#allocation2 + $0x48] sm:$0xff] }
 0x129   :  { %42 = vst.msk [vmem:[#allocation2 + $0x78] sm:$0xff] %vm26_vm1, %v2596_v6  ;;  %v3679_v14 = vmax.f32 %v3673_v18, %v655_v43  ;;  %v1033_v6 = vld [vmem:[#allocation5 + $0x60] sm:$0xff] }
 0x12a   :  { %5521 = vst [vmem:[#allocation41_spill] sm:$0xff] %v3673_v18 }
 0x12b   :  { %v663_v29 = vpop.xlane.xlu1 %662  ;;  %1101 = vst.msk [vmem:[#allocation5] sm:$0xff] %vm26_vm1, %v1085_v3  ;;  %v641_v58 = vpop.xlane.xlu0 %640  ;;  %v1090_v3 = vadd.f32 %v1064_v12, %v1026_v25 }
 0x12c   :  { %977 = vst.msk [vmem:[#allocation2 + $0x20] sm:$0xff] %vm26_vm1, %v3651_v63  ;;  %v3690_v59 = vmax.f32 %v3675_v55, %v641_v58 }
 0x12d   :  { %v1078_v35 = vpop.xlane.xlu2 %1077  ;;  %981 = vst.msk [vmem:[#allocation2 + $0x40] sm:$0xff] %vm26_vm1, %v3671_v45  ;;  %v3693_v43 = vld [vmem:[#allocation2 + $0x60] sm:$0xff] }
 0x12e   :  { %5522 = vst [vmem:[#allocation42_spill] sm:$0xff] %v3690_v59  ;;  %v3698_v15 = vmax.f32 %v3693_v43, %v3593_v20  ;;  %v3701_v44 = vld [vmem:[#allocation2 + $0x68] sm:$0xff]  ;;  %v3731_v20 = vld [vmem:[#allocation2 + $0x50] sm:$0xff] }
 0x12f   :  { %786 = vperm.xlu0 %2430, %v3651_v63   ;;  %1109 = vst.msk [vmem:[#allocation5 + $0x40] sm:$0xff] %vm26_vm1, %v1093_v36  ;;  %v3708_v18 = vmax.f32 %v3701_v44, %v663_v29  ;;  %v1034_v29 = vld [vmem:[#allocation5 + $0x68] sm:$0xff]  ;;  %v1027_v36 = vld [vmem:[#allocation5 + $0x30] sm:$0xff] }
 0x130   :  { %1105 = vst.msk [vmem:[#allocation5 + $0x20] sm:$0xff] %vm26_vm1, %v1089_v9  ;;  %826 = vperm.xlu1 %2431, %v3698_v15   ;;  %v1097_v9 = vadd.f32 %v1078_v35, %v1033_v6 }
 0x131   :  { %5523 = vst [vmem:[#allocation43_spill] sm:$0xff] %v3701_v44 }
 0x132   :  { %974 = vst.msk [vmem:[#allocation2 + $0x8] sm:$0xff] %vm26_vm1, %v3636_v28 }
 0x133   :  { %5524 = vst [vmem:[#allocation44_spill] sm:$0xff] %v3708_v18  ;;  %v1080_v12 = vpop.xlane.xlu1 %1079  ;;  %v649_v58 = vpop.xlane.xlu0 %648 }
 0x134   :  { %985 = vst.msk [vmem:[#allocation2 + $0x60] sm:$0xff] %vm26_vm1, %v3698_v15  ;;  %v3727_v35 = vmax.f32 %v3718_v16, %v649_v58  ;;  %v1098_v6 = vadd.f32 %v1080_v12, %v1034_v29  ;;  %v1023_v12 = vld [vmem:[#allocation5 + $0x10] sm:$0xff] }
 0x135   :  { %771 = vperm.xlu2 %2432, %v3636_v28   ;;  %v1072_v25 = vpop.xlane.xlu2 %1071  ;;  %1106 = vst.msk [vmem:[#allocation5 + $0x28] sm:$0xff] %vm26_vm1, %v1090_v3 }
 0x136   :  { %5525 = vst [vmem:[#allocation45_spill] sm:$0xff] %v3718_v16  ;;  %v1094_v3 = vadd.f32 %v1072_v25, %v1030_v53 }
 0x137   :  { %831 = vperm.xlu0 %2430, %v3708_v18   ;;  %978 = vst.msk [vmem:[#allocation2 + $0x28] sm:$0xff] %vm26_vm1, %v3658_v0 }
 0x138   :  { %1102 = vst.msk [vmem:[#allocation5 + $0x8] sm:$0xff] %vm26_vm1, %v1086_v60  ;;  %811 = vperm.xlu1 %2431, %v3679_v14  }
 0x139   :  { %982 = vst.msk [vmem:[#allocation2 + $0x48] sm:$0xff] %vm26_vm1, %v3679_v14 }
 0x13a   :  { %5526 = vst [vmem:[#allocation46_spill] sm:$0xff] %v3727_v35 }
 0x13b   :  { %1113 = vst.msk [vmem:[#allocation5 + $0x60] sm:$0xff] %vm26_vm1, %v1097_v9  ;;  %v657_v58 = vpop.xlane.xlu1 %656 }
 0x13c   :  { %5527 = vst [vmem:[#allocation47_spill] sm:$0xff] %v3731_v20  ;;  %v3741_v9 = vmax.f32 %v3731_v20, %v657_v58  ;;  %v3755_v58 = vld [vmem:[#allocation2 + $0x38] sm:$0xff] }
 0x13d   :  { %791 = vperm.xlu2 %2432, %v3658_v0   ;;  %986 = vst.msk [vmem:[#allocation2 + $0x68] sm:$0xff] %vm26_vm1, %v3708_v18  ;;  %v1066_v25 = vpop.xlane.xlu2 %1065  ;;  %v3775_v20 = vld [vmem:[#allocation2 + $0x18] sm:$0xff] }
 0x13e   :  { %975 = vst.msk [vmem:[#allocation2 + $0x10] sm:$0xff] %vm26_vm1, %v3690_v59  ;;  %v1091_v53 = vadd.f32 %v1066_v25, %v1027_v36  ;;  %v3753_v25 = vld [vmem:[#allocation2 + $0x70] sm:$0xff]  ;;  %v3781_v18 = vld [vmem:[#allocation2 + $0x78] sm:$0xff] }
 0x13f   :  { %1110 = vst.msk [vmem:[#allocation5 + $0x48] sm:$0xff] %vm26_vm1, %v1094_v3  ;;  %776 = vperm.xlu0 %2430, %v3690_v59   ;;  %v1058_v3 = vpop.xlane.xlu0 %1057 }
 0x140   :  { %5528 = vst [vmem:[#allocation48_spill] sm:$0xff] %v3741_v9  ;;  %v1087_v36 = vadd.f32 %v1058_v3, %v1023_v12  ;;  %796 = vperm.xlu1 %2431, %v3727_v35  }
 0x141   :  { %1114 = vst.msk [vmem:[#allocation5 + $0x68] sm:$0xff] %vm26_vm1, %v1098_v6 }
 0x142   :  { %979 = vst.msk [vmem:[#allocation2 + $0x30] sm:$0xff] %vm26_vm1, %v3727_v35 }
 0x143   :  { %1107 = vst.msk [vmem:[#allocation5 + $0x30] sm:$0xff] %vm26_vm1, %v1091_v53  ;;  %v651_v60 = vpop.xlane.xlu1 %650  ;;  %v1035_v53 = vld [vmem:[#allocation5 + $0x70] sm:$0xff] }
 0x144   :  { %983 = vst.msk [vmem:[#allocation2 + $0x50] sm:$0xff] %vm26_vm1, %v3741_v9  ;;  %v3762_v29 = vmax.f32 %v3755_v58, %v651_v60 }
 0x145   :  { %806 = vperm.xlu2 %2432, %v3671_v45   ;;  %5529 = vst [vmem:[#allocation49_spill] sm:$0xff] %v3753_v25  ;;  %v665_v6 = vpop.xlane.xlu2 %664 }
 0x146   :  { %5530 = vst [vmem:[#allocation50_spill] sm:$0xff] %v3755_v58  ;;  %v3759_v16 = vmax.f32 %v3753_v25, %v665_v6  ;;  %v1031_v6 = vld [vmem:[#allocation5 + $0x50] sm:$0xff] }
 0x147   :  { %1103 = vst.msk [vmem:[#allocation5 + $0x10] sm:$0xff] %vm26_vm1, %v1087_v36  ;;  %816 = vperm.xlu0 %2430, %v3741_v9   ;;  %v1082_v60 = vpop.xlane.xlu0 %1081  ;;  %v1123_v58 = vld [vmem:[#allocation6 + $0x30] sm:$0xff] }
 0x148   :  { %5531 = vst [vmem:[#allocation51_spill] sm:$0xff] %v3759_v16  ;;  %v1099_v36 = vadd.f32 %v1082_v60, %v1035_v53 }
 0x149   :  { %5532 = vst [vmem:[#allocation52_spill] sm:$0xff] %v3762_v29 }
 0x14a   :  { %987 = vst.msk [vmem:[#allocation2 + $0x70] sm:$0xff] %vm26_vm1, %v3759_v16 }
 0x14b   :  { %980 = vst.msk [vmem:[#allocation2 + $0x38] sm:$0xff] %vm26_vm1, %v3762_v29  ;;  %v1074_v9 = vpop.xlane.xlu1 %1073 }
 0x14c   :  { %5533 = vst [vmem:[#allocation53_spill] sm:$0xff] %v3775_v20  ;;  %v1095_v25 = vadd.f32 %v1074_v9, %v1031_v6 }
 0x14d   :  { %836 = vperm.xlu2 %2432, %v3759_v16   ;;  %1115 = vst.msk [vmem:[#allocation5 + $0x70] sm:$0xff] %vm26_vm1, %v1099_v36  ;;  %v643_v12 = vpop.xlane.xlu2 %642  ;;  %v1024_v36 = vld [vmem:[#allocation5 + $0x18] sm:$0xff] }
 0x14e   :  { %v3779_v35 = vmax.f32 %v3775_v20, %v643_v12  ;;  %5535 = vst [vmem:[#allocation55_spill] sm:$0xff] %v3781_v18  ;;  %v1028_v12 = vld [vmem:[#allocation5 + $0x38] sm:$0xff] }
 0x14f   :  { %801 = vperm.xlu0 %2430, %v3762_v29   ;;  %1111 = vst.msk [vmem:[#allocation5 + $0x50] sm:$0xff] %vm26_vm1, %v1095_v25  ;;  %v667_v60 = vpop.xlane.xlu0 %666  ;;  %v1032_v29 = vld [vmem:[#allocation5 + $0x58] sm:$0xff] }
 0x150   :  { %5534 = vst [vmem:[#allocation54_spill] sm:$0xff] %v3779_v35  ;;  %781 = vperm.xlu1 %2431, %v3779_v35   ;;  %v3791_v9 = vmax.f32 %v3781_v18, %v667_v60  ;;  %v3800_v16 = vld [vmem:[#allocation2 + $0x58] sm:$0xff] }
 0x151   :  { %976 = vst.msk [vmem:[#allocation2 + $0x18] sm:$0xff] %vm26_vm1, %v3779_v35 }
 0x152   :  { %5536 = vst [vmem:[#allocation56_spill] sm:$0xff] %v3791_v9 }
 0x153   :  { %988 = vst.msk [vmem:[#allocation2 + $0x78] sm:$0xff] %vm26_vm1, %v3791_v9  ;;  %v1068_v25 = vpop.xlane.xlu1 %1067 }
 0x154   :  { %v1092_v53 = vadd.f32 %v1068_v25, %v1028_v12  ;;  %5537 = vst [vmem:[#allocation57_spill] sm:$0xff] %v3800_v16 }
 0x155   :  { %v1060_v3 = vpop.xlane.xlu2 %1059 }
 0x156   :  { %v1088_v20 = vadd.f32 %v1060_v3, %v1024_v36  ;;  %1108 = vst.msk [vmem:[#allocation5 + $0x38] sm:$0xff] %vm26_vm1, %v1092_v53  ;;  %v1121_v3 = vld [vmem:[#allocation6 + $0x20] sm:$0xff]  ;;  %v1036_v36 = vld [vmem:[#allocation5 + $0x78] sm:$0xff] }
 0x157   :  { %v1076_v60 = vpop.xlane.xlu0 %1075 }
 0x158   :  { %841 = vperm.xlu1 %2431, %v3791_v9   ;;  %1104 = vst.msk [vmem:[#allocation5 + $0x18] sm:$0xff] %vm26_vm1, %v1088_v20  ;;  %v1096_v35 = vadd.f32 %v1076_v60, %v1032_v29  ;;  %v1124_v60 = vld [vmem:[#allocation6 + $0x38] sm:$0xff]  ;;  %v1122_v9 = vld [vmem:[#allocation6 + $0x28] sm:$0xff] }
 0x15a   :  { %1112 = vst.msk [vmem:[#allocation5 + $0x58] sm:$0xff] %vm26_vm1, %v1096_v35  ;;  %v1126_v35 = vld [vmem:[#allocation6 + $0x48] sm:$0xff] }
 0x15b   :  { %v1146_v6 = vpop.xlane.xlu1 %1145 }
 0x15c   :  { %v1171_v44 = vadd.f32 %v1146_v6, %v1123_v58 }
 0x15d   :  { %v659_v18 = vpop.xlane.xlu2 %658 }
 0x15e   :  { %v3804_v12 = vmax.f32 %v3800_v16, %v659_v18  ;;  %1187 = vst.msk [vmem:[#allocation6 + $0x30] sm:$0xff] %vm26_vm1, %v1171_v44  ;;  %v1129_v16 = vld [vmem:[#allocation6 + $0x60] sm:$0xff] }
 0x15f   :  { %v1142_v20 = vpop.xlane.xlu0 %1141 }
 0x160   :  { %5538 = vst [vmem:[#allocation58_spill] sm:$0xff] %v3804_v12  ;;  %821 = vperm.xlu2 %2432, %v3804_v12   ;;  %v1169_v29 = vadd.f32 %v1142_v20, %v1121_v3 }
 0x161   :  { %984 = vst.msk [vmem:[#allocation2 + $0x58] sm:$0xff] %vm26_vm1, %v3804_v12 }
 0x162   :  { %1185 = vst.msk [vmem:[#allocation6 + $0x20] sm:$0xff] %vm26_vm1, %v1169_v29  ;;  %v1127_v29 = vld [vmem:[#allocation6 + $0x50] sm:$0xff] }
 0x163   :  { %v1152_v58 = vpop.xlane.xlu1 %1151 }
 0x164   :  { %v1174_v6 = vadd.f32 %v1152_v58, %v1126_v35  ;;  %v1132_v58 = vld [vmem:[#allocation6 + $0x78] sm:$0xff] }
 0x165   :  { %v1084_v18 = vpop.xlane.xlu2 %1083 }
 0x166   :  { %v1100_v25 = vadd.f32 %v1084_v18, %v1036_v36  ;;  %1190 = vst.msk [vmem:[#allocation6 + $0x48] sm:$0xff] %vm26_vm1, %v1174_v6  ;;  %v1125_v18 = vld [vmem:[#allocation6 + $0x40] sm:$0xff]  ;;  %v1225_v6 = vmul.f32 %v3099_v57, %v2908_v27 }
 0x167   :  { %v1148_v44 = vpop.xlane.xlu0 %1147 }
 0x168   :  { %1116 = vst.msk [vmem:[#allocation5 + $0x78] sm:$0xff] %vm26_vm1, %v1100_v25  ;;  %v1172_v53 = vadd.f32 %v1148_v44, %v1124_v60  ;;  %v3833_v25 = vsel %vm539_vm14, 1.0, %v5474_v2  ;;  %v3837_v60 = vsel %vm535_vm10, 1.0, %v5474_v2  ;;  %v1199_v44 = vld [vmem:[#allocation7 + $0x10] sm:$0xff]  ;;  %vm5545_vm14 = vmmov %vm5541_vm3  ;;  %vm5546_vm3 = vcmp.ne.s32.totalorder %v3093_v62, %v2767_v42 }
 0x169   :  { %vm538_vm6 = vmand %vm5546_vm3, %vm5545_vm14 }
 0x16a   :  { %1188 = vst.msk [vmem:[#allocation6 + $0x38] sm:$0xff] %vm26_vm1, %v1172_v53  ;;  %v3868_v42 = vsel %vm538_vm6, 1.0, %v5474_v2 }
 0x16b   :  { %v1158_v3 = vpop.xlane.xlu1 %1157 }
 0x16c   :  { %v1177_v12 = vadd.f32 %v1158_v3, %v1129_v16  ;;  %v1128_v3 = vld [vmem:[#allocation6 + $0x58] sm:$0xff] }
 0x16d   :  { %v1144_v20 = vpop.xlane.xlu2 %1143 }
 0x16e   :  { %v1170_v59 = vadd.f32 %v1144_v20, %v1122_v9  ;;  %1193 = vst.msk [vmem:[#allocation6 + $0x60] sm:$0xff] %vm26_vm1, %v1177_v12  ;;  %v1130_v12 = vld [vmem:[#allocation6 + $0x68] sm:$0xff]  ;;  %v3841_v20 = vmul.f32 %v3833_v25, %v3291_v34 }
 0x16f   :  { %v1154_v35 = vpop.xlane.xlu0 %1153 }
 0x170   :  { %1186 = vst.msk [vmem:[#allocation6 + $0x28] sm:$0xff] %vm26_vm1, %v1170_v59  ;;  %v1175_v36 = vadd.f32 %v1154_v35, %v1127_v29  ;;  %v3846_v29 = vmul.f32 %v3837_v60, %v3229_v17  ;;  %v1228_v17 = vmul.f32 %v3841_v20, %v3219_v37 }
 0x172   :  { %1191 = vst.msk [vmem:[#allocation6 + $0x50] sm:$0xff] %vm26_vm1, %v1175_v36  ;;  %v1224_v39 = vmul.f32 %v3846_v29, %v3241_v23 }
 0x173   :  { %v1164_v53 = vpop.xlane.xlu1 %1163 }
 0x174   :  { %v1180_v59 = vadd.f32 %v1164_v53, %v1132_v58  ;;  %v3864_v53 = vsel %vm534_vm2, 1.0, %v5474_v2 }
 0x175   :  { %v1150_v16 = vpop.xlane.xlu2 %1149 }
 0x176   :  { %v1173_v9 = vadd.f32 %v1150_v16, %v1125_v18  ;;  %1196 = vst.msk [vmem:[#allocation6 + $0x78] sm:$0xff] %vm26_vm1, %v1180_v59  ;;  %v1197_v18 = vld [vmem:[#allocation7] sm:$0xff]  ;;  %v1202_v59 = vld [vmem:[#allocation7 + $0x28] sm:$0xff] }
 0x177   :  { %v1160_v47 = vpop.xlane.xlu0 %1159 }
 0x178   :  { %1189 = vst.msk [vmem:[#allocation6 + $0x40] sm:$0xff] %vm26_vm1, %v1173_v9  ;;  %v1178_v22 = vadd.f32 %v1160_v47, %v1130_v12  ;;  %v1131_v9 = vld [vmem:[#allocation6 + $0x70] sm:$0xff]  ;;  %v3872_v12 = vmul.f32 %v3864_v53, %v3164_v8 }
 0x179   :  { %1253 = vadd.xlane.f32.xlu0 %v1225_v6  ;;  %v3877_v6 = vmul.f32 %v3868_v42, %v3147_v21 }
 0x17a   :  { %1194 = vst.msk [vmem:[#allocation6 + $0x68] sm:$0xff] %vm26_vm1, %v1178_v22 }
 0x17b   :  { %v1234_v35 = vpop.xlane.xlu1 %1233 }
 0x17c   :  { %v1263_v34 = vadd.f32 %v1234_v35, %v1199_v44  ;;  %v1200_v35 = vld [vmem:[#allocation7 + $0x18] sm:$0xff] }
 0x17d   :  { %v1156_v36 = vpop.xlane.xlu2 %1155 }
 0x17e   :  { %v1176_v58 = vadd.f32 %v1156_v36, %v1128_v3  ;;  %1279 = vst.msk [vmem:[#allocation7 + $0x10] sm:$0xff] %vm26_vm1, %v1263_v34  ;;  %v5547_v36 = vld [vmem:[#allocation22_spill] sm:$0xff] }
 0x17f   :  { %v1230_v16 = vpop.xlane.xlu0 %1229  ;;  %v1223_v34 = vmul.f32 %v3872_v12, %v5547_v36 }
 0x180   :  { %1192 = vst.msk [vmem:[#allocation6 + $0x58] sm:$0xff] %vm26_vm1, %v1176_v58  ;;  %v1261_v62 = vadd.f32 %v1230_v16, %v1197_v18  ;;  %v5548_v58 = vld [vmem:[#allocation25_spill] sm:$0xff] }
 0x181   :  { %1259 = vadd.xlane.f32.xlu0 %v1228_v17  ;;  %v1227_v8 = vmul.f32 %v3877_v6, %v5548_v58  ;;  %v1205_v17 = vld [vmem:[#allocation7 + $0x40] sm:$0xff] }
 0x182   :  { %1251 = vadd.xlane.f32.xlu1 %v1224_v39  ;;  %1277 = vst.msk [vmem:[#allocation7] sm:$0xff] %vm26_vm1, %v1261_v62  ;;  %v1198_v39 = vld [vmem:[#allocation7 + $0x8] sm:$0xff] }
 0x183   :  { %v1240_v47 = vpop.xlane.xlu1 %1239 }
 0x184   :  { %v1266_v44 = vadd.f32 %v1240_v47, %v1202_v59  ;;  %v1203_v47 = vld [vmem:[#allocation7 + $0x30] sm:$0xff] }
 0x185   :  { %v1162_v22 = vpop.xlane.xlu2 %1161 }
 0x186   :  { %v1179_v3 = vadd.f32 %v1162_v22, %v1131_v9  ;;  %1282 = vst.msk [vmem:[#allocation7 + $0x28] sm:$0xff] %vm26_vm1, %v1266_v44  ;;  %v5549_v22 = vld [vmem:[#allocation19_spill] sm:$0xff] }
 0x187   :  { %v1236_v18 = vpop.xlane.xlu0 %1235  ;;  %v1226_v44 = vmul.f32 %v3279_v50, %v5549_v22 }
 0x188   :  { %1195 = vst.msk [vmem:[#allocation6 + $0x70] sm:$0xff] %vm26_vm1, %v1179_v3  ;;  %v1264_v21 = vadd.f32 %v1236_v18, %v1200_v35  ;;  %v1201_v35 = vld [vmem:[#allocation7 + $0x20] sm:$0xff]  ;;  %v1206_v18 = vld [vmem:[#allocation7 + $0x48] sm:$0xff] }
 0x189   :  { %1249 = vadd.xlane.f32.xlu2 %v1223_v34  ;;  %1313 = vadd.xlane.f32.xlu0 %v3373_v40 }
 0x18a   :  { %1257 = vadd.xlane.f32.xlu1 %v1227_v8  ;;  %1280 = vst.msk [vmem:[#allocation7 + $0x18] sm:$0xff] %vm26_vm1, %v1264_v21 }
 0x18b   :  { %v1246_v16 = vpop.xlane.xlu1 %1245 }
 0x18c   :  { %v1269_v59 = vadd.f32 %v1246_v16, %v1205_v17 }
 0x18d   :  { %v1232_v62 = vpop.xlane.xlu2 %1231 }
 0x18e   :  { %v1262_v9 = vadd.f32 %v1232_v62, %v1198_v39  ;;  %1285 = vst.msk [vmem:[#allocation7 + $0x40] sm:$0xff] %vm26_vm1, %v1269_v59 }
 0x18f   :  { %v1242_v3 = vpop.xlane.xlu0 %1241 }
 0x190   :  { %1278 = vst.msk [vmem:[#allocation7 + $0x8] sm:$0xff] %vm26_vm1, %v1262_v9  ;;  %v1267_v40 = vadd.f32 %v1242_v3, %v1203_v47 }
 0x191   :  { %1255 = vadd.xlane.f32.xlu2 %v1226_v44  ;;  %1319 = vadd.xlane.f32.xlu0 %v3417_v51  ;;  %v1204_v51 = vld [vmem:[#allocation7 + $0x38] sm:$0xff] }
 0x192   :  { %1311 = vadd.xlane.f32.xlu1 %v3468_v1  ;;  %1283 = vst.msk [vmem:[#allocation7 + $0x30] sm:$0xff] %vm26_vm1, %v1267_v40 }
 0x195   :  { %v1238_v34 = vpop.xlane.xlu2 %1237 }
 0x196   :  { %v1265_v8 = vadd.f32 %v1238_v34, %v1201_v35 }
 0x197   :  { %v1248_v21 = vpop.xlane.xlu0 %1247 }
 0x198   :  { %1281 = vst.msk [vmem:[#allocation7 + $0x20] sm:$0xff] %vm26_vm1, %v1265_v8  ;;  %v1270_v17 = vadd.f32 %v1248_v21, %v1206_v18  ;;  %v2312_v21 = vsel %vm2798_vm8, 1.0, %v5474_v2 }
 0x199   :  { %1309 = vadd.xlane.f32.xlu2 %v3399_v52  ;;  %1325 = vadd.xlane.f32.xlu0 %v3474_v11  ;;  %v767_v39 = vpop.permute.xlu1 %766  ;;  %v2314_v52 = vsel %vm2783_vm5, 1.0, %v5474_v2 }
 0x19a   :  { %1317 = vadd.xlane.f32.xlu1 %v3518_v56  ;;  %1286 = vst.msk [vmem:[#allocation7 + $0x48] sm:$0xff] %vm26_vm1, %v1270_v17  ;;  %v844_v1 = vsub.f32 %v2868_v13, %v767_v39 }
 0x19c   :  { %v860_v59 = vmul.f32 1.442695, %v844_v1 }
 0x19d   :  { %v1244_v16 = vpop.xlane.xlu2 %1243 }
 0x19e   :  { %v1268_v62 = vadd.f32 %v1244_v16, %v1204_v51  ;;  %2434 = vpow2.f32 %v860_v59 }
 0x1a0   :  { %1284 = vst.msk [vmem:[#allocation7 + $0x38] sm:$0xff] %vm26_vm1, %v1268_v62  ;;  %v5553_v62 = vld [vmem:[#allocation21_spill] sm:$0xff] }
 0x1a1   :  { %1315 = vadd.xlane.f32.xlu2 %v3452_v10  ;;  %1393 = vadd.xlane.f32.xlu0 %v2314_v52  ;;  %v787_v11 = vpop.permute.xlu0 %786  ;;  %v2313_v10 = vsel %vm2843_vm0, 1.0, %v5474_v2 }
 0x1a2   :  { %1323 = vadd.xlane.f32.xlu1 %v3557_v46  ;;  %v848_v56 = vsub.f32 %v2925_v32, %v787_v11  ;;  %v827_v40 = vpop.permute.xlu1 %826 }
 0x1a3   :  { %v856_v35 = vsub.f32 %v2908_v27, %v827_v40 }
 0x1a4   :  { %v2435_v13 = vpop.eup %2434  ;;  %v868_v3 = vmul.f32 1.442695, %v848_v56 }
 0x1a5   :  { %v772_v47 = vpop.permute.xlu2 %771  ;;  %v892_v44 = vmul.f32 %v2435_v13, %v3385_v38  ;;  %v884_v46 = vmul.f32 1.442695, %v856_v35 }
 0x1a6   :  { %2436 = vpow2.f32 %v868_v3  ;;  %v845_v18 = vsub.f32 %v2955_v48, %v772_v47 }
 0x1a7   :  { %2438 = vpow2.f32 %v884_v46 }
 0x1a8   :  { %v862_v39 = vmul.f32 1.442695, %v845_v18 }
 0x1a9   :  { %1321 = vadd.xlane.f32.xlu2 %v3505_v7  ;;  %908 = vadd.xlane.f32.xlu0 %v892_v44  ;;  %v832_v8 = vpop.permute.xlu0 %831 }
 0x1aa   :  { %1391 = vadd.xlane.f32.xlu1 %v2313_v10  ;;  %v812_v7 = vpop.permute.xlu1 %811  ;;  %v857_v48 = vsub.f32 %v5549_v22, %v832_v8 }
 0x1ab   :  { %v853_v27 = vsub.f32 %v3016_v30, %v812_v7  ;;  %v5554_v7 = vld [vmem:[#allocation34_spill] sm:$0xff] }
 0x1ac   :  { %v2437_v51 = vpop.eup %2436  ;;  %v886_v3 = vmul.f32 1.442695, %v857_v48 }
 0x1ad   :  { %v792_v32 = vpop.permute.xlu2 %791  ;;  %v2439_v1 = vpop.eup %2438  ;;  %v878_v16 = vmul.f32 1.442695, %v853_v27  ;;  %v896_v52 = vmul.f32 %v2437_v51, %v3499_v24 }
 0x1ae   :  { %v904_v59 = vmul.f32 %v2439_v1, %v5553_v62  ;;  %v849_v56 = vsub.f32 %v2964_v61, %v792_v32 }
 0x1af   :  { %2440 = vpow2.f32 %v878_v16 }
 0x1b0   :  { %2442 = vpow2.f32 %v862_v39  ;;  %v870_v24 = vmul.f32 1.442695, %v849_v56 }
 0x1b1   :  { %1389 = vadd.xlane.f32.xlu2 %v2312_v21  ;;  %v777_v17 = vpop.permute.xlu0 %776  ;;  %932 = vadd.xlane.f32.xlu0 %v904_v59 }
 0x1b2   :  { %v797_v47 = vpop.permute.xlu1 %796 }
 0x1b3   :  { %v850_v13 = vsub.f32 %v3087_v5, %v797_v47  ;;  %v846_v5 = vsub.f32 %v3064_v19, %v777_v17  ;;  %v5556_v17 = vld [vmem:[#allocation30_spill] sm:$0xff] }
 0x1b5   :  { %v807_v9 = vpop.permute.xlu2 %806  ;;  %v2441_v40 = vpop.eup %2440  ;;  %v872_v35 = vmul.f32 1.442695, %v850_v13  ;;  %v864_v21 = vmul.f32 1.442695, %v846_v5 }
 0x1b6   :  { %v852_v11 = vsub.f32 %v2922_v31, %v807_v9  ;;  %v2443_v34 = vpop.eup %2442  ;;  %v901_v10 = vmul.f32 %v2441_v40, %v3534_v33 }
 0x1b7   :  { %v893_v31 = vmul.f32 %v2443_v34, %v3445_v54  ;;  %v5555_v54 = vld [vmem:[#allocation26_spill] sm:$0xff] }
 0x1b8   :  { %v876_v30 = vmul.f32 1.442695, %v852_v11 }
 0x1b9   :  { %916 = vadd.xlane.f32.xlu2 %v896_v52  ;;  %v817_v44 = vpop.permute.xlu0 %816  ;;  %926 = vadd.xlane.f32.xlu0 %v901_v10 }
 0x1ba   :  { %2444 = vpow2.f32 %v876_v30  ;;  %v854_v22 = vsub.f32 %v5547_v36, %v817_v44  ;;  %v5558_v44 = vld [vmem:[#allocation33_spill] sm:$0xff] }
 0x1bb   :  { %2446 = vpow2.f32 %v872_v35 }
 0x1bc   :  { %2448 = vpow2.f32 %v886_v3  ;;  %v880_v8 = vmul.f32 1.442695, %v854_v22 }
 0x1bd   :  { %2450 = vpow2.f32 %v870_v24  ;;  %v837_v39 = vpop.permute.xlu2 %836 }
 0x1be   :  { %2452 = vpow2.f32 %v880_v8  ;;  %v858_v16 = vsub.f32 %v5548_v58, %v837_v39  ;;  %v5559_v58 = vld [vmem:[#allocation31_spill] sm:$0xff]  ;;  %v5566_v39 = vld [vmem:[#allocation28_spill] sm:$0xff]  ;;  %v1298_v8 = vld [vmem:[#allocation8 + $0x28] sm:$0xff] }
 0x1bf   :  { %vm5567_vm5 = vnez %v5566_v39 }
 0x1c0   :  { %v2445_v61 = vpop.eup %2444  ;;  %v888_v11 = vmul.f32 1.442695, %v858_v16  ;;  %v1212_v16 = vld [vmem:[#allocation7 + $0x78] sm:$0xff] }
 0x1c1   :  { %910 = vadd.xlane.f32.xlu2 %v893_v31  ;;  %v900_v46 = vmul.f32 %v2445_v61, %v3455_v26  ;;  %v802_v32 = vpop.permute.xlu0 %801  ;;  %v2447_v38 = vpop.eup %2446 }
 0x1c2   :  { %v782_v18 = vpop.permute.xlu1 %781  ;;  %v2449_v36 = vpop.eup %2448  ;;  %v898_v27 = vmul.f32 %v2447_v38, %v5554_v7  ;;  %v851_v51 = vsub.f32 %v5555_v54, %v802_v32 }
 0x1c3   :  { %924 = vadd.xlane.f32.xlu1 %v900_v46  ;;  %v847_v33 = vsub.f32 %v3189_v4, %v782_v18  ;;  %v2451_v19 = vpop.eup %2450  ;;  %v905_v26 = vmul.f32 %v2449_v36, %v5556_v17  ;;  %v5557_v4 = vld [vmem:[#allocation32_spill] sm:$0xff]  ;;  %v2317_v46 = vsel %vm2938_vm15, 1.0, %v5474_v2  ;;  %v2315_v18 = vsel %vm2828_vm13, 1.0, %v5474_v2  ;;  %v1297_v36 = vld [vmem:[#allocation8 + $0x20] sm:$0xff] }
 0x1c4   :  { %920 = vadd.xlane.f32.xlu0 %v898_v27  ;;  %v874_v62 = vmul.f32 1.442695, %v851_v51  ;;  %v897_v59 = vmul.f32 %v2451_v19, %v5557_v4  ;;  %v2453_v9 = vpop.eup %2452  ;;  %v1209_v27 = vld [vmem:[#allocation7 + $0x60] sm:$0xff]  ;;  %v5568_v19 = vld [vmem:[#allocation18_spill] sm:$0xff] }
 0x1c5   :  { %v866_v1 = vmul.f32 1.442695, %v847_v33  ;;  %v902_v47 = vmul.f32 %v2453_v9, %v3864_v53  ;;  %v822_v24 = vpop.permute.xlu2 %821  ;;  %v2320_v33 = vsel %vm2884_vm11, 1.0, %v5474_v2  ;;  %vm5569_vm8 = vnez %v5568_v19 }
 0x1c6   :  { %v855_v53 = vsub.f32 %v3241_v23, %v822_v24  ;;  %v2316_v23 = vsel %vm2896_vm12, 1.0, %v5474_v2  ;;  %v2321_v17 = vsel %vm5569_vm8, 1.0, %v5474_v2 }
 0x1c7   :  { %2454 = vpow2.f32 %v866_v1  ;;  %v2323_v1 = vsel %vm5567_vm5, 1.0, %v5474_v2 }
 0x1c8   :  { %2456 = vpow2.f32 %v864_v21  ;;  %v882_v5 = vmul.f32 1.442695, %v855_v53  ;;  %v2318_v21 = vsel %vm3057_vm4, 1.0, %v5474_v2  ;;  %v5580_v53 = vld [vmem:[#allocation17_spill] sm:$0xff] }
 0x1c9   :  { %934 = vadd.xlane.f32.xlu2 %v905_v26  ;;  %2458 = vpow2.f32 %v874_v62  ;;  %v5570_v26 = vld [vmem:[#allocation27_spill] sm:$0xff]  ;;  %v1208_v62 = vld [vmem:[#allocation7 + $0x58] sm:$0xff]  ;;  %vm5581_vm4 = vnez %v5580_v53 }
 0x1ca   :  { %v842_v52 = vpop.permute.xlu1 %841  ;;  %vm5571_vm13 = vnez %v5570_v26  ;;  %v1375_v26 = vld [vmem:[#allocation4 + $0x10] sm:$0xff] }
 0x1cb   :  { %918 = vadd.xlane.f32.xlu1 %v897_v59  ;;  %v859_v48 = vsub.f32 %v3219_v37, %v842_v52  ;;  %v5560_v37 = vld [vmem:[#allocation35_spill] sm:$0xff] }
 0x1cd   :  { %v2455_v56 = vpop.eup %2454  ;;  %v890_v30 = vmul.f32 1.442695, %v859_v48  ;;  %v5572_v48 = vld [vmem:[#allocation23_spill] sm:$0xff] }
 0x1ce   :  { %v2457_v13 = vpop.eup %2456  ;;  %v895_v3 = vmul.f32 %v2455_v56, %v5558_v44  ;;  %vm5573_vm0 = vnez %v5572_v48  ;;  %v5574_v56 = vld [vmem:[#allocation16_spill] sm:$0xff]  ;;  %v1207_v44 = vld [vmem:[#allocation7 + $0x50] sm:$0xff] }
 0x1cf   :  { %2460 = vpow2.f32 %v890_v30  ;;  %v894_v40 = vmul.f32 %v2457_v13, %v5559_v58  ;;  %v2459_v35 = vpop.eup %2458  ;;  %vm5575_vm11 = vnez %v5574_v56  ;;  %v1211_v58 = vld [vmem:[#allocation7 + $0x70] sm:$0xff] }
 0x1d0   :  { %2462 = vpow2.f32 %v888_v11  ;;  %914 = vadd.xlane.f32.xlu0 %v895_v3  ;;  %v899_v10 = vmul.f32 %v2459_v35, %v5560_v37  ;;  %v2326_v11 = vsel %vm5573_vm0, 1.0, %v5474_v2  ;;  %v2324_v30 = vsel %vm5575_vm11, 1.0, %v5474_v2  ;;  %v1295_v3 = vld [vmem:[#allocation8 + $0x10] sm:$0xff] }
 0x1d1   :  { %928 = vadd.xlane.f32.xlu2 %v902_v47  ;;  %2464 = vpow2.f32 %v882_v5  ;;  %v5576_v47 = vld [vmem:[#allocation24_spill] sm:$0xff]  ;;  %v1210_v5 = vld [vmem:[#allocation7 + $0x68] sm:$0xff] }
 0x1d2   :  { %vm5577_vm12 = vnez %v5576_v47 }
 0x1d3   :  { %912 = vadd.xlane.f32.xlu1 %v894_v40  ;;  %v2322_v13 = vsel %vm5577_vm12, 1.0, %v5474_v2 }
 0x1d5   :  { %v2461_v34 = vpop.eup %2460 }
 0x1d6   :  { %v2463_v22 = vpop.eup %2462  ;;  %v907_v31 = vmul.f32 %v2461_v34, %v3833_v25 }
 0x1d7   :  { %v906_v61 = vmul.f32 %v2463_v22, %v3868_v42  ;;  %v2465_v38 = vpop.eup %2464  ;;  %v5578_v22 = vld [vmem:[#allocation29_spill] sm:$0xff] }
 0x1d8   :  { %938 = vadd.xlane.f32.xlu0 %v907_v31  ;;  %v903_v7 = vmul.f32 %v2465_v38, %v3837_v60  ;;  %v2319_v60 = vsel %vm5571_vm13, 1.0, %v5474_v2  ;;  %vm5579_vm15 = vnez %v5578_v22 }
 0x1d9   :  { %922 = vadd.xlane.f32.xlu2 %v899_v10  ;;  %v2327_v31 = vsel %vm5579_vm15, 1.0, %v5474_v2 }
 0x1db   :  { %936 = vadd.xlane.f32.xlu1 %v906_v61  ;;  %v2325_v61 = vsel %vm5581_vm4, 1.0, %v5474_v2  ;;  %v1293_v2 = vld [vmem:[#allocation8] sm:$0xff] }
 0x1e0   :  { %1399 = vadd.xlane.f32.xlu0 %v2317_v46  ;;  %v1294_v46 = vld [vmem:[#allocation8 + $0x8] sm:$0xff] }
 0x1e1   :  { %1395 = vadd.xlane.f32.xlu2 %v2315_v18 }
 0x1e3   :  { %1397 = vadd.xlane.f32.xlu1 %v2316_v23 }
 0x1e8   :  { %1405 = vadd.xlane.f32.xlu0 %v2320_v33  ;;  %v5582_v33 = vld [vmem:[#allocation36_spill] sm:$0xff] }
 0x1e9   :  { %1401 = vadd.xlane.f32.xlu2 %v2318_v21 }
 0x1eb   :  { %930 = vadd.xlane.f32.xlu1 %v903_v7 }
 0x1ec   :  { %v1254_v54 = vpop.xlane.xlu0 %1253 }
 0x1ed   :  { %v1273_v51 = vadd.f32 %v1254_v54, %v1209_v27 }
 0x1ef   :  { %1289 = vst.msk [vmem:[#allocation7 + $0x60] sm:$0xff] %vm26_vm1, %v1273_v51 }
 0x1f0   :  { %1411 = vadd.xlane.f32.xlu0 %v2323_v1  ;;  %v5584_v1 = vld [vmem:[#allocation38_spill] sm:$0xff] }
 0x1f1   :  { %1407 = vadd.xlane.f32.xlu2 %v2321_v17  ;;  %v1296_v17 = vld [vmem:[#allocation8 + $0x18] sm:$0xff] }
 0x1f3   :  { %1403 = vadd.xlane.f32.xlu1 %v2319_v60  ;;  %v1300_v60 = vld [vmem:[#allocation8 + $0x38] sm:$0xff] }
 0x1f4   :  { %v1260_v4 = vpop.xlane.xlu0 %1259 }
 0x1f5   :  { %v1252_v59 = vpop.xlane.xlu1 %1251  ;;  %v1276_v9 = vadd.f32 %v1260_v4, %v1212_v16 }
 0x1f6   :  { %v1272_v52 = vadd.f32 %v1252_v59, %v1208_v62 }
 0x1f7   :  { %1292 = vst.msk [vmem:[#allocation7 + $0x78] sm:$0xff] %vm26_vm1, %v1276_v9 }
 0x1f8   :  { %1288 = vst.msk [vmem:[#allocation7 + $0x58] sm:$0xff] %vm26_vm1, %v1272_v52  ;;  %1417 = vadd.xlane.f32.xlu0 %v2326_v11  ;;  %v1374_v11 = vld [vmem:[#allocation4 + $0x8] sm:$0xff] }
 0x1f9   :  { %1413 = vadd.xlane.f32.xlu2 %v2324_v30 }
 0x1fb   :  { %1409 = vadd.xlane.f32.xlu1 %v2322_v13 }
 0x1fc   :  { %v1250_v40 = vpop.xlane.xlu2 %1249  ;;  %v1314_v35 = vpop.xlane.xlu0 %1313 }
 0x1fd   :  { %v1271_v34 = vadd.f32 %v1250_v40, %v1207_v44  ;;  %v1258_v24 = vpop.xlane.xlu1 %1257  ;;  %v1343_v37 = vadd.f32 %v1314_v35, %v1295_v3  ;;  %v5586_v3 = vld [vmem:[#allocation40_spill] sm:$0xff] }
 0x1fe   :  { %v1275_v10 = vadd.f32 %v1258_v24, %v1211_v58  ;;  %v5587_v58 = vsub.f32 %v5586_v3, %v3651_v63  ;;  %v1373_v63 = vld [vmem:[#allocation4] sm:$0xff] }
 0x1ff   :  { %1287 = vst.msk [vmem:[#allocation7 + $0x50] sm:$0xff] %vm26_vm1, %v1271_v34  ;;  %v5588_v34 = vld [vmem:[#allocation39_spill] sm:$0xff] }
 0x200   :  { %1291 = vst.msk [vmem:[#allocation7 + $0x70] sm:$0xff] %vm26_vm1, %v1275_v10  ;;  %1329 = vadd.xlane.f32.xlu0 %v3872_v12  ;;  %v1301_v12 = vld [vmem:[#allocation8 + $0x40] sm:$0xff]  ;;  %v708_v40 = vmul.f32 1.442695, %v5587_v58  ;;  %v5589_v24 = vsub.f32 %v5588_v34, %v3636_v28  ;;  %v5590_v10 = vsub.f32 %v3693_v43, %v3698_v15  ;;  %v5595_v43 = vld [vmem:[#allocation42_spill] sm:$0xff] }
 0x201   :  { %1419 = vadd.xlane.f32.xlu2 %v2327_v31  ;;  %1359 = vst.msk [vmem:[#allocation8 + $0x10] sm:$0xff] %vm26_vm1, %v1343_v37  ;;  %v5591_v31 = vsub.f32 %v3653_v41, %v3658_v0  ;;  %v5596_v15 = vsub.f32 %v3675_v55, %v5595_v43  ;;  %v5612_v58 = vld [vmem:[#allocation53_spill] sm:$0xff] }
 0x202   :  { %v702_v37 = vmul.f32 1.442695, %v5589_v24  ;;  %v724_v22 = vmul.f32 1.442695, %v5590_v10  ;;  %v737_v10 = vld [vmem:[#allocation3 + $0x28] sm:$0xff] }
 0x203   :  { %1415 = vadd.xlane.f32.xlu1 %v2325_v61  ;;  %v710_v53 = vmul.f32 1.442695, %v5591_v31  ;;  %v5592_v61 = vsub.f32 %v3665_v49, %v3671_v45  ;;  %v704_v0 = vmul.f32 1.442695, %v5596_v15  ;;  %v5600_v49 = vld [vmem:[#allocation45_spill] sm:$0xff]  ;;  %v5601_v45 = vld [vmem:[#allocation46_spill] sm:$0xff] }
 0x204   :  { %v1256_v32 = vpop.xlane.xlu2 %1255  ;;  %v1320_v18 = vpop.xlane.xlu0 %1319  ;;  %v5615_v31 = vld [vmem:[#allocation55_spill] sm:$0xff] }
 0x205   :  { %v1274_v25 = vadd.f32 %v1256_v32, %v1210_v5  ;;  %v1312_v23 = vpop.xlane.xlu1 %1311  ;;  %v1346_v38 = vadd.f32 %v1320_v18, %v1298_v8  ;;  %v716_v28 = vmul.f32 1.442695, %v5592_v61  ;;  %v5593_v5 = vld [vmem:[#allocation41_spill] sm:$0xff]  ;;  %v5597_v18 = vld [vmem:[#allocation43_spill] sm:$0xff] }
 0x206   :  { %v1342_v42 = vadd.f32 %v1312_v23, %v1294_v46  ;;  %v5594_v8 = vsub.f32 %v5593_v5, %v3679_v14  ;;  %v5603_v14 = vld [vmem:[#allocation47_spill] sm:$0xff]  ;;  %v741_v5 = vld [vmem:[#allocation3 + $0x48] sm:$0xff] }
 0x207   :  { %1290 = vst.msk [vmem:[#allocation7 + $0x68] sm:$0xff] %vm26_vm1, %v1274_v25  ;;  %v5598_v25 = vld [vmem:[#allocation44_spill] sm:$0xff] }
 0x208   :  { %1358 = vst.msk [vmem:[#allocation8 + $0x8] sm:$0xff] %vm26_vm1, %v1342_v42  ;;  %1335 = vadd.xlane.f32.xlu0 %v3279_v50  ;;  %v5583_v50 = vld [vmem:[#allocation37_spill] sm:$0xff]  ;;  %v718_v46 = vmul.f32 1.442695, %v5594_v8  ;;  %v5599_v23 = vsub.f32 %v5597_v18, %v5598_v25  ;;  %v5602_v42 = vsub.f32 %v5600_v49, %v5601_v45  ;;  %v738_v49 = vld [vmem:[#allocation3 + $0x30] sm:$0xff] }
 0x209   :  { %1331 = vadd.xlane.f32.xlu2 %v3846_v29  ;;  %1362 = vst.msk [vmem:[#allocation8 + $0x28] sm:$0xff] %vm26_vm1, %v1346_v38  ;;  %v5585_v29 = vsub.f32 %v5583_v50, %v5584_v1  ;;  %v5606_v50 = vld [vmem:[#allocation49_spill] sm:$0xff]  ;;  %v5607_v1 = vld [vmem:[#allocation51_spill] sm:$0xff] }
 0x20a   :  { %v726_v38 = vmul.f32 1.442695, %v5599_v23 }
 0x20b   :  { %1327 = vadd.xlane.f32.xlu1 %v5582_v33  ;;  %v700_v19 = vmul.f32 1.442695, %v5585_v29  ;;  %v5604_v33 = vld [vmem:[#allocation48_spill] sm:$0xff]  ;;  %v5608_v29 = vsub.f32 %v5606_v50, %v5607_v1  ;;  %v1584_v50 = vld [vmem:[#allocation5] sm:$0xff] }
 0x20c   :  { %v1310_v21 = vpop.xlane.xlu2 %1309  ;;  %v1326_v7 = vpop.xlane.xlu0 %1325 }
 0x20d   :  { %v1341_v27 = vadd.f32 %v1310_v21, %v1293_v2  ;;  %v1318_v54 = vpop.xlane.xlu1 %1317  ;;  %v1349_v51 = vadd.f32 %v1326_v7, %v1301_v12  ;;  %2466 = vpow2.f32 %v700_v19  ;;  %v712_v2 = vmul.f32 1.442695, %v5602_v42  ;;  %v1616_v42 = vld [vmem:[#allocation7] sm:$0xff] }
 0x20e   :  { %v1345_v39 = vadd.f32 %v1318_v54, %v1297_v36  ;;  %2468 = vpow2.f32 %v708_v40  ;;  %v5605_v36 = vsub.f32 %v5603_v14, %v5604_v33  ;;  %v728_v19 = vmul.f32 1.442695, %v5608_v29  ;;  %v5613_v40 = vld [vmem:[#allocation54_spill] sm:$0xff] }
 0x20f   :  { %1357 = vst.msk [vmem:[#allocation8] sm:$0xff] %vm26_vm1, %v1341_v27  ;;  %2470 = vpow2.f32 %v702_v37  ;;  %v736_v27 = vld [vmem:[#allocation3 + $0x20] sm:$0xff] }
 0x210   :  { %1361 = vst.msk [vmem:[#allocation8 + $0x20] sm:$0xff] %vm26_vm1, %v1345_v39  ;;  %2472 = vpow2.f32 %v724_v22  ;;  %v720_v55 = vmul.f32 1.442695, %v5605_v36 }
 0x211   :  { %1337 = vadd.xlane.f32.xlu2 %v3877_v6  ;;  %1365 = vst.msk [vmem:[#allocation8 + $0x40] sm:$0xff] %vm26_vm1, %v1349_v51  ;;  %v1299_v6 = vld [vmem:[#allocation8 + $0x30] sm:$0xff]  ;;  %2474 = vpow2.f32 %v710_v53  ;;  %v5616_v53 = vld [vmem:[#allocation56_spill] sm:$0xff] }
 0x212   :  { %2476 = vpow2.f32 %v716_v28  ;;  %v740_v28 = vld [vmem:[#allocation3 + $0x40] sm:$0xff] }
 0x213   :  { %1333 = vadd.xlane.f32.xlu1 %v3099_v57  ;;  %v2467_v48 = vpop.eup %2466  ;;  %v732_v57 = vld [vmem:[#allocation3] sm:$0xff]  ;;  %2478 = vpow2.f32 %v718_v46 }
 0x214   :  { %v1316_v16 = vpop.xlane.xlu2 %1315  ;;  %v1394_v62 = vpop.xlane.xlu0 %1393  ;;  %v748_v44 = vmul.f32 %v2467_v48, %v732_v57  ;;  %2480 = vpow2.f32 %v704_v0  ;;  %v5609_v57 = vld [vmem:[#allocation50_spill] sm:$0xff]  ;;  %v5618_v46 = vld [vmem:[#allocation57_spill] sm:$0xff] }
 0x215   :  { %v1344_v4 = vadd.f32 %v1316_v16, %v1296_v17  ;;  %v1324_v59 = vpop.xlane.xlu1 %1323  ;;  %v1423_v9 = vadd.f32 %v1394_v62, %v1375_v26  ;;  %v2469_v21 = vpop.eup %2468  ;;  %2482 = vpow2.f32 %v726_v38  ;;  %v744_v26 = vld [vmem:[#allocation3 + $0x60] sm:$0xff]  ;;  %v745_v0 = vld [vmem:[#allocation3 + $0x68] sm:$0xff] }
 0x216   :  { %v1348_v52 = vadd.f32 %v1324_v59, %v1300_v60  ;;  %v2471_v51 = vpop.eup %2470  ;;  %2484 = vpow2.f32 %v712_v2  ;;  %v752_v62 = vmul.f32 %v2469_v21, %v736_v27 }
 0x217   :  { %1360 = vst.msk [vmem:[#allocation8 + $0x18] sm:$0xff] %vm26_vm1, %v1344_v4  ;;  %v2473_v39 = vpop.eup %2472  ;;  %2486 = vpow2.f32 %v720_v55  ;;  %v1648_v55 = vld [vmem:[#allocation8] sm:$0xff] }
 0x218   :  { %1364 = vst.msk [vmem:[#allocation8 + $0x38] sm:$0xff] %vm26_vm1, %v1348_v52  ;;  %v2475_v60 = vpop.eup %2474  ;;  %v760_v48 = vmul.f32 %v2473_v39, %v744_v26  ;;  %v1456_v39 = vld [vmem:[#allocation2] sm:$0xff] }
 0x219   :  { %1439 = vst.msk [vmem:[#allocation4 + $0x10] sm:$0xff] %vm26_vm1, %v1423_v9  ;;  %v2477_v59 = vpop.eup %2476  ;;  %v4079_v38 = vmul.f32 %v2475_v60, %v737_v10  ;;  %v1600_v60 = vld [vmem:[#allocation6] sm:$0xff] }
 0x21a   :  { %v2479_v9 = vpop.eup %2478 }
 0x21b   :  { %1339 = vadd.xlane.f32.xlu1 %v3841_v20  ;;  %v757_v33 = vmul.f32 %v2479_v9, %v741_v5 }
 0x21c   :  { %v1322_v56 = vpop.xlane.xlu2 %1321  ;;  %v909_v35 = vpop.xlane.xlu0 %908 }
 0x21d   :  { %v1347_v30 = vadd.f32 %v1322_v56, %v1299_v6  ;;  %v1392_v47 = vpop.xlane.xlu1 %1391  ;;  %v940_v20 = vadd.f32 %v909_v35, %v748_v44  ;;  %v5610_v56 = vld [vmem:[#allocation52_spill] sm:$0xff]  ;;  %v5614_v35 = vsub.f32 %v5612_v58, %v5613_v40 }
 0x21e   :  { %v1422_v13 = vadd.f32 %v1392_v47, %v1374_v11  ;;  %v4050_v11 = vpop.eup %2480 }
 0x21f   :  { %1363 = vst.msk [vmem:[#allocation8 + $0x30] sm:$0xff] %vm26_vm1, %v1347_v30  ;;  %v5611_v30 = vsub.f32 %v5609_v57, %v5610_v56  ;;  %v2483_v3 = vpop.eup %2482  ;;  %v706_v34 = vmul.f32 1.442695, %v5614_v35 }
 0x220   :  { %1438 = vst.msk [vmem:[#allocation4 + $0x8] sm:$0xff] %vm26_vm1, %v1422_v13  ;;  %v1538_v24 = vld [vmem:[#allocation4 + $0x10] sm:$0xff]  ;;  %v2485_v22 = vpop.eup %2484 }
 0x221   :  { %957 = vst.msk [vmem:[#allocation3] sm:$0xff] %vm26_vm1, %v940_v20  ;;  %v714_v47 = vmul.f32 1.442695, %v5611_v30  ;;  %v733_v20 = vld [vmem:[#allocation3 + $0x8] sm:$0xff]  ;;  %v4068_v8 = vpop.eup %2486  ;;  %v4077_v18 = vadd.f32 -1.0, %v1538_v24  ;;  %v4081_v2 = vsub.f32 8.0, %v1538_v24 }
 0x222   :  { %v749_v25 = vmul.f32 %v2471_v51, %v733_v20 }
 0x224   :  { %v1390_v32 = vpop.xlane.xlu2 %1389  ;;  %v933_v54 = vpop.xlane.xlu0 %932 }
 0x225   :  { %v1421_v41 = vadd.f32 %v1390_v32, %v1373_v63  ;;  %v952_v37 = vadd.f32 %v933_v54, %v760_v48  ;;  %v5617_v63 = vsub.f32 %v5615_v31, %v5616_v53  ;;  %v5619_v32 = vld [vmem:[#allocation58_spill] sm:$0xff]  ;;  %v761_v54 = vmul.f32 %v2483_v3, %v745_v0 }
 0x226   :  { %v5620_v43 = vsub.f32 %v5618_v46, %v5619_v32 }
 0x227   :  { %v1537_v12 = vld [vmem:[#allocation4 + $0x8] sm:$0xff]  ;;  %1437 = vst.msk [vmem:[#allocation4] sm:$0xff] %vm26_vm1, %v1421_v41  ;;  %v730_v61 = vmul.f32 1.442695, %v5617_v63 }
 0x228   :  { %v4042_v7 = vadd.f32 -1.0, %v1537_v12  ;;  %v1472_v17 = vld [vmem:[#allocation3] sm:$0xff]  ;;  %v4047_v16 = vsub.f32 8.0, %v1537_v12  ;;  %v722_v15 = vmul.f32 1.442695, %v5620_v43  ;;  %969 = vst.msk [vmem:[#allocation3 + $0x60] sm:$0xff] %vm26_vm1, %v952_v37  ;;  %v756_v12 = vmul.f32 %v2477_v59, %v740_v28 }
 0x22a   :  { %2488 = vrcp.f32 %v4042_v7  ;;  %vm1748_vm8 = vweird.f32 %v4042_v7  ;;  %vm2052_vm12 = vweird.f32 %v4047_v16 }
 0x22b   :  { %2490 = vlog2.f32 %v1472_v17  ;;  %v754_v17 = vmul.f32 %v2485_v22, %v738_v49 }
 0x22c   :  { %v917_v4 = vpop.xlane.xlu2 %916  ;;  %2492 = vpow2.f32 %v728_v19  ;;  %v927_v23 = vpop.xlane.xlu0 %926 }
 0x22d   :  { %v944_v6 = vadd.f32 %v917_v4, %v752_v62  ;;  %2494 = vrcp.f32 %v4047_v16  ;;  %v949_v19 = vadd.f32 %v927_v23, %v757_v33  ;;  %v1632_v62 = vsub.f32 %v1616_v42, %v1584_v50 }
 0x22e   :  { %v1536_v52 = vld [vmem:[#allocation4] sm:$0xff] }
 0x22f   :  { %v4055_v13 = vadd.f32 -1.0, %v1536_v52  ;;  %v4057_v44 = vsub.f32 8.0, %v1536_v52  ;;  %961 = vst.msk [vmem:[#allocation3 + $0x20] sm:$0xff] %vm26_vm1, %v944_v6  ;;  %v1664_v52 = vsub.f32 %v1648_v55, %v1600_v60 }
 0x230   :  { %v4075_v41 = vpop.eup %2488  ;;  %966 = vst.msk [vmem:[#allocation3 + $0x48] sm:$0xff] %vm26_vm1, %v949_v19  ;;  %v747_v19 = vld [vmem:[#allocation3 + $0x78] sm:$0xff] }
 0x231   :  { %2496 = vrcp.f32 %v4055_v13  ;;  %v2491_v45 = vpop.eup %2490  ;;  %v4089_v1 = vmul.f32 %v4075_v41, %v4042_v7  ;;  %vm1733_vm10 = vweird.f32 %v4055_v13  ;;  %v1737_v57 = vand.u32 2147483647, %v4055_v13 }
 0x232   :  { %2498 = vrcp.f32 %v4057_v44  ;;  %v4083_v36 = vpop.eup %2492  ;;  %v1489_v21 = vmul.f32 0.6931472, %v2491_v45  ;;  %v1739_v56 = vand.u32 2147483648, %v4055_v13  ;;  %vm2037_vm7 = vweird.f32 %v4057_v44 }
 0x233   :  { %2500 = vpow2.f32 %v714_v47  ;;  %v4085_v51 = vpop.eup %2494  ;;  %v1745_v58 = vsub.f32 1.0, %v4089_v1  ;;  %v2043_v20 = vand.u32 2147483648, %v4057_v44  ;;  %v2041_v32 = vand.u32 2147483647, %v4057_v44 }
 0x234   :  { %2502 = vpow2.f32 %v706_v34  ;;  %v911_v14 = vpop.xlane.xlu2 %910  ;;  %v1520_v4 = vadd.f32 %v1489_v21, %v1456_v39  ;;  %v2048_v40 = vmul.f32 %v4085_v51, %v4047_v16  ;;  %v1740_v23 = vor.u32 1.1754944e-38, %v1739_v56  ;;  %v734_v21 = vld [vmem:[#allocation3 + $0x10] sm:$0xff] }
 0x235   :  { %2504 = vpow2.f32 %v730_v61  ;;  %v941_v27 = vadd.f32 %v911_v14, %v749_v25  ;;  %vm1738_vm3 = vcmp.eq.f32.partialorder %v1737_v57, 8.507059e+37  ;;  %vm2042_vm5 = vcmp.eq.f32.partialorder %v2041_v32, 8.507059e+37  ;;  %v4207_v32 = vld [vmem:[#allocation7 + $0x28] sm:$0xff] }
 0x236   :  { %2506 = vpow2.f32 %v722_v15  ;;  %v925_v29 = vpop.xlane.xlu1 %924  ;;  %v1680_v47 = vmul.f32 %v1600_v60, %v1520_v4  ;;  %v1984_v34 = vmul.f32 %v1664_v52, %v1520_v4  ;;  %v2049_v0 = vsub.f32 1.0, %v2048_v40  ;;  %v4157_v60 = vld [vmem:[#allocation7 + $0x10] sm:$0xff]  ;;  %v1649_v4 = vld [vmem:[#allocation8 + $0x8] sm:$0xff] }
 0x237   :  { %v4091_v26 = vpop.eup %2496  ;;  %2508 = vrcp.f32 %v4077_v18  ;;  %v948_v59 = vadd.f32 %v925_v29, %v756_v12  ;;  %958 = vst.msk [vmem:[#allocation3 + $0x8] sm:$0xff] %vm26_vm1, %v941_v27  ;;  %v921_v22 = vpop.xlane.xlu0 %920  ;;  %v746_v27 = vld [vmem:[#allocation3 + $0x70] sm:$0xff]  ;;  %v750_v52 = vmul.f32 %v4050_v11, %v734_v21  ;;  %vm1749_vm13 = vweird.f32 %v4075_v41 }
 0x238   :  { %v4095_v9 = vpop.eup %2498  ;;  %2510 = vrcp.f32 %v4081_v2  ;;  %v1729_v6 = vmul.f32 %v4091_v26, %v4055_v13  ;;  %v1696_v10 = vsub.f32 %v1584_v50, %v1680_v47  ;;  %vm1734_vm9 = vweird.f32 %v4091_v26  ;;  %v742_v50 = vld [vmem:[#allocation3 + $0x50] sm:$0xff]  ;;  %v4167_v47 = vld [vmem:[#allocation5 + $0x8] sm:$0xff]  ;;  %vm4222_vm11 = vmor %vm1748_vm8, %vm1749_vm13 }
 0x239   :  { %v4102_v48 = vpop.eup %2500  ;;  %v2033_v30 = vmul.f32 %v4095_v9, %v4057_v44  ;;  %965 = vst.msk [vmem:[#allocation3 + $0x40] sm:$0xff] %vm26_vm1, %v948_v59  ;;  %v2000_v63 = vsub.f32 %v1632_v62, %v1984_v34  ;;  %v946_v28 = vadd.f32 %v921_v22, %v754_v17  ;;  %vm2038_vm2 = vweird.f32 %v4095_v9  ;;  %vm4135_vm14 = vmor %vm1733_vm10, %vm1734_vm9  ;;  %v739_v44 = vld [vmem:[#allocation3 + $0x38] sm:$0xff]  ;;  %v4159_v62 = vld [vmem:[#allocation7 + $0x8] sm:$0xff] }
 0x23a   :  { %v4109_v3 = vpop.eup %2502  ;;  %v1730_v35 = vsub.f32 1.0, %v1729_v6  ;;  %v1712_v49 = vmul.f32 -1.0, %v1696_v10  ;;  %vm4146_vm6 = vmor %vm2037_vm7, %vm2038_vm2  ;;  %v743_v17 = vld [vmem:[#allocation3 + $0x58] sm:$0xff]  ;;  %v1746_v6 = vmul.f32 %v4075_v41, %v1745_v58  ;;  %v2050_v57 = vmul.f32 %v4085_v51, %v2049_v0  ;;  %v4169_v40 = vld [vmem:[#allocation5 + $0x10] sm:$0xff] }
 0x23b   :  { %v4114_v24 = vpop.eup %2504  ;;  %v2034_v37 = vsub.f32 1.0, %v2033_v30  ;;  %963 = vst.msk [vmem:[#allocation3 + $0x30] sm:$0xff] %vm26_vm1, %v946_v28  ;;  %v2016_v33 = vmul.f32 -1.0, %v2000_v63  ;;  %v1601_v30 = vld [vmem:[#allocation6 + $0x8] sm:$0xff]  ;;  %v758_v11 = vmul.f32 %v4068_v8, %v742_v50  ;;  %vm2053_vm0 = vweird.f32 %v4085_v51 }
 0x23c   :  { %v4118_v31 = vpop.eup %2506  ;;  %v1731_v53 = vmul.f32 %v4091_v26, %v1730_v35  ;;  %v935_v61 = vpop.xlane.xlu2 %934  ;;  %v4178_v35 = vmul.f32 %v4102_v48, %v739_v44  ;;  %v1665_v10 = vsub.f32 %v1649_v4, %v1601_v30  ;;  %v1747_v28 = vadd.f32 %v4075_v41, %v1746_v6  ;;  %vm4237_vm15 = vmor %vm2052_vm12, %vm2053_vm0  ;;  %v4250_v4 = vld [vmem:[#allocation5 + $0x40] sm:$0xff]  ;;  %v4258_v6 = vld [vmem:[#allocation6 + $0x10] sm:$0xff] }
 0x23d   :  { %v4122_v5 = vpop.eup %2508  ;;  %v2035_v46 = vmul.f32 %v4095_v9, %v2034_v37  ;;  %v953_v43 = vadd.f32 %v935_v61, %v761_v54  ;;  %v2044_v54 = vor.u32 1.1754944e-38, %v2043_v20  ;;  %v1634_v37 = vsub.f32 %v4157_v60, %v4169_v40  ;;  %v1457_v61 = vld [vmem:[#allocation2 + $0x8] sm:$0xff] }
 0x23e   :  { %v4127_v15 = vpop.eup %2510  ;;  %v1732_v25 = vadd.f32 %v4091_v26, %v1731_v53  ;;  %v1473_v45 = vld [vmem:[#allocation3 + $0x8] sm:$0xff]  ;;  %v919_v42 = vpop.xlane.xlu1 %918  ;;  %v1633_v20 = vsub.f32 %v4159_v62, %v4167_v47  ;;  %v4192_v8 = vmul.f32 %v4118_v31, %v743_v17  ;;  %v4196_v48 = vmul.f32 %v4122_v5, %v4077_v18 }
 0x23f   :  { %v2036_v14 = vadd.f32 %v4095_v9, %v2035_v46  ;;  %2512 = vlog2.f32 %v1473_v45  ;;  %v945_v55 = vadd.f32 %v919_v42, %v4079_v38  ;;  %970 = vst.msk [vmem:[#allocation3 + $0x68] sm:$0xff] %vm26_vm1, %v953_v43  ;;  %v735_v38 = vld [vmem:[#allocation3 + $0x18] sm:$0xff]  ;;  %v2051_v31 = vadd.f32 %v4085_v51, %v2050_v57  ;;  %v4211_v45 = vld [vmem:[#allocation5 + $0x28] sm:$0xff]  ;;  %v4262_v57 = vld [vmem:[#allocation7 + $0x20] sm:$0xff] }
 0x240   :  { %v1736_v39 = vsel %vm4135_vm14, %v4091_v26, %v1732_v25  ;;  %v751_v58 = vmul.f32 %v4109_v3, %v735_v38  ;;  %v4200_v3 = vmul.f32 %v4127_v15, %v4081_v2  ;;  %v4209_v43 = vld [vmem:[#allocation7 + $0x18] sm:$0xff]  ;;  %v1752_v42 = vand.u32 2147483647, %v4042_v7  ;;  %v1461_v50 = vld [vmem:[#allocation2 + $0x28] sm:$0xff] }
 0x241   :  { %v1741_v1 = vsel %vm1738_vm3, %v1740_v23, %v1736_v39  ;;  %v2040_v29 = vsel %vm4146_vm6, %v4095_v9, %v2036_v14  ;;  %962 = vst.msk [vmem:[#allocation3 + $0x28] sm:$0xff] %vm26_vm1, %v945_v55  ;;  %v4165_v9 = vmul.f32 %v4083_v36, %v746_v27  ;;  %v4181_v36 = vmul.f32 %v4114_v24, %v747_v19  ;;  %v1476_v24 = vld [vmem:[#allocation3 + $0x20] sm:$0xff] }
 0x242   :  { %v1742_v59 = vmul.f32 %v1741_v1, %v1712_v49  ;;  %v2045_v26 = vsel %vm2042_vm5, %v2044_v54, %v2040_v29  ;;  %v1754_v12 = vand.u32 2147483648, %v4042_v7  ;;  %v2058_v14 = vand.u32 2147483648, %v4047_v16  ;;  %v1480_v27 = vld [vmem:[#allocation3 + $0x40] sm:$0xff] }
 0x243   :  { %v2046_v56 = vmul.f32 %v2045_v26, %v2016_v33  ;;  %v915_v46 = vpop.xlane.xlu0 %914  ;;  %2514 = vlog2.f32 %v1476_v24  ;;  %v4216_v33 = vld [vmem:[#allocation5 + $0x18] sm:$0xff]  ;;  %v2056_v21 = vand.u32 2147483647, %v4047_v16  ;;  %v1760_v7 = vsub.f32 1.0, %v4196_v48  ;;  %v1478_v16 = vld [vmem:[#allocation3 + $0x30] sm:$0xff]  ;;  %v4270_v48 = vld [vmem:[#allocation8 + $0x28] sm:$0xff] }
 0x244   :  { %1968 = vst.msk [vmem:[%s5339_s5] sm:$0xff] %vm26_vm1, %v1742_v59  ;;  %v929_v63 = vpop.xlane.xlu2 %928  ;;  %v943_v49 = vadd.f32 %v915_v46, %v751_v58  ;;  %v2064_v38 = vsub.f32 1.0, %v4200_v3  ;;  %v1751_v29 = vsel %vm4222_vm11, %v4075_v41, %v1747_v28  ;;  %v2055_v44 = vsel %vm4237_vm15, %v4085_v51, %v2051_v31  ;;  %v4252_v59 = vld [vmem:[#allocation7 + $0x40] sm:$0xff]  ;;  %v4260_v51 = vld [vmem:[#allocation7 + $0x30] sm:$0xff]  ;;  %v4279_v28 = vld [vmem:[#allocation8 + $0x18] sm:$0xff] }
 0x245   :  { %v2513_v34 = vpop.eup %2512  ;;  %2272 = vst.msk [vmem:[%s5340_s6] sm:$0xff] %vm26_vm1, %v2046_v56  ;;  %v950_v23 = vadd.f32 %v929_v63, %v758_v11  ;;  %vm4254_vm4 = vcmp.eq.f32.partialorder %v1752_v42, 8.507059e+37  ;;  %v2059_v41 = vor.u32 1.1754944e-38, %v2058_v14  ;;  %2516 = vlog2.f32 %v1480_v27  ;;  %v4264_v56 = vld [vmem:[#allocation8 + $0x10] sm:$0xff]  ;;  %v4281_v31 = vld [vmem:[#allocation8 + $0x40] sm:$0xff] }
 0x246   :  { %v1491_v22 = vmul.f32 0.6931472, %v2513_v34  ;;  %v913_v53 = vpop.xlane.xlu1 %912  ;;  %960 = vst.msk [vmem:[#allocation3 + $0x18] sm:$0xff] %vm26_vm1, %v943_v49  ;;  %vm2057_vm10 = vcmp.eq.f32.partialorder %v2056_v21, 8.507059e+37  ;;  %2518 = vlog2.f32 %v1478_v16  ;;  %v1640_v63 = vsub.f32 %v4252_v59, %v4250_v4  ;;  %v4294_v55 = vld [vmem:[#allocation6 + $0x20] sm:$0xff]  ;;  %v4296_v21 = vld [vmem:[#allocation6 + $0x28] sm:$0xff] }
 0x247   :  { %v942_v25 = vadd.f32 %v913_v53, %v750_v52  ;;  %967 = vst.msk [vmem:[#allocation3 + $0x50] sm:$0xff] %vm26_vm1, %v950_v23  ;;  %v1755_v52 = vor.u32 1.1754944e-38, %v1754_v12  ;;  %v2060_v24 = vsel %vm2057_vm10, %v2059_v41, %v2055_v44  ;;  %v4284_v23 = vld [vmem:[#allocation6 + $0x18] sm:$0xff]  ;;  %v1666_v42 = vsub.f32 %v4264_v56, %v4258_v6  ;;  %v1606_v49 = vld [vmem:[#allocation6 + $0x30] sm:$0xff] }
 0x248   :  { %v1521_v0 = vadd.f32 %v1491_v22, %v1457_v61  ;;  %v1477_v62 = vld [vmem:[#allocation3 + $0x28] sm:$0xff]  ;;  %v4277_v61 = vld [vmem:[#allocation8 + $0x20] sm:$0xff]  ;;  %v1761_v12 = vmul.f32 %v4122_v5, %v1760_v7  ;;  %v2065_v27 = vmul.f32 %v4127_v15, %v2064_v38  ;;  %vm1763_vm7 = vweird.f32 %v4077_v18 }
 0x249   :  { %959 = vst.msk [vmem:[#allocation3 + $0x10] sm:$0xff] %vm26_vm1, %v942_v25  ;;  %v2515_v34 = vpop.eup %2514  ;;  %v1756_v3 = vsel %vm4254_vm4, %v1755_v52, %v1751_v29  ;;  %2520 = vlog2.f32 %v1477_v62  ;;  %v1668_v16 = vsub.f32 %v4277_v61, %v4294_v55  ;;  %v1667_v29 = vsub.f32 %v4279_v28, %v4284_v23  ;;  %v1377_v62 = vld [vmem:[#allocation4 + $0x20] sm:$0xff] }
 0x24a   :  { %v1681_v13 = vmul.f32 %v1601_v30, %v1521_v0  ;;  %v1985_v54 = vmul.f32 %v1665_v10, %v1521_v0  ;;  %v4268_v10 = vld [vmem:[#allocation5 + $0x30] sm:$0xff]  ;;  %v1460_v52 = vld [vmem:[#allocation2 + $0x20] sm:$0xff]  ;;  %v1762_v41 = vadd.f32 %v4122_v5, %v1761_v12  ;;  %vm1764_vm9 = vweird.f32 %v4122_v5 }
 0x24b   :  { %v939_v53 = vpop.xlane.xlu0 %938  ;;  %v2517_v7 = vpop.eup %2516  ;;  %vm2067_vm2 = vweird.f32 %v4081_v2  ;;  %vm2068_vm14 = vweird.f32 %v4127_v15  ;;  %vm4338_vm3 = vmor %vm1763_vm7, %vm1764_vm9  ;;  %v5639_v28 = vsub.f32 %v4270_v48, %v4296_v21 }
 0x24c   :  { %v1697_v19 = vsub.f32 %v4167_v47, %v1681_v13  ;;  %v2001_v17 = vsub.f32 %v1633_v20, %v1985_v54  ;;  %v923_v58 = vpop.xlane.xlu2 %922  ;;  %v4266_v20 = vld [vmem:[#allocation5 + $0x20] sm:$0xff]  ;;  %v1497_v13 = vmul.f32 0.6931472, %v2515_v34  ;;  %v955_v54 = vadd.f32 %v939_v53, %v4181_v36  ;;  %v2519_v36 = vpop.eup %2518  ;;  %vm4352_vm5 = vmor %vm2067_vm2, %vm2068_vm14 }
 0x24d   :  { %v947_v25 = vadd.f32 %v923_v58, %v4178_v35  ;;  %v4298_v35 = vld [vmem:[#allocation6 + $0x40] sm:$0xff]  ;;  %v1475_v44 = vld [vmem:[#allocation3 + $0x18] sm:$0xff]  ;;  %v1505_v34 = vmul.f32 0.6931472, %v2517_v7  ;;  %v2073_v53 = vand.u32 2147483648, %v4081_v2 }
 0x24e   :  { %v1713_v30 = vmul.f32 -1.0, %v1697_v19  ;;  %v2017_v47 = vmul.f32 -1.0, %v2001_v17  ;;  %v937_v11 = vpop.xlane.xlu1 %936  ;;  %v1672_v38 = vsub.f32 %v4281_v31, %v4298_v35  ;;  %v1767_v19 = vand.u32 2147483647, %v4077_v18  ;;  %972 = vst.msk [vmem:[#allocation3 + $0x78] sm:$0xff] %vm26_vm1, %v955_v54  ;;  %v1464_v54 = vld [vmem:[#allocation2 + $0x40] sm:$0xff] }
 0x24f   :  { %v954_v22 = vadd.f32 %v937_v11, %v4165_v9  ;;  %v1636_v9 = vsub.f32 %v4262_v57, %v4266_v20  ;;  %v1769_v17 = vand.u32 2147483648, %v4077_v18  ;;  %964 = vst.msk [vmem:[#allocation3 + $0x38] sm:$0xff] %vm26_vm1, %v947_v25  ;;  %v2521_v26 = vpop.eup %2520  ;;  %v2066_v11 = vadd.f32 %v4127_v15, %v2065_v27  ;;  %v1378_v25 = vld [vmem:[#allocation4 + $0x28] sm:$0xff]  ;;  %v1381_v57 = vld [vmem:[#allocation4 + $0x40] sm:$0xff] }
 0x250   :  { %v1757_v46 = vmul.f32 %v1756_v3, %v1713_v30  ;;  %v2061_v0 = vmul.f32 %v2060_v24, %v2017_v47  ;;  %v1474_v14 = vld [vmem:[#allocation3 + $0x10] sm:$0xff]  ;;  %v2071_v30 = vand.u32 2147483647, %v4081_v2  ;;  %v4327_v47 = vld [vmem:[#allocation8 + $0x38] sm:$0xff]  ;;  %v1524_v58 = vadd.f32 %v1497_v13, %v1460_v52 }
 0x251   :  { %971 = vst.msk [vmem:[#allocation3 + $0x70] sm:$0xff] %vm26_vm1, %v954_v22  ;;  %2522 = vlog2.f32 %v1474_v14  ;;  %v1376_v24 = vld [vmem:[#allocation4 + $0x18] sm:$0xff]  ;;  %v1501_v61 = vmul.f32 0.6931472, %v2519_v36  ;;  %vm4342_vm6 = vcmp.eq.f32.partialorder %v1767_v19, 8.507059e+37  ;;  %v1770_v7 = vor.u32 1.1754944e-38, %v1769_v17 }
 0x252   :  { %1969 = vst.msk [vmem:[%s5339_s5 + $0x8] sm:$0xff] %vm26_vm1, %v1757_v46  ;;  %2524 = vlog2.f32 %v1475_v44  ;;  %v4332_v44 = vld [vmem:[#allocation6 + $0x38] sm:$0xff]  ;;  %v1499_v36 = vmul.f32 0.6931472, %v2521_v26  ;;  %vm4356_vm8 = vcmp.eq.f32.partialorder %v2071_v30, 8.507059e+37  ;;  %v1766_v17 = vsel %vm4338_vm3, %v4122_v5, %v1762_v41 }
 0x253   :  { %2273 = vst.msk [vmem:[%s5340_s6 + $0x8] sm:$0xff] %vm26_vm1, %v2061_v0  ;;  %v1400_v12 = vpop.xlane.xlu0 %1399  ;;  %v1684_v2 = vmul.f32 %v4294_v55, %v1524_v58  ;;  %v1988_v52 = vmul.f32 %v1668_v16, %v1524_v58  ;;  %v1528_v39 = vadd.f32 %v1505_v34, %v1464_v54  ;;  %v2070_v30 = vsel %vm4352_vm5, %v4127_v15, %v2066_v11 }
 0x254   :  { %v1396_v22 = vpop.xlane.xlu2 %1395  ;;  %v2074_v27 = vor.u32 1.1754944e-38, %v2073_v53  ;;  %v1525_v55 = vadd.f32 %v1499_v36, %v1461_v50  ;;  %v1771_v16 = vsel %vm4342_vm6, %v1770_v7, %v1766_v17  ;;  %v1379_v7 = vld [vmem:[#allocation4 + $0x30] sm:$0xff] }
 0x255   :  { %v1424_v0 = vadd.f32 %v1396_v22, %v1376_v24  ;;  %v1481_v24 = vld [vmem:[#allocation3 + $0x48] sm:$0xff]  ;;  %v1700_v53 = vsub.f32 %v4266_v20, %v1684_v2  ;;  %v1688_v50 = vmul.f32 %v4298_v35, %v1528_v39 }
 0x256   :  { %v1398_v3 = vpop.xlane.xlu1 %1397  ;;  %2526 = vlog2.f32 %v1481_v24  ;;  %v2075_v15 = vsel %vm4356_vm8, %v2074_v27, %v2070_v30  ;;  %v1479_v54 = vld [vmem:[#allocation3 + $0x38] sm:$0xff] }
 0x257   :  { %v1425_v46 = vadd.f32 %v1398_v3, %v1377_v62  ;;  %v2523_v14 = vpop.eup %2522  ;;  %v1426_v62 = vadd.f32 %v1400_v12, %v1378_v25  ;;  %v1654_v3 = vld [vmem:[#allocation8 + $0x30] sm:$0xff]  ;;  %1440 = vst.msk [vmem:[#allocation4 + $0x18] sm:$0xff] %vm26_vm1, %v1424_v0  ;;  %v1992_v0 = vmul.f32 %v1672_v38, %v1528_v39  ;;  %2528 = vlog2.f32 %v1479_v54 }
 0x258   :  { %v1493_v26 = vmul.f32 0.6931472, %v2523_v14  ;;  %v2525_v22 = vpop.eup %2524  ;;  %v1458_v25 = vld [vmem:[#allocation2 + $0x10] sm:$0xff]  ;;  %v1670_v1 = vsub.f32 %v1654_v3, %v1606_v49 }
 0x259   :  { %1441 = vst.msk [vmem:[#allocation4 + $0x20] sm:$0xff] %vm26_vm1, %v1425_v46  ;;  %v1462_v12 = vld [vmem:[#allocation2 + $0x30] sm:$0xff]  ;;  %v1495_v14 = vmul.f32 0.6931472, %v2525_v22  ;;  %v1459_v46 = vld [vmem:[#allocation2 + $0x18] sm:$0xff]  ;;  %v2008_v24 = vsub.f32 %v1640_v63, %v1992_v0  ;;  %v5640_v22 = vsub.f32 %v4260_v51, %v4268_v10  ;;  %v5641_v63 = vsub.f32 %v4209_v43, %v4216_v33 }
 0x25a   :  { %v1526_v5 = vadd.f32 %v1501_v61, %v1462_v12  ;;  %v1522_v41 = vadd.f32 %v1493_v26, %v1458_v25  ;;  %1442 = vst.msk [vmem:[#allocation4 + $0x28] sm:$0xff] %vm26_vm1, %v1426_v62  ;;  %v2004_v61 = vsub.f32 %v1636_v9, %v1988_v52  ;;  %v1685_v9 = vmul.f32 %v4296_v21, %v1525_v55  ;;  %v1482_v12 = vld [vmem:[#allocation3 + $0x50] sm:$0xff] }
 0x25b   :  { %v1523_v34 = vadd.f32 %v1495_v14, %v1459_v46  ;;  %v1406_v20 = vpop.xlane.xlu0 %1405  ;;  %v4442_v27 = vmul.f32 -1.0, %v2008_v24 }
 0x25c   :  { %v1682_v11 = vmul.f32 %v4258_v6, %v1522_v41  ;;  %v1986_v58 = vmul.f32 %v1666_v42, %v1522_v41  ;;  %v1402_v36 = vpop.xlane.xlu2 %1401  ;;  %v1686_v62 = vmul.f32 %v1606_v49, %v1526_v5  ;;  %v1990_v6 = vmul.f32 %v1670_v1, %v1526_v5  ;;  %v4393_v18 = vpop.eup %2526 }
 0x25d   :  { %v1427_v39 = vadd.f32 %v1402_v36, %v1379_v7  ;;  %v1429_v35 = vadd.f32 %v1406_v20, %v1381_v57  ;;  %v1683_v49 = vmul.f32 %v4284_v23, %v1523_v34  ;;  %v1987_v60 = vmul.f32 %v1667_v29, %v1523_v34  ;;  %v2529_v2 = vpop.eup %2528 }
 0x25e   :  { %v931_v13 = vpop.xlane.xlu1 %930  ;;  %v1698_v56 = vsub.f32 %v4169_v40, %v1682_v11  ;;  %v2002_v42 = vsub.f32 %v1634_v37, %v1986_v58  ;;  %v1539_v1 = vld [vmem:[#allocation4 + $0x18] sm:$0xff]  ;;  %v1989_v23 = vmul.f32 %v5639_v28, %v1525_v55  ;;  %v1702_v29 = vsub.f32 %v4268_v10, %v1686_v62 }
 0x25f   :  { %v951_v31 = vadd.f32 %v931_v13, %v4192_v8  ;;  %v4402_v19 = vadd.f32 -1.0, %v1539_v1  ;;  %v1704_v8 = vsub.f32 %v4250_v4, %v1688_v50  ;;  %1443 = vst.msk [vmem:[#allocation4 + $0x30] sm:$0xff] %vm26_vm1, %v1427_v39  ;;  %v2006_v25 = vsub.f32 %v5640_v22, %v1990_v6 }
 0x260   :  { %v1540_v52 = vld [vmem:[#allocation4 + $0x20] sm:$0xff]  ;;  %v1714_v38 = vmul.f32 -1.0, %v1698_v56  ;;  %v2018_v3 = vmul.f32 -1.0, %v2002_v42  ;;  %1445 = vst.msk [vmem:[#allocation4 + $0x40] sm:$0xff] %vm26_vm1, %v1429_v35  ;;  %v4419_v4 = vmul.f32 -1.0, %v1700_v53  ;;  %v1701_v59 = vsub.f32 %v4211_v45, %v1685_v9 }
 0x261   :  { %v4398_v40 = vadd.f32 -1.0, %v1540_v52  ;;  %v4400_v37 = vsub.f32 8.0, %v1540_v52  ;;  %968 = vst.msk [vmem:[#allocation3 + $0x58] sm:$0xff] %vm26_vm1, %v951_v31  ;;  %v4427_v48 = vsub.f32 8.0, %v1539_v1  ;;  %v4429_v51 = vmul.f32 -1.0, %v2004_v61 }
 0x262   :  { %v1772_v17 = vmul.f32 %v1771_v16, %v1714_v38  ;;  %v2076_v26 = vmul.f32 %v2075_v15, %v2018_v3  ;;  %v1699_v10 = vsub.f32 %v4216_v33, %v1683_v49  ;;  %v2003_v21 = vsub.f32 %v5641_v63, %v1987_v60  ;;  %v1541_v33 = vld [vmem:[#allocation4 + $0x28] sm:$0xff] }
 0x263   :  { %2530 = vrcp.f32 %v4398_v40  ;;  %v4440_v30 = vmul.f32 -1.0, %v1704_v8  ;;  %v1797_v5 = vand.u32 2147483647, %v4398_v40  ;;  %v5642_v41 = vsub.f32 %v4207_v32, %v4211_v45 }
 0x264   :  { %1970 = vst.msk [vmem:[%s5339_s5 + $0x10] sm:$0xff] %vm26_vm1, %v1772_v17  ;;  %2532 = vrcp.f32 %v4400_v37  ;;  %v4450_v46 = vmul.f32 -1.0, %v1702_v29  ;;  %v4452_v55 = vmul.f32 -1.0, %v2006_v25  ;;  %v1799_v43 = vand.u32 2147483648, %v4398_v40 }
 0x265   :  { %2274 = vst.msk [vmem:[%s5340_s6 + $0x10] sm:$0xff] %vm26_vm1, %v2076_v26  ;;  %2534 = vrcp.f32 %v4402_v19  ;;  %v4448_v14 = vsub.f32 %v5642_v41, %v1989_v23  ;;  %v4455_v16 = vmul.f32 -1.0, %v1701_v59  ;;  %v2101_v15 = vand.u32 2147483647, %v4400_v37 }
 0x266   :  { %2536 = vlog2.f32 %v1482_v12  ;;  %v2103_v11 = vand.u32 2147483648, %v4400_v37  ;;  %v4460_v34 = vmul.f32 -1.0, %v1699_v10  ;;  %v4462_v32 = vmul.f32 -1.0, %v2003_v21  ;;  %v4496_v24 = vpop.xlane.xlu1 %1403  ;;  %v4508_v12 = vpop.xlane.xlu2 %1407  ;;  %v1542_v41 = vld [vmem:[#allocation4 + $0x30] sm:$0xff] }
 0x267   :  { %2538 = vrcp.f32 %v4427_v48  ;;  %v4464_v45 = vmul.f32 0.6931472, %v2529_v2  ;;  %vm1793_vm13 = vweird.f32 %v4398_v40  ;;  %vm4468_vm0 = vcmp.eq.f32.partialorder %v1797_v5, 8.507059e+37 }
 0x268   :  { %vm2097_vm11 = vweird.f32 %v4400_v37  ;;  %v4473_v0 = vadd.f32 -1.0, %v1541_v33  ;;  %v1800_v13 = vor.u32 1.1754944e-38, %v1799_v43  ;;  %vm1778_vm12 = vweird.f32 %v4402_v19  ;;  %v4519_v43 = vpop.xlane.xlu0 %1411 }
 0x269   :  { %v2531_v58 = vpop.eup %2530  ;;  %v1782_v36 = vand.u32 2147483647, %v4402_v19  ;;  %vm4480_vm15 = vcmp.eq.f32.partialorder %v2101_v15, 8.507059e+37  ;;  %v2104_v42 = vor.u32 1.1754944e-38, %v2103_v11  ;;  %v1784_v9 = vand.u32 2147483648, %v4402_v19 }
 0x26a   :  { %v2533_v53 = vpop.eup %2532  ;;  %v1789_v61 = vmul.f32 %v2531_v58, %v4398_v40  ;;  %v4486_v52 = vsub.f32 8.0, %v1541_v33  ;;  %2540 = vrcp.f32 %v4473_v0  ;;  %vm1794_vm4 = vweird.f32 %v2531_v58 }
 0x26b   :  { %v2535_v54 = vpop.eup %2534  ;;  %v2093_v7 = vmul.f32 %v2533_v53, %v4400_v37  ;;  %v2086_v38 = vand.u32 2147483647, %v4427_v48  ;;  %vm2098_vm10 = vweird.f32 %v2533_v53  ;;  %vm4490_vm7 = vcmp.eq.f32.partialorder %v1782_v36, 8.507059e+37  ;;  %vm1795_vm2 = vmor %vm1793_vm13, %vm1794_vm4 }
 0x26c   :  { %v4478_v62 = vpop.eup %2536  ;;  %v1790_v6 = vsub.f32 1.0, %v1789_v61  ;;  %v1774_v57 = vmul.f32 %v2535_v54, %v4402_v19  ;;  %vm1779_vm9 = vweird.f32 %v2535_v54  ;;  %2542 = vrcp.f32 %v4486_v52  ;;  %vm2099_vm3 = vmor %vm2097_vm11, %vm2098_vm10 }
 0x26d   :  { %v2094_v20 = vsub.f32 1.0, %v2093_v7  ;;  %v2539_v31 = vpop.eup %2538  ;;  %vm2082_vm14 = vweird.f32 %v4427_v48  ;;  %v2088_v28 = vand.u32 2147483648, %v4427_v48  ;;  %v1785_v22 = vor.u32 1.1754944e-38, %v1784_v9  ;;  %vm1780_vm5 = vmor %vm1778_vm12, %vm1779_vm9 }
 0x26e   :  { %v1791_v39 = vmul.f32 %v2531_v58, %v1790_v6  ;;  %v1775_v35 = vsub.f32 1.0, %v1774_v57  ;;  %v2078_v1 = vmul.f32 %v2539_v31, %v4427_v48  ;;  %vm4504_vm6 = vcmp.eq.f32.partialorder %v2086_v38, 8.507059e+37 }
 0x26f   :  { %v2095_v3 = vmul.f32 %v2533_v53, %v2094_v20  ;;  %vm2083_vm8 = vweird.f32 %v2539_v31  ;;  %v2089_v11 = vor.u32 1.1754944e-38, %v2088_v28  ;;  %v1812_v61 = vand.u32 2147483647, %v4473_v0 }
 0x270   :  { %v1792_v60 = vadd.f32 %v2531_v58, %v1791_v39  ;;  %v1776_v8 = vmul.f32 %v2535_v54, %v1775_v35  ;;  %v2079_v26 = vsub.f32 1.0, %v2078_v1  ;;  %v2541_v40 = vpop.eup %2540  ;;  %vm2084_vm13 = vmor %vm2082_vm14, %vm2083_vm8  ;;  %v4539_v7 = vadd.f32 -1.0, %v1542_v41 }
 0x271   :  { %v2096_v17 = vadd.f32 %v2533_v53, %v2095_v3  ;;  %v1804_v5 = vmul.f32 %v2541_v40, %v4473_v0  ;;  %v4547_v6 = vsub.f32 8.0, %v1542_v41  ;;  %vm1808_vm11 = vweird.f32 %v4473_v0  ;;  %v1414_v3 = vpop.xlane.xlu2 %1413 }
 0x272   :  { %v1796_v23 = vsel %vm1795_vm2, %v2531_v58, %v1792_v60  ;;  %v1777_v29 = vadd.f32 %v2535_v54, %v1776_v8  ;;  %v2080_v63 = vmul.f32 %v2539_v31, %v2079_v26  ;;  %v2543_v58 = vpop.eup %2542  ;;  %2544 = vrcp.f32 %v4539_v7 }
 0x273   :  { %v1801_v59 = vsel %vm4468_vm0, %v1800_v13, %v1796_v23  ;;  %v2100_v10 = vsel %vm2099_vm3, %v2533_v53, %v2096_v17  ;;  %v1805_v53 = vsub.f32 1.0, %v1804_v5  ;;  %v2118_v13 = vand.u32 2147483648, %v4486_v52  ;;  %v1383_v5 = vld [vmem:[#allocation4 + $0x50] sm:$0xff] }
 0x274   :  { %v1802_v37 = vmul.f32 %v1801_v59, %v4419_v4  ;;  %v2105_v21 = vsel %vm4480_vm15, %v2104_v42, %v2100_v10  ;;  %v1781_v2 = vsel %vm1780_vm5, %v2535_v54, %v1777_v29  ;;  %v2081_v19 = vadd.f32 %v2539_v31, %v2080_v63  ;;  %v1463_v29 = vld [vmem:[#allocation2 + $0x38] sm:$0xff] }
 0x275   :  { %v2106_v33 = vmul.f32 %v2105_v21, %v4429_v51  ;;  %v1786_v15 = vsel %vm4490_vm7, %v1785_v22, %v1781_v2  ;;  %v1814_v51 = vand.u32 2147483648, %v4473_v0  ;;  %v2108_v54 = vmul.f32 %v2543_v58, %v4486_v52  ;;  %v1380_v10 = vld [vmem:[#allocation4 + $0x38] sm:$0xff] }
 0x276   :  { %1972 = vst.msk [vmem:[%s5339_s5 + $0x20] sm:$0xff] %vm26_vm1, %v1802_v37  ;;  %v1787_v4 = vmul.f32 %v1786_v15, %v4460_v34  ;;  %v2085_v50 = vsel %vm2084_vm13, %v2539_v31, %v2081_v19  ;;  %v1544_v34 = vld [vmem:[#allocation4 + $0x40] sm:$0xff]  ;;  %v1806_v36 = vmul.f32 %v2541_v40, %v1805_v53  ;;  %vm1809_vm0 = vweird.f32 %v2541_v40  ;;  %v1410_v31 = vpop.xlane.xlu1 %1409  ;;  %v1384_v63 = vld [vmem:[#allocation4 + $0x58] sm:$0xff] }
 0x277   :  { %2276 = vst.msk [vmem:[%s5340_s6 + $0x20] sm:$0xff] %vm26_vm1, %v2106_v33  ;;  %v2090_v48 = vsel %vm4504_vm6, %v2089_v11, %v2085_v50  ;;  %v2109_v42 = vsub.f32 1.0, %v2108_v54  ;;  %vm1813_vm12 = vcmp.eq.f32.partialorder %v1812_v61, 8.507059e+37  ;;  %v1815_v20 = vor.u32 1.1754944e-38, %v1814_v51  ;;  %vm1810_vm15 = vmor %vm1808_vm11, %vm1809_vm0  ;;  %v1385_v11 = vld [vmem:[#allocation4 + $0x60] sm:$0xff]  ;;  %v1387_v61 = vld [vmem:[#allocation4 + $0x70] sm:$0xff] }
 0x278   :  { %1971 = vst.msk [vmem:[%s5339_s5 + $0x18] sm:$0xff] %vm26_vm1, %v1787_v4  ;;  %v2091_v56 = vmul.f32 %v2090_v48, %v4462_v32  ;;  %v1807_v57 = vadd.f32 %v2541_v40, %v1806_v36  ;;  %v4552_v9 = vadd.f32 -1.0, %v1544_v34  ;;  %vm2113_vm4 = vweird.f32 %v2543_v58  ;;  %v4569_v23 = vpop.eup %2544 }
 0x279   :  { %v2110_v39 = vmul.f32 %v2543_v58, %v2109_v42  ;;  %v2116_v32 = vand.u32 2147483647, %v4486_v52  ;;  %2546 = vrcp.f32 %v4547_v6  ;;  %vm2112_vm10 = vweird.f32 %v4486_v52  ;;  %v1418_v52 = vpop.xlane.xlu0 %1417 }
 0x27a   :  { %2275 = vst.msk [vmem:[%s5340_s6 + $0x18] sm:$0xff] %vm26_vm1, %v2091_v56  ;;  %v1811_v0 = vsel %vm1810_vm15, %v2541_v40, %v1807_v57  ;;  %v2119_v35 = vor.u32 1.1754944e-38, %v2118_v13  ;;  %v1827_v38 = vand.u32 2147483647, %v4539_v7  ;;  %v1829_v60 = vand.u32 2147483648, %v4539_v7  ;;  %vm2114_vm7 = vmor %vm2112_vm10, %vm2113_vm4 }
 0x27b   :  { %v1816_v49 = vsel %vm1813_vm12, %v1815_v20, %v1811_v0  ;;  %v2111_v1 = vadd.f32 %v2543_v58, %v2110_v39  ;;  %v4563_v8 = vsub.f32 8.0, %v1544_v34  ;;  %v2131_v26 = vand.u32 2147483647, %v4547_v6  ;;  %v1386_v34 = vld [vmem:[#allocation4 + $0x68] sm:$0xff]  ;;  %v1420_v39 = vpop.xlane.xlu2 %1419 }
 0x27c   :  { %v1817_v17 = vmul.f32 %v1816_v49, %v4455_v16  ;;  %v2133_v28 = vand.u32 2147483648, %v4547_v6  ;;  %2548 = vrcp.f32 %v4552_v9  ;;  %v2021_v22 = vmul.f32 -1.0, %v4448_v14  ;;  %v1382_v14 = vld [vmem:[#allocation4 + $0x48] sm:$0xff] }
 0x27d   :  { %v2115_v25 = vsel %vm2114_vm7, %v2543_v58, %v2111_v1  ;;  %vm2117_vm9 = vcmp.eq.f32.partialorder %v2116_v32, 8.507059e+37  ;;  %2550 = vrcp.f32 %v4563_v8  ;;  %v4574_v40 = vadd.f32 %v4464_v45, %v1463_v29 }
 0x27e   :  { %1973 = vst.msk [vmem:[%s5339_s5 + $0x28] sm:$0xff] %vm26_vm1, %v1817_v17  ;;  %v2120_v16 = vsel %vm2117_vm9, %v2119_v35, %v2115_v25  ;;  %v1819_v59 = vmul.f32 %v4569_v23, %v4539_v7  ;;  %vm1823_vm2 = vweird.f32 %v4539_v7  ;;  %vm4585_vm14 = vcmp.eq.f32.partialorder %v1827_v38, 8.507059e+37  ;;  %v1416_v48 = vpop.xlane.xlu1 %1415  ;;  %v1303_v17 = vld [vmem:[#allocation8 + $0x50] sm:$0xff] }
 0x27f   :  { %v4583_v37 = vpop.eup %2546  ;;  %v2121_v21 = vmul.f32 %v2120_v16, %v2021_v22  ;;  %v1830_v2 = vor.u32 1.1754944e-38, %v1829_v60  ;;  %vm2127_vm3 = vweird.f32 %v4547_v6  ;;  %vm4592_vm6 = vcmp.eq.f32.partialorder %v2131_v26, 8.507059e+37 }
 0x280   :  { %v1820_v41 = vsub.f32 1.0, %v1819_v59  ;;  %v2123_v33 = vmul.f32 %v4583_v37, %v4547_v6  ;;  %v2134_v19 = vor.u32 1.1754944e-38, %v2133_v28  ;;  %vm1853_vm5 = vweird.f32 %v4552_v9 }
 0x281   :  { %2277 = vst.msk [vmem:[%s5340_s6 + $0x28] sm:$0xff] %vm26_vm1, %v2121_v21  ;;  %v1428_v58 = vadd.f32 %v4496_v24, %v1380_v10  ;;  %v1430_v4 = vadd.f32 %v4508_v12, %v1382_v14  ;;  %v1432_v53 = vadd.f32 %v4519_v43, %v1384_v63  ;;  %vm1824_vm8 = vweird.f32 %v4569_v23  ;;  %v1330_v7 = vpop.xlane.xlu0 %1329 }
 0x282   :  { %v4604_v51 = vpop.eup %2548  ;;  %v1821_v50 = vmul.f32 %v4569_v23, %v1820_v41  ;;  %v2124_v54 = vsub.f32 1.0, %v2123_v33  ;;  %v1431_v13 = vadd.f32 %v1410_v31, %v1383_v5  ;;  %vm2128_vm13 = vweird.f32 %v4583_v37  ;;  %v1388_v31 = vld [vmem:[#allocation4 + $0x78] sm:$0xff]  ;;  %vm1825_vm0 = vmor %vm1823_vm2, %vm1824_vm8  ;;  %v1484_v5 = vld [vmem:[#allocation3 + $0x60] sm:$0xff] }
 0x283   :  { %v4608_v36 = vpop.eup %2550  ;;  %v1849_v24 = vmul.f32 %v4604_v51, %v4552_v9  ;;  %v1857_v12 = vand.u32 2147483647, %v4552_v9  ;;  %1444 = vst.msk [vmem:[#allocation4 + $0x38] sm:$0xff] %vm26_vm1, %v1428_v58  ;;  %v1433_v43 = vadd.f32 %v1414_v3, %v1385_v11  ;;  %v1435_v20 = vadd.f32 %v1418_v52, %v1387_v61  ;;  %vm2129_vm11 = vmor %vm2127_vm3, %vm2128_vm13  ;;  %v1591_v11 = vld [vmem:[#allocation5 + $0x38] sm:$0xff]  ;;  %v1485_v58 = vld [vmem:[#allocation3 + $0x68] sm:$0xff] }
 0x284   :  { %v1822_v56 = vadd.f32 %v4569_v23, %v1821_v50  ;;  %v2125_v42 = vmul.f32 %v4583_v37, %v2124_v54  ;;  %v2153_v57 = vmul.f32 %v4608_v36, %v4563_v8  ;;  %1446 = vst.msk [vmem:[#allocation4 + $0x48] sm:$0xff] %vm26_vm1, %v1430_v4  ;;  %v1859_v0 = vand.u32 2147483648, %v4552_v9  ;;  %v4684_v61 = vld [vmem:[#allocation7 + $0x48] sm:$0xff]  ;;  %v1486_v50 = vld [vmem:[#allocation3 + $0x70] sm:$0xff] }
 0x285   :  { %v1850_v32 = vsub.f32 1.0, %v1849_v24  ;;  %v2161_v35 = vand.u32 2147483647, %v4563_v8  ;;  %1448 = vst.msk [vmem:[#allocation4 + $0x58] sm:$0xff] %vm26_vm1, %v1432_v53  ;;  %v1434_v38 = vadd.f32 %v1416_v48, %v1386_v34  ;;  %v2163_v60 = vand.u32 2147483648, %v4563_v8  ;;  %v4702_v24 = vld [vmem:[#allocation5 + $0x48] sm:$0xff] }
 0x286   :  { %v1826_v3 = vsel %vm1825_vm0, %v4569_v23, %v1822_v56  ;;  %v2126_v49 = vadd.f32 %v4583_v37, %v2125_v42  ;;  %v2154_v1 = vsub.f32 1.0, %v2153_v57  ;;  %1447 = vst.msk [vmem:[#allocation4 + $0x50] sm:$0xff] %vm26_vm1, %v1431_v13  ;;  %vm1854_vm12 = vweird.f32 %v4604_v51  ;;  %v1483_v13 = vld [vmem:[#allocation3 + $0x58] sm:$0xff] }
 0x287   :  { %v1831_v26 = vsel %vm4585_vm14, %v1830_v2, %v1826_v3  ;;  %v1851_v28 = vmul.f32 %v4604_v51, %v1850_v32  ;;  %1449 = vst.msk [vmem:[#allocation4 + $0x60] sm:$0xff] %vm26_vm1, %v1433_v43  ;;  %v1436_v52 = vadd.f32 %v1420_v39, %v1388_v31  ;;  %vm2158_vm15 = vweird.f32 %v4608_v36  ;;  %vm1855_vm10 = vmor %vm1853_vm5, %vm1854_vm12  ;;  %v4706_v42 = vld [vmem:[#allocation5 + $0x58] sm:$0xff]  ;;  %v1302_v32 = vld [vmem:[#allocation8 + $0x48] sm:$0xff] }
 0x288   :  { %v1832_v23 = vmul.f32 %v1831_v26, %v4450_v46  ;;  %v2130_v29 = vsel %vm2129_vm11, %v4583_v37, %v2126_v49  ;;  %v2155_v22 = vmul.f32 %v4608_v36, %v2154_v1  ;;  %1451 = vst.msk [vmem:[#allocation4 + $0x70] sm:$0xff] %vm26_vm1, %v1435_v20  ;;  %vm2157_vm4 = vweird.f32 %v4563_v8 }
 0x289   :  { %v2135_v6 = vsel %vm4592_vm6, %v2134_v19, %v2130_v29  ;;  %v1852_v25 = vadd.f32 %v4604_v51, %v1851_v28  ;;  %1450 = vst.msk [vmem:[#allocation4 + $0x68] sm:$0xff] %vm26_vm1, %v1434_v38  ;;  %v1351_v16 = vadd.f32 %v1330_v7, %v1303_v17  ;;  %vm1858_vm7 = vcmp.eq.f32.partialorder %v1857_v12, 8.507059e+37  ;;  %vm2159_vm9 = vmor %vm2157_vm4, %vm2158_vm15 }
 0x28a   :  { %1974 = vst.msk [vmem:[%s5339_s5 + $0x30] sm:$0xff] %vm26_vm1, %v1832_v23  ;;  %v2136_v46 = vmul.f32 %v2135_v6, %v4452_v55  ;;  %v1860_v59 = vor.u32 1.1754944e-38, %v1859_v0  ;;  %v2156_v10 = vadd.f32 %v4608_v36, %v2155_v22  ;;  %v1543_v8 = vld [vmem:[#allocation4 + $0x38] sm:$0xff]  ;;  %v2164_v63 = vor.u32 1.1754944e-38, %v2163_v60  ;;  %v1465_v0 = vld [vmem:[#allocation2 + $0x48] sm:$0xff] }
 0x28b   :  { %v1856_v14 = vsel %vm1855_vm10, %v4604_v51, %v1852_v25  ;;  %v4663_v37 = vadd.f32 -1.0, %v1543_v8  ;;  %v4665_v21 = vsub.f32 8.0, %v1543_v8  ;;  %1452 = vst.msk [vmem:[#allocation4 + $0x78] sm:$0xff] %vm26_vm1, %v1436_v52  ;;  %v1623_v55 = vld [vmem:[#allocation7 + $0x38] sm:$0xff]  ;;  %v1687_v9 = vmul.f32 %v4332_v44, %v4574_v40  ;;  %v1545_v53 = vld [vmem:[#allocation4 + $0x48] sm:$0xff] }
 0x28c   :  { %2278 = vst.msk [vmem:[%s5340_s6 + $0x30] sm:$0xff] %vm26_vm1, %v2136_v46  ;;  %v1861_v45 = vsel %vm1858_vm7, %v1860_v59, %v1856_v14  ;;  %v2160_v2 = vsel %vm2159_vm9, %v4608_v36, %v2156_v10  ;;  %vm2162_vm2 = vcmp.eq.f32.partialorder %v2161_v35, 8.507059e+37  ;;  %v5655_v41 = vsub.f32 %v4327_v47, %v4332_v44  ;;  %v4690_v47 = vld [vmem:[#allocation7 + $0x60] sm:$0xff]  ;;  %v1487_v44 = vld [vmem:[#allocation3 + $0x78] sm:$0xff]  ;;  %v1466_v35 = vld [vmem:[#allocation2 + $0x50] sm:$0xff] }
 0x28d   :  { %v1862_v15 = vmul.f32 %v1861_v45, %v4440_v30  ;;  %v2165_v19 = vsel %vm2162_vm2, %v2164_v63, %v2160_v2  ;;  %2552 = vrcp.f32 %v4663_v37  ;;  %1367 = vst.msk [vmem:[#allocation8 + $0x50] sm:$0xff] %vm26_vm1, %v1351_v16  ;;  %v1639_v51 = vsub.f32 %v1623_v55, %v1591_v11  ;;  %v1547_v30 = vld [vmem:[#allocation4 + $0x58] sm:$0xff]  ;;  %v1546_v48 = vld [vmem:[#allocation4 + $0x50] sm:$0xff]  ;;  %v4700_v36 = vld [vmem:[#allocation5 + $0x60] sm:$0xff] }
 0x28e   :  { %v1991_v33 = vmul.f32 %v5655_v41, %v4574_v40  ;;  %v2166_v4 = vmul.f32 %v2165_v19, %v4442_v27  ;;  %2554 = vrcp.f32 %v4665_v21  ;;  %5656 = vst [vmem:[#allocation22_spill] sm:$0xff] %v4684_v61  ;;  %v4696_v27 = vld [vmem:[#allocation7 + $0x58] sm:$0xff]  ;;  %v1703_v40 = vsub.f32 %v1591_v11, %v1687_v9  ;;  %v1548_v8 = vld [vmem:[#allocation4 + $0x60] sm:$0xff]  ;;  %v4735_v63 = vld [vmem:[#allocation6 + $0x50] sm:$0xff] }
 0x28f   :  { %1976 = vst.msk [vmem:[%s5339_s5 + $0x40] sm:$0xff] %vm26_vm1, %v1862_v15  ;;  %2556 = vlog2.f32 %v1484_v5  ;;  %v4698_v34 = vadd.f32 -1.0, %v1545_v53  ;;  %v1507_v12 = vmul.f32 0.6931472, %v4393_v18  ;;  %v1509_v43 = vmul.f32 0.6931472, %v4478_v62 }
 0x290   :  { %5657 = vst [vmem:[#allocation25_spill] sm:$0xff] %v4690_v47  ;;  %2558 = vlog2.f32 %v1485_v58  ;;  %v2007_v54 = vsub.f32 %v1639_v51, %v1991_v33  ;;  %v4712_v31 = vadd.f32 -1.0, %v1547_v30  ;;  %v4717_v62 = vadd.f32 -1.0, %v1546_v48  ;;  %v4749_v33 = vld [vmem:[#allocation7 + $0x50] sm:$0xff]  ;;  %v4761_v51 = vld [vmem:[#allocation6 + $0x48] sm:$0xff] }
 0x291   :  { %2280 = vst.msk [vmem:[%s5340_s6 + $0x40] sm:$0xff] %vm26_vm1, %v2166_v4  ;;  %2560 = vlog2.f32 %v1486_v50  ;;  %v1719_v38 = vmul.f32 -1.0, %v1703_v40  ;;  %v4721_v17 = vsub.f32 8.0, %v1545_v53  ;;  %v4723_v7 = vadd.f32 %v1509_v43, %v1466_v35  ;;  %v4759_v53 = vld [vmem:[#allocation5 + $0x50] sm:$0xff]  ;;  %v4763_v50 = vld [vmem:[#allocation7 + $0x68] sm:$0xff] }
 0x292   :  { %5658 = vst [vmem:[#allocation19_spill] sm:$0xff] %v4696_v27  ;;  %2562 = vlog2.f32 %v1487_v44  ;;  %v2023_v3 = vmul.f32 -1.0, %v2007_v54  ;;  %v4725_v26 = vadd.f32 %v1507_v12, %v1465_v0  ;;  %v1842_v52 = vand.u32 2147483647, %v4663_v37  ;;  %v1550_v35 = vld [vmem:[#allocation4 + $0x70] sm:$0xff] }
 0x293   :  { %5659 = vst [vmem:[#allocation9_spill] sm:$0xff] %v4700_v36  ;;  %v2553_v56 = vpop.eup %2552  ;;  %2564 = vlog2.f32 %v1483_v13  ;;  %v1844_v23 = vand.u32 2147483648, %v4663_v37  ;;  %v2148_v25 = vand.u32 2147483648, %v4665_v21  ;;  %v2146_v59 = vand.u32 2147483647, %v4665_v21 }
 0x294   :  { %v2555_v39 = vpop.eup %2554  ;;  %v1834_v18 = vmul.f32 %v2553_v56, %v4663_v37  ;;  %2566 = vrcp.f32 %v4698_v34  ;;  %vm1839_vm14 = vweird.f32 %v2553_v56  ;;  %v4733_v10 = vsub.f32 8.0, %v1547_v30  ;;  %5660 = vst [vmem:[#allocation12_spill] sm:$0xff] %v4763_v50 }
 0x295   :  { %v2138_v49 = vmul.f32 %v2555_v39, %v4665_v21  ;;  %v2557_v1 = vpop.eup %2556  ;;  %2568 = vrcp.f32 %v4712_v31  ;;  %vm2143_vm3 = vweird.f32 %v2555_v39  ;;  %vm1838_vm6 = vweird.f32 %v4663_v37 }
 0x296   :  { %v1835_v60 = vsub.f32 1.0, %v1834_v18  ;;  %v2559_v28 = vpop.eup %2558  ;;  %2570 = vrcp.f32 %v4717_v62  ;;  %v4739_v9 = vsub.f32 8.0, %v1546_v48  ;;  %vm1840_vm5 = vmor %vm1838_vm6, %vm1839_vm14  ;;  %v1845_v2 = vor.u32 1.1754944e-38, %v1844_v23 }
 0x297   :  { %v2139_v29 = vsub.f32 1.0, %v2138_v49  ;;  %v2561_v22 = vpop.eup %2560  ;;  %2572 = vrcp.f32 %v4721_v17  ;;  %vm2142_vm8 = vweird.f32 %v4665_v21  ;;  %v4747_v41 = vmul.f32 %v4735_v63, %v4723_v7 }
 0x298   :  { %v1836_v6 = vmul.f32 %v2553_v56, %v1835_v60  ;;  %v2563_v16 = vpop.eup %2562  ;;  %vm1843_vm13 = vcmp.eq.f32.partialorder %v1842_v52, 8.507059e+37  ;;  %vm2144_vm0 = vmor %vm2142_vm8, %vm2143_vm3  ;;  %v2149_v37 = vor.u32 1.1754944e-38, %v2148_v25  ;;  %v4752_v19 = vadd.f32 -1.0, %v1548_v8  ;;  %v1549_v60 = vld [vmem:[#allocation4 + $0x68] sm:$0xff] }
 0x299   :  { %v2140_v46 = vmul.f32 %v2555_v39, %v2139_v29  ;;  %v2565_v14 = vpop.eup %2564  ;;  %vm2147_vm11 = vcmp.eq.f32.partialorder %v2146_v59, 8.507059e+37  ;;  %2574 = vrcp.f32 %v4733_v10  ;;  %v4770_v13 = vmul.f32 0.6931472, %v2557_v1  ;;  %v4815_v59 = vld [vmem:[#allocation4 + $0x78] sm:$0xff]  ;;  %v1658_v29 = vld [vmem:[#allocation8 + $0x50] sm:$0xff] }
 0x29a   :  { %v1837_v55 = vadd.f32 %v2553_v56, %v1836_v6  ;;  %v4741_v45 = vpop.eup %2566  ;;  %2576 = vrcp.f32 %v4739_v9  ;;  %v4774_v12 = vmul.f32 %v4761_v51, %v4725_v26  ;;  %v4788_v0 = vsub.f32 8.0, %v1548_v8 }
 0x29b   :  { %v2141_v5 = vadd.f32 %v2555_v39, %v2140_v46  ;;  %v4754_v11 = vpop.eup %2568  ;;  %v1864_v40 = vmul.f32 %v4741_v45, %v4698_v34  ;;  %2578 = vrcp.f32 %v4752_v19  ;;  %v1874_v49 = vand.u32 2147483648, %v4698_v34 }
 0x29c   :  { %v1841_v15 = vsel %vm1840_vm5, %v2553_v56, %v1837_v55  ;;  %v4757_v21 = vpop.eup %2570  ;;  %v4778_v56 = vld [vmem:[#allocation5 + $0x68] sm:$0xff]  ;;  %5661 = vst [vmem:[#allocation10_spill] sm:$0xff] %v4788_v0  ;;  %v1894_v1 = vmul.f32 %v4754_v11, %v4712_v31  ;;  %v4804_v52 = vmul.f32 0.6931472, %v2565_v14  ;;  %v4813_v46 = vadd.f32 -1.0, %v1550_v35 }
 0x29d   :  { %v1846_v58 = vsel %vm1843_vm13, %v1845_v2, %v1841_v15  ;;  %v2145_v4 = vsel %vm2144_vm0, %v2555_v39, %v2141_v5  ;;  %v4776_v43 = vpop.eup %2572  ;;  %v4780_v39 = vmul.f32 0.6931472, %v2559_v28  ;;  %v1879_v18 = vmul.f32 %v4757_v21, %v4717_v62 }
 0x29e   :  { %v1847_v44 = vmul.f32 %v1846_v58, %v1719_v38  ;;  %v2150_v30 = vsel %vm2147_vm11, %v2149_v37, %v2145_v4  ;;  %v4802_v28 = vmul.f32 0.6931472, %v2563_v16  ;;  %v1865_v23 = vsub.f32 1.0, %v1864_v40 }
 0x29f   :  { %v2151_v48 = vmul.f32 %v2150_v30, %v2023_v3  ;;  %v4793_v3 = vmul.f32 0.6931472, %v2561_v22  ;;  %v4808_v22 = vpop.eup %2574  ;;  %v2168_v25 = vmul.f32 %v4776_v43, %v4721_v17  ;;  %v1904_v14 = vand.u32 2147483648, %v4712_v31 }
 0x2a0   :  { %1975 = vst.msk [vmem:[%s5339_s5 + $0x38] sm:$0xff] %vm26_vm1, %v1847_v44  ;;  %v4819_v8 = vpop.eup %2576  ;;  %v1880_v55 = vsub.f32 1.0, %v1879_v18  ;;  %2580 = vrcp.f32 %v4788_v0  ;;  %v4823_v2 = vadd.f32 -1.0, %v1549_v60  ;;  %v4825_v5 = vor.u32 1.1754944e-38, %v1874_v49 }
 0x2a1   :  { %5662 = vst [vmem:[#allocation21_spill] sm:$0xff] %v4793_v3  ;;  %v1895_v15 = vsub.f32 1.0, %v1894_v1  ;;  %v1887_v37 = vand.u32 2147483647, %v4717_v62  ;;  %2582 = vrcp.f32 %v4813_v46  ;;  %v4829_v58 = vpop.eup %2578  ;;  %v1866_v4 = vmul.f32 %v4741_v45, %v1865_v23 }
 0x2a2   :  { %2279 = vst.msk [vmem:[%s5340_s6 + $0x38] sm:$0xff] %vm26_vm1, %v2151_v48  ;;  %v2198_v30 = vmul.f32 %v4808_v22, %v4733_v10  ;;  %v4836_v40 = vadd.f32 -1.0, %v4815_v59  ;;  %v2169_v48 = vsub.f32 1.0, %v2168_v25  ;;  %v1889_v18 = vand.u32 2147483648, %v4717_v62 }
 0x2a3   :  { %5663 = vst [vmem:[#allocation34_spill] sm:$0xff] %v4802_v28  ;;  %v2183_v49 = vmul.f32 %v4819_v8, %v4739_v9  ;;  %2584 = vrcp.f32 %v4823_v2  ;;  %v4842_v1 = vor.u32 1.1754944e-38, %v1904_v14  ;;  %v1881_v23 = vmul.f32 %v4757_v21, %v1880_v55  ;;  %v5707_v3 = vld [vmem:[#allocation10_spill] sm:$0xff] }
 0x2a4   :  { %vm1883_vm12 = vweird.f32 %v4717_v62  ;;  %v4846_v20 = vsub.f32 8.0, %v1550_v35  ;;  %v1896_v38 = vmul.f32 %v4754_v11, %v1895_v15  ;;  %vm4849_vm15 = vcmp.eq.f32.partialorder %v1887_v37, 8.507059e+37 }
 0x2a5   :  { %v1909_v25 = vmul.f32 %v4829_v58, %v4752_v19  ;;  %v4855_v57 = vsub.f32 8.0, %v1549_v60  ;;  %v4860_v14 = vadd.f32 %v4741_v45, %v1866_v4  ;;  %v2199_v55 = vsub.f32 1.0, %v2198_v30 }
 0x2a6   :  { %v4857_v16 = vpop.eup %2580  ;;  %v1919_v35 = vand.u32 2147483648, %v4752_v19  ;;  %2586 = vrcp.f32 %v4836_v40  ;;  %v4867_v37 = vmul.f32 %v4776_v43, %v2169_v48  ;;  %vm1884_vm4 = vweird.f32 %v4757_v21 }
 0x2a7   :  { %v4864_v15 = vpop.eup %2582  ;;  %v1890_v54 = vor.u32 1.1754944e-38, %v1889_v18  ;;  %v2184_v60 = vsub.f32 1.0, %v2183_v49  ;;  %vm1869_vm10 = vweird.f32 %v4741_v45  ;;  %v1882_v44 = vadd.f32 %v4757_v21, %v1881_v23  ;;  %vm4898_vm14 = vmor %vm1883_vm12, %vm1884_vm4 }
 0x2a8   :  { %vm2187_vm7 = vweird.f32 %v4739_v9  ;;  %v1949_v30 = vand.u32 2147483648, %v4813_v46  ;;  %2588 = vrcp.f32 %v4846_v20  ;;  %v4879_v48 = vadd.f32 %v4754_v11, %v1896_v38 }
 0x2a9   :  { %v4876_v6 = vpop.eup %2584  ;;  %v1910_v18 = vsub.f32 1.0, %v1909_v25  ;;  %v2213_v49 = vmul.f32 %v4857_v16, %v4788_v0  ;;  %2590 = vrcp.f32 %v4855_v57  ;;  %vm1868_vm9 = vweird.f32 %v4698_v34 }
 0x2aa   :  { %v4886_v23 = vmul.f32 %v4808_v22, %v2199_v55  ;;  %v4888_v4 = vor.u32 1.1754944e-38, %v1919_v35  ;;  %v1939_v47 = vmul.f32 %v4864_v15, %v4813_v46  ;;  %v1934_v28 = vand.u32 2147483648, %v4823_v2  ;;  %vm4986_vm11 = vmor %vm1868_vm9, %vm1869_vm10 }
 0x2ab   :  { %vm1899_vm2 = vweird.f32 %v4754_v11  ;;  %v2185_v25 = vmul.f32 %v4819_v8, %v2184_v60  ;;  %v1924_v35 = vmul.f32 %v4876_v6, %v4823_v2  ;;  %v1674_v50 = vsub.f32 %v1658_v29, %v4735_v63 }
 0x2ac   :  { %5666 = vst [vmem:[#allocation26_spill] sm:$0xff] %v4888_v4  ;;  %v4907_v27 = vpop.eup %2586  ;;  %v5669_v4 = vand.u32 2147483647, %v4698_v34  ;;  %v4915_v62 = vor.u32 1.1754944e-38, %v1949_v30  ;;  %v4918_v36 = vsub.f32 8.0, %v4815_v59  ;;  %v5673_v60 = vsub.f32 %v4759_v53, %v4747_v41  ;;  %v1467_v41 = vld [vmem:[#allocation2 + $0x58] sm:$0xff] }
 0x2ad   :  { %v1886_v63 = vsel %vm4898_vm14, %v4757_v21, %v1882_v44  ;;  %vm1898_vm6 = vweird.f32 %v4712_v31  ;;  %v1911_v29 = vmul.f32 %v4829_v58, %v1910_v18  ;;  %v1932_v0 = vand.u32 2147483647, %v4823_v2 }
 0x2ae   :  { %vm4911_vm3 = vcmp.eq.f32.partialorder %v5669_v4, 8.507059e+37  ;;  %5672 = vst [vmem:[#allocation30_spill] sm:$0xff] %v4915_v62  ;;  %v1722_v55 = vmul.f32 -1.0, %v5673_v60  ;;  %v2214_v4 = vsub.f32 1.0, %v2213_v49  ;;  %v1891_v30 = vsel %vm4849_vm15, %v1890_v54, %v1886_v63  ;;  %v4931_v59 = vpop.eup %2588  ;;  %v1328_v54 = vpop.xlane.xlu1 %1327  ;;  %vm5018_vm9 = vmor %vm1898_vm6, %vm1899_vm2 }
 0x2af   :  { %v1940_v62 = vsub.f32 1.0, %v1939_v47  ;;  %v4933_v61 = vor.u32 1.1754944e-38, %v1934_v28  ;;  %v4936_v38 = vpop.eup %2590  ;;  %v1925_v21 = vsub.f32 1.0, %v1924_v35  ;;  %v1954_v44 = vmul.f32 %v4907_v27, %v4836_v40 }
 0x2b0   :  { %v1892_v60 = vmul.f32 %v1891_v30, %v1722_v55  ;;  %v1994_v18 = vmul.f32 %v1674_v50, %v4723_v7  ;;  %v2186_v49 = vadd.f32 %v4819_v8, %v2185_v25  ;;  %2592 = vrcp.f32 %v4918_v36  ;;  %v1336_v30 = vpop.xlane.xlu0 %1335 }
 0x2b1   :  { %vm2188_vm5 = vweird.f32 %v4819_v8  ;;  %v2191_v47 = vand.u32 2147483647, %v4739_v9  ;;  %v5674_v28 = vand.u32 2147483647, %v4712_v31  ;;  %v4957_v50 = vadd.f32 %v4829_v58, %v1911_v29 }
 0x2b2   :  { %1978 = vst.msk [vmem:[%s5339_s5 + $0x50] sm:$0xff] %vm26_vm1, %v1892_v60  ;;  %v4960_v25 = vmul.f32 %v4857_v16, %v2214_v4  ;;  %v5677_v55 = vsub.f32 %v4749_v33, %v4759_v53  ;;  %vm4967_vm13 = vmor %vm2187_vm7, %vm2188_vm5  ;;  %v2193_v60 = vand.u32 2147483648, %v4739_v9  ;;  %vm1928_vm0 = vweird.f32 %v4823_v2 }
 0x2b3   :  { %vm4952_vm8 = vcmp.eq.f32.partialorder %v5674_v28, 8.507059e+37  ;;  %v4974_v28 = vmul.f32 %v4931_v59, %v4846_v20  ;;  %v2228_v29 = vmul.f32 %v4936_v38, %v4855_v57  ;;  %v2190_v33 = vsel %vm4967_vm13, %v4819_v8, %v2186_v49 }
 0x2b4   :  { %v2010_v35 = vsub.f32 %v5677_v55, %v1994_v18  ;;  %v1350_v53 = vadd.f32 %v1328_v54, %v1302_v32  ;;  %vm2172_vm12 = vweird.f32 %v4721_v17  ;;  %v1941_v4 = vmul.f32 %v4864_v15, %v1940_v62  ;;  %v5002_v32 = vld [vmem:[#allocation6 + $0x58] sm:$0xff] }
 0x2b5   :  { %v1926_v18 = vmul.f32 %v4876_v6, %v1925_v21  ;;  %v1955_v55 = vsub.f32 1.0, %v1954_v44  ;;  %v2194_v63 = vor.u32 1.1754944e-38, %v2193_v60  ;;  %vm1914_vm15 = vweird.f32 %v4829_v58 }
 0x2b6   :  { %v2026_v8 = vmul.f32 -1.0, %v2010_v35  ;;  %vm2192_vm4 = vcmp.eq.f32.partialorder %v2191_v47, 8.507059e+37  ;;  %v5682_v34 = vsub.f32 %v4702_v24, %v4774_v12  ;;  %1366 = vst.msk [vmem:[#allocation8 + $0x48] sm:$0xff] %vm26_vm1, %v1350_v53  ;;  %v1871_v62 = vsel %vm4986_vm11, %v4741_v45, %v4860_v14  ;;  %v5012_v54 = vpop.eup %2592  ;;  %v1332_v47 = vpop.xlane.xlu2 %1331  ;;  %v1306_v35 = vld [vmem:[#allocation8 + $0x68] sm:$0xff]  ;;  %v1305_v45 = vld [vmem:[#allocation8 + $0x60] sm:$0xff] }
 0x2b7   :  { %vm2202_vm10 = vweird.f32 %v4733_v10  ;;  %vm1929_vm7 = vweird.f32 %v4876_v6  ;;  %v2195_v21 = vsel %vm2192_vm4, %v2194_v63, %v2190_v33  ;;  %v1876_v44 = vsel %vm4911_vm3, %v4825_v5, %v1871_v62  ;;  %v1304_v63 = vld [vmem:[#allocation8 + $0x58] sm:$0xff] }
 0x2b8   :  { %v1721_v49 = vmul.f32 -1.0, %v5682_v34  ;;  %v5010_v12 = vadd.f32 %v4804_v52, %v1467_v41  ;;  %vm1913_vm14 = vweird.f32 %v4752_v19  ;;  %v2244_v14 = vsub.f32 1.0, %v4974_v28  ;;  %vm5078_vm11 = vmor %vm1928_vm0, %vm1929_vm7 }
 0x2b9   :  { %vm5024_vm5 = vcmp.eq.f32.partialorder %v1932_v0, 8.507059e+37  ;;  %v2229_v52 = vsub.f32 1.0, %v2228_v29  ;;  %v2196_v5 = vmul.f32 %v2195_v21, %v2026_v8  ;;  %v5029_v31 = vadd.f32 %v4864_v15, %v1941_v4  ;;  %v1469_v4 = vld [vmem:[#allocation2 + $0x68] sm:$0xff] }
 0x2ba   :  { %v1877_v41 = vmul.f32 %v1876_v44, %v1721_v49  ;;  %v1927_v60 = vadd.f32 %v4876_v6, %v1926_v18  ;;  %v1691_v33 = vmul.f32 %v5002_v32, %v5010_v12  ;;  %v1901_v0 = vsel %vm5018_vm9, %v4754_v11, %v4879_v48  ;;  %v5056_v8 = vld [vmem:[#allocation6 + $0x68] sm:$0xff] }
 0x2bb   :  { %vm1944_vm2 = vweird.f32 %v4864_v15  ;;  %v1956_v29 = vmul.f32 %v4907_v27, %v1955_v55  ;;  %2282 = vst.msk [vmem:[%s5340_s6 + $0x50] sm:$0xff] %vm26_vm1, %v2196_v5  ;;  %v5046_v53 = vadd.f32 %v4776_v43, %v4867_v37  ;;  %vm2173_vm3 = vweird.f32 %v4776_v43 }
 0x2bc   :  { %v2176_v9 = vand.u32 2147483647, %v4721_v17  ;;  %1977 = vst.msk [vmem:[%s5339_s5 + $0x48] sm:$0xff] %vm26_vm1, %v1877_v41  ;;  %v2178_v11 = vand.u32 2147483648, %v4721_v17  ;;  %v1707_v48 = vsub.f32 %v4706_v42, %v1691_v33  ;;  %v1352_v18 = vadd.f32 %v1332_v47, %v1304_v63  ;;  %vm5095_vm0 = vmor %vm2172_vm12, %vm2173_vm3  ;;  %v5210_v17 = vld [vmem:[#allocation5 + $0x70] sm:$0xff] }
 0x2bd   :  { %v1354_v55 = vadd.f32 %v1336_v30, %v1306_v35  ;;  %v5687_v37 = vand.u32 2147483647, %v4752_v19  ;;  %vm1943_vm13 = vweird.f32 %v4813_v46  ;;  %v2230_v49 = vmul.f32 %v4936_v38, %v2229_v52  ;;  %v1657_v52 = vld [vmem:[#allocation8 + $0x48] sm:$0xff]  ;;  %v1468_v30 = vld [vmem:[#allocation2 + $0x60] sm:$0xff]  ;;  %vm5138_vm3 = vmor %vm1913_vm14, %vm1914_vm15 }
 0x2be   :  { %v1906_v62 = vsel %vm4952_vm8, %v4842_v1, %v1901_v0  ;;  %v2201_v21 = vadd.f32 %v4808_v22, %v4886_v23  ;;  %v5072_v44 = vadd.f32 %v4780_v39, %v1469_v4  ;;  %vm2232_vm4 = vweird.f32 %v4855_v57  ;;  %1368 = vst.msk [vmem:[#allocation8 + $0x58] sm:$0xff] %vm26_vm1, %v1352_v18  ;;  %v1334_v23 = vpop.xlane.xlu1 %1333  ;;  %v5705_v18 = vld [vmem:[#allocation22_spill] sm:$0xff] }
 0x2bf   :  { %vm5060_vm6 = vcmp.eq.f32.partialorder %v5687_v37, 8.507059e+37  ;;  %v1723_v7 = vmul.f32 -1.0, %v1707_v48  ;;  %vm2203_vm8 = vweird.f32 %v4808_v22  ;;  %v2206_v1 = vand.u32 2147483647, %v4733_v10  ;;  %1370 = vst.msk [vmem:[#allocation8 + $0x68] sm:$0xff] %vm26_vm1, %v1354_v55 }
 0x2c0   :  { %v2208_v39 = vand.u32 2147483648, %v4733_v10  ;;  %v5088_v41 = vadd.f32 %v4907_v27, %v1956_v29  ;;  %v1673_v2 = vsub.f32 %v1657_v52, %v4761_v51  ;;  %v1693_v47 = vmul.f32 %v5056_v8, %v5072_v44  ;;  %vm5124_vm9 = vmor %vm2202_vm10, %vm2203_vm8 }
 0x2c1   :  { %v1931_v35 = vsel %vm5078_vm11, %v4876_v6, %v1927_v60  ;;  %v2175_v51 = vsel %vm5095_vm0, %v4776_v43, %v5046_v53  ;;  %vm5109_vm7 = vcmp.eq.f32.partialorder %v2176_v9, 8.507059e+37  ;;  %v2179_v33 = vor.u32 1.1754944e-38, %v2178_v11  ;;  %v5132_v11 = vld [vmem:[#allocation6 + $0x60] sm:$0xff]  ;;  %vm5183_vm8 = vmor %vm1943_vm13, %vm1944_vm2 }
 0x2c2   :  { %v1907_v0 = vmul.f32 %v1906_v62, %v1723_v7  ;;  %v5696_v29 = vand.u32 2147483647, %v4813_v46  ;;  %v1993_v6 = vmul.f32 %v1673_v2, %v4725_v26  ;;  %v1709_v60 = vsub.f32 %v4778_v56, %v1693_v47  ;;  %v5709_v2 = vld [vmem:[#allocation21_spill] sm:$0xff] }
 0x2c3   :  { %v5130_v53 = vadd.f32 %v4770_v13, %v1468_v30  ;;  %v1353_v9 = vadd.f32 %v1334_v23, %v1305_v45  ;;  %v2205_v10 = vsel %vm5124_vm9, %v4808_v22, %v2201_v21  ;;  %vm5149_vm10 = vcmp.eq.f32.partialorder %v2206_v1, 8.507059e+37  ;;  %v1470_v21 = vld [vmem:[#allocation2 + $0x70] sm:$0xff] }
 0x2c4   :  { %vm5115_vm12 = vcmp.eq.f32.partialorder %v5696_v29, 8.507059e+37  ;;  %1979 = vst.msk [vmem:[%s5339_s5 + $0x58] sm:$0xff] %vm26_vm1, %v1907_v0  ;;  %v2209_v48 = vor.u32 1.1754944e-38, %v2208_v39  ;;  %v1936_v19 = vsel %vm5024_vm5, %v4933_v61, %v1931_v35  ;;  %vm1959_vm15 = vweird.f32 %v4907_v27  ;;  %v5708_v39 = vld [vmem:[#allocation9_spill] sm:$0xff]  ;;  %v5712_v0 = vld [vmem:[#allocation26_spill] sm:$0xff]  ;;  %v5717_v13 = vld [vmem:[#allocation19_spill] sm:$0xff] }
 0x2c5   :  { %v5706_v55 = vsub.f32 %v5705_v18, %v4702_v24  ;;  %v1725_v62 = vmul.f32 -1.0, %v1709_v60  ;;  %v1692_v45 = vmul.f32 %v5132_v11, %v5130_v53  ;;  %1369 = vst.msk [vmem:[#allocation8 + $0x60] sm:$0xff] %vm26_vm1, %v1353_v9  ;;  %v1916_v22 = vsel %vm5138_vm3, %v4829_v58, %v4957_v50  ;;  %v1659_v7 = vld [vmem:[#allocation8 + $0x58] sm:$0xff]  ;;  %v5177_v50 = vld [vmem:[#allocation6 + $0x70] sm:$0xff]  ;;  %v1338_v9 = vpop.xlane.xlu2 %1337 }
 0x2c6   :  { %vm2217_vm14 = vweird.f32 %v5707_v3  ;;  %v2231_v61 = vadd.f32 %v4936_v38, %v2230_v49  ;;  %vm2233_vm5 = vweird.f32 %v4936_v38  ;;  %v2236_v24 = vand.u32 2147483647, %v4855_v57  ;;  %v1661_v30 = vld [vmem:[#allocation8 + $0x68] sm:$0xff]  ;;  %v1615_v49 = vld [vmem:[#allocation6 + $0x78] sm:$0xff] }
 0x2c7   :  { %v2009_v37 = vsub.f32 %v5706_v55, %v1993_v6  ;;  %v2238_v5 = vand.u32 2147483648, %v4855_v57  ;;  %vm1958_vm11 = vweird.f32 %v4836_v40  ;;  %v1937_v1 = vmul.f32 %v1936_v19, %v1725_v62  ;;  %vm5204_vm2 = vmor %vm2232_vm4, %vm2233_vm5  ;;  %v1307_v57 = vld [vmem:[#allocation8 + $0x70] sm:$0xff] }
 0x2c8   :  { %v1708_v23 = vsub.f32 %v5708_v39, %v1692_v45  ;;  %v5175_v58 = vadd.f32 %v5709_v2, %v1470_v21  ;;  %v2180_v63 = vsel %vm5109_vm7, %v2179_v33, %v2175_v51  ;;  %v2210_v47 = vsel %vm5149_vm10, %v2209_v48, %v2205_v10  ;;  %v1340_v21 = vpop.xlane.xlu1 %1339  ;;  %vm5266_vm0 = vmor %vm1958_vm11, %vm1959_vm15 }
 0x2c9   :  { %v2025_v52 = vmul.f32 -1.0, %v2009_v37  ;;  %v1675_v35 = vsub.f32 %v1659_v7, %v5002_v32  ;;  %v1921_v29 = vsel %vm5060_vm6, %v5712_v0, %v1916_v22  ;;  %v1677_v46 = vsub.f32 %v1661_v30, %v5056_v8  ;;  %1981 = vst.msk [vmem:[%s5339_s5 + $0x68] sm:$0xff] %vm26_vm1, %v1937_v1  ;;  %v5720_v37 = vld [vmem:[#allocation12_spill] sm:$0xff] }
 0x2ca   :  { %v1724_v32 = vmul.f32 -1.0, %v1708_v23  ;;  %v1694_v34 = vmul.f32 %v5177_v50, %v5175_v58  ;;  %v2235_v33 = vsel %vm5204_vm2, %v4936_v38, %v2231_v61  ;;  %vm5216_vm6 = vcmp.eq.f32.partialorder %v2236_v24, 8.507059e+37  ;;  %v1471_v61 = vld [vmem:[#allocation2 + $0x78] sm:$0xff]  ;;  %v5724_v23 = vld [vmem:[#allocation34_spill] sm:$0xff] }
 0x2cb   :  { %v2181_v6 = vmul.f32 %v2180_v63, %v2025_v52  ;;  %v1995_v8 = vmul.f32 %v1675_v35, %v5010_v12  ;;  %v1946_v60 = vsel %vm5183_vm8, %v4864_v15, %v5029_v31  ;;  %v1997_v12 = vmul.f32 %v1677_v46, %v5072_v44  ;;  %v5719_v31 = vld [vmem:[#allocation30_spill] sm:$0xff] }
 0x2cc   :  { %v2239_v26 = vor.u32 1.1754944e-38, %v2238_v5  ;;  %v1922_v38 = vmul.f32 %v1921_v29, %v1724_v32  ;;  %v1710_v10 = vsub.f32 %v5210_v17, %v1694_v34  ;;  %v5718_v48 = vsub.f32 %v5717_v13, %v4706_v42  ;;  %v1660_v18 = vld [vmem:[#allocation8 + $0x60] sm:$0xff]  ;;  %v1599_v32 = vld [vmem:[#allocation5 + $0x78] sm:$0xff] }
 0x2cd   :  { %2281 = vst.msk [vmem:[%s5340_s6 + $0x48] sm:$0xff] %vm26_vm1, %v2181_v6  ;;  %v2216_v15 = vadd.f32 %v4857_v16, %v4960_v25  ;;  %vm2218_vm13 = vweird.f32 %v4857_v16  ;;  %v1951_v55 = vsel %vm5115_vm12, %v5719_v31, %v1946_v60  ;;  %v5721_v44 = vsub.f32 %v5720_v37, %v4778_v56  ;;  %v1308_v25 = vld [vmem:[#allocation8 + $0x78] sm:$0xff]  ;;  %v5727_v29 = vld [vmem:[#allocation25_spill] sm:$0xff] }
 0x2ce   :  { %v2011_v19 = vsub.f32 %v5718_v48, %v1995_v8  ;;  %v1676_v45 = vsub.f32 %v1660_v18, %v5132_v11  ;;  %1980 = vst.msk [vmem:[%s5339_s5 + $0x60] sm:$0xff] %vm26_vm1, %v1922_v38  ;;  %v1726_v42 = vmul.f32 -1.0, %v1710_v10  ;;  %v1355_v22 = vadd.f32 %v1338_v9, %v1307_v57  ;;  %vm5256_vm4 = vmor %vm2217_vm14, %vm2218_vm13 }
 0x2cf   :  { %v2013_v62 = vsub.f32 %v5721_v44, %v1997_v12  ;;  %v2240_v4 = vsel %vm5216_vm6, %v2239_v26, %v2235_v33  ;;  %v2221_v5 = vand.u32 2147483647, %v5707_v3  ;;  %v2223_v56 = vand.u32 2147483648, %v5707_v3  ;;  %v1630_v12 = vld [vmem:[#allocation7 + $0x70] sm:$0xff] }
 0x2d0   :  { %v2027_v24 = vmul.f32 -1.0, %v2011_v19  ;;  %v1996_v11 = vmul.f32 %v1676_v45, %v5130_v53  ;;  %v1952_v1 = vmul.f32 %v1951_v55, %v1726_v42  ;;  %1371 = vst.msk [vmem:[#allocation8 + $0x70] sm:$0xff] %vm26_vm1, %v1355_v22  ;;  %v1535_v2 = vadd.f32 %v5724_v23, %v1471_v61 }
 0x2d1   :  { %v2029_v52 = vmul.f32 -1.0, %v2013_v62  ;;  %v2258_v3 = vmul.f32 %v5012_v54, %v4918_v36  ;;  %v2220_v35 = vsel %vm5256_vm4, %v4857_v16, %v2216_v15  ;;  %v1356_v30 = vadd.f32 %v1340_v21, %v1308_v25  ;;  %v1631_v15 = vld [vmem:[#allocation7 + $0x78] sm:$0xff] }
 0x2d2   :  { %v2211_v63 = vmul.f32 %v2210_v47, %v2027_v24  ;;  %v5728_v6 = vsub.f32 %v5727_v29, %v5708_v39  ;;  %1982 = vst.msk [vmem:[%s5339_s5 + $0x70] sm:$0xff] %vm26_vm1, %v1952_v1  ;;  %v1695_v51 = vmul.f32 %v1615_v49, %v1535_v2  ;;  %v1961_v47 = vsel %vm5266_vm0, %v4907_v27, %v5088_v41 }
 0x2d3   :  { %v2241_v0 = vmul.f32 %v2240_v4, %v2029_v52  ;;  %v5729_v16 = vand.u32 2147483647, %v4836_v40  ;;  %v5730_v34 = vand.u32 2147483648, %v4836_v40  ;;  %v2224_v39 = vor.u32 1.1754944e-38, %v2223_v56  ;;  %1372 = vst.msk [vmem:[#allocation8 + $0x78] sm:$0xff] %vm26_vm1, %v1356_v30 }
 0x2d4   :  { %v2012_v46 = vsub.f32 %v5728_v6, %v1996_v11  ;;  %2283 = vst.msk [vmem:[%s5340_s6 + $0x58] sm:$0xff] %vm26_vm1, %v2211_v63  ;;  %v2245_v33 = vmul.f32 %v4931_v59, %v2244_v14  ;;  %vm2222_vm12 = vcmp.eq.f32.partialorder %v2221_v5, 8.507059e+37  ;;  %v1711_v41 = vsub.f32 %v1599_v32, %v1695_v51 }
 0x2d5   :  { %vm1963_vm7 = vcmp.eq.f32.partialorder %v5729_v16, 8.507059e+37  ;;  %v1965_v8 = vor.u32 1.1754944e-38, %v5730_v34  ;;  %2285 = vst.msk [vmem:[%s5340_s6 + $0x68] sm:$0xff] %vm26_vm1, %v2241_v0  ;;  %v2259_v40 = vsub.f32 1.0, %v2258_v3  ;;  %v2225_v43 = vsel %vm2222_vm12, %v2224_v39, %v2220_v35 }
 0x2d6   :  { %v2028_v27 = vmul.f32 -1.0, %v2012_v46  ;;  %v1727_v9 = vmul.f32 -1.0, %v1711_v41  ;;  %v2246_v28 = vadd.f32 %v4931_v59, %v2245_v33  ;;  %vm2248_vm9 = vweird.f32 %v4931_v59 }
 0x2d7   :  { %v1966_v57 = vsel %vm1963_vm7, %v1965_v8, %v1961_v47  ;;  %v1662_v26 = vld [vmem:[#allocation8 + $0x70] sm:$0xff]  ;;  %v2260_v10 = vmul.f32 %v5012_v54, %v2259_v40  ;;  %v2253_v13 = vand.u32 2147483648, %v4846_v20  ;;  %v1646_v48 = vsub.f32 %v1630_v12, %v5210_v17 }
 0x2d8   :  { %v2226_v60 = vmul.f32 %v2225_v43, %v2028_v27  ;;  %v1678_v14 = vsub.f32 %v1662_v26, %v5177_v50  ;;  %v1967_v38 = vmul.f32 %v1966_v57, %v1727_v9  ;;  %vm2247_vm3 = vweird.f32 %v4846_v20 }
 0x2d9   :  { %v2251_v19 = vand.u32 2147483647, %v4846_v20  ;;  %vm2249_vm10 = vmor %vm2247_vm3, %vm2248_vm9  ;;  %v2254_v37 = vor.u32 1.1754944e-38, %v2253_v13  ;;  %v2261_v17 = vadd.f32 %v5012_v54, %v2260_v10  ;;  %vm2263_vm15 = vweird.f32 %v5012_v54 }
 0x2da   :  { %2284 = vst.msk [vmem:[%s5340_s6 + $0x60] sm:$0xff] %vm26_vm1, %v2226_v60  ;;  %v1998_v18 = vmul.f32 %v1678_v14, %v5175_v58  ;;  %v2250_v50 = vsel %vm2249_vm10, %v4931_v59, %v2246_v28  ;;  %v1663_v55 = vld [vmem:[#allocation8 + $0x78] sm:$0xff]  ;;  %v1647_v20 = vsub.f32 %v1631_v15, %v1599_v32  ;;  %v2268_v62 = vand.u32 2147483648, %v4918_v36 }
 0x2db   :  { %1983 = vst.msk [vmem:[%s5339_s5 + $0x78] sm:$0xff] %vm26_vm1, %v1967_v38  ;;  %v1679_v44 = vsub.f32 %v1663_v55, %v1615_v49  ;;  %vm2252_vm14 = vcmp.eq.f32.partialorder %v2251_v19, 8.507059e+37  ;;  %vm2262_vm5 = vweird.f32 %v4918_v36  ;;  %v2266_v22 = vand.u32 2147483647, %v4918_v36 }
 0x2dc   :  { %v2014_v31 = vsub.f32 %v1646_v48, %v1998_v18  ;;  %v2255_v45 = vsel %vm2252_vm14, %v2254_v37, %v2250_v50  ;;  %vm2264_vm11 = vmor %vm2262_vm5, %vm2263_vm15  ;;  %v2269_v61 = vor.u32 1.1754944e-38, %v2268_v62 }
 0x2dd   :  { %v1999_v42 = vmul.f32 %v1679_v44, %v1535_v2  ;;  %v2265_v21 = vsel %vm2264_vm11, %v5012_v54, %v2261_v17  ;;  %vm2267_vm8 = vcmp.eq.f32.partialorder %v2266_v22, 8.507059e+37 }
 0x2de   :  { %v2030_v58 = vmul.f32 -1.0, %v2014_v31  ;;  %v2270_v4 = vsel %vm2267_vm8, %v2269_v61, %v2265_v21 }
 0x2df   :  { %v2015_v25 = vsub.f32 %v1647_v20, %v1999_v42 }
 0x2e0   :  { %v2256_v59 = vmul.f32 %v2255_v45, %v2030_v58 }
 0x2e1   :  { %v2031_v24 = vmul.f32 -1.0, %v2015_v25 }
 0x2e2   :  { %2286 = vst.msk [vmem:[%s5340_s6 + $0x70] sm:$0xff] %vm26_vm1, %v2256_v59 }
 0x2e3   :  { %v2271_v5 = vmul.f32 %v2270_v4, %v2031_v24 }
 0x2e5   :  { %2287 = vst.msk [vmem:[%s5340_s6 + $0x78] sm:$0xff] %vm26_vm1, %v2271_v5 }

</bundles_post_ra>
